<compile_context>
chip_gen: v7x
topology: tpu7x:2x2x1
jax: 0.10.0
libtpu: 0.0.40
codegen_flags: <defaults>
</compile_context>

<pallas_src>
import functools

import jax
import jax.numpy as jnp
from jax.experimental import pallas as pl
from jax.experimental.pallas import tpu as pltpu

LANE = 128
EXPANSION = 4


def _round_up(x, m):
    return (x + m - 1) // m * m


# -----------------------------------------------------------------------------
# Fused matmul kernel:  out = act( (A @ B) * scale + bias [+ residual] )
# A,B in bf16, f32 VMEM accumulator, store gated to the last K step.
# -----------------------------------------------------------------------------
def _matmul_fused_kernel(*refs, relu, has_res):
    if has_res:
        a_ref, b_ref, s_ref, c_ref, r_ref, o_ref, acc_ref = refs
    else:
        a_ref, b_ref, s_ref, c_ref, o_ref, acc_ref = refs
        r_ref = None
    k = pl.program_id(2)

    @pl.when(k == 0)
    def _():
        acc_ref[...] = jnp.zeros_like(acc_ref)

    acc_ref[...] += jnp.dot(a_ref[...], b_ref[...],
                            preferred_element_type=jnp.float32)

    @pl.when(k == pl.num_programs(2) - 1)
    def _():
        y = acc_ref[...] * s_ref[...] + c_ref[...]
        if has_res:
            y = y + r_ref[...].astype(jnp.float32)
        if relu:
            y = jnp.maximum(y, 0.0)
        o_ref[...] = y.astype(o_ref.dtype)


def matmul_fused(a, b, scale, bias, *, relu, residual=None,
                 out_dtype=jnp.float32):
    """(M,K)@(K,N)*scale+bias [+residual] [ReLU]. K and N multiples of 128."""
    M, K = a.shape
    K2, Nc = b.shape
    assert K == K2 and K % LANE == 0 and Nc % LANE == 0
    Mp = _round_up(M, LANE)
    if Mp != M:
        a = jnp.pad(a, ((0, Mp - M), (0, 0)))
        if residual is not None:
            residual = jnp.pad(residual, ((0, Mp - M), (0, 0)))
    tm = 256 if Mp % 256 == 0 else 128
    tn = 256 if Nc % 256 == 0 else 128
    tk = 256 if K % 256 == 0 else 128
    has_res = residual is not None

    in_specs = [pl.BlockSpec((tm, tk), lambda i, j, k: (i, k)),
                pl.BlockSpec((tk, tn), lambda i, j, k: (k, j)),
                pl.BlockSpec((1, tn), lambda i, j, k: (0, j)),
                pl.BlockSpec((1, tn), lambda i, j, k: (0, j))]
    args = [a.astype(jnp.bfloat16), b.astype(jnp.bfloat16),
            scale.reshape(1, Nc).astype(jnp.float32),
            bias.reshape(1, Nc).astype(jnp.float32)]
    if has_res:
        in_specs.append(pl.BlockSpec((tm, tn), lambda i, j, k: (i, j)))
        args.append(residual)

    out = pl.pallas_call(
        functools.partial(_matmul_fused_kernel, relu=relu, has_res=has_res),
        out_shape=jax.ShapeDtypeStruct((Mp, Nc), out_dtype),
        grid=(Mp // tm, Nc // tn, K // tk),
        in_specs=in_specs,
        out_specs=pl.BlockSpec((tm, tn), lambda i, j, k: (i, j)),
        scratch_shapes=[pltpu.VMEM((tm, tn), jnp.float32)],
        compiler_params=pltpu.CompilerParams(
            dimension_semantics=("parallel", "parallel", "arbitrary")),
    )(*args)
    return out[:M] if Mp != M else out


# -----------------------------------------------------------------------------
# Direct 3x3 conv (stride s, pad 1) + folded BN + ReLU, no im2col in HBM.
# The padded activation is kept flattened per phase; each of the 9 taps is a
# shifted contiguous window of the VMEM-resident block.
# -----------------------------------------------------------------------------
def _conv3x3_kernel(xph_ref, w_ref, s_ref, b_ref, o_ref, acc_ref, *,
                    taps, m_rows, relu):
    acc_ref[...] = jnp.zeros_like(acc_ref)
    for t, (p, off) in enumerate(taps):
        a = xph_ref[0, p, off:off + m_rows, :]          # (m_rows, C) bf16
        acc_ref[...] += jnp.dot(a, w_ref[t],
                                preferred_element_type=jnp.float32)
    y = acc_ref[...] * s_ref[...] + b_ref[...]
    if relu:
        y = jnp.maximum(y, 0.0)
    o_ref[0] = y.astype(o_ref.dtype)


def conv3x3_bn_act(x, w_taps, scale, bias, *, stride, relu=True,
                   out_dtype=jnp.bfloat16):
    """x: (N,H,W,C) bf16 (C mult of 128); w_taps: (9,C,Co) bf16 (tap-major)."""
    N, H, W, C = x.shape
    kh = kw = 3
    pad = 1
    s = stride
    Ho = (H + 2 * pad - kh) // s + 1
    Wo = (W + 2 * pad - kw) // s + 1
    Hq = Ho + (kh - 1) // s
    Wq = Wo + (kw - 1) // s
    Hp = max(H + 2 * pad, s * Hq)
    Wp = max(W + 2 * pad, s * Wq)
    xp = jnp.pad(x, ((0, 0), (pad, Hp - H - pad), (pad, Wp - W - pad), (0, 0)))

    # phase decimation: total bytes == input bytes (no 9x im2col blow-up)
    phases = []
    for py in range(s):
        for px in range(s):
            ph = xp[:, py::s, px::s, :][:, :Hq, :Wq, :]
            phases.append(ph.reshape(N, Hq * Wq, C))
    xph = jnp.stack(phases, axis=1)                      # (N, s*s, Hq*Wq, C)
    extra = (kw - 1) // s
    if extra:
        xph = jnp.pad(xph, ((0, 0), (0, 0), (0, extra), (0, 0)))
    Lq = Hq * Wq + extra

    m_rows = Ho * Wq          # compute Wq-wide rows; edge columns dropped below
    Co = w_taps.shape[-1]
    taps = []
    for dy in range(kh):
        for dx in range(kw):
            taps.append(((dy % s) * s + (dx % s),
                         (dy // s) * Wq + (dx // s)))

    out = pl.pallas_call(
        functools.partial(_conv3x3_kernel, taps=tuple(taps), m_rows=m_rows,
                          relu=relu),
        out_shape=jax.ShapeDtypeStruct((N, m_rows, Co), out_dtype),
        grid=(N,),
        in_specs=[pl.BlockSpec((1, s * s, Lq, C), lambda n: (n, 0, 0, 0)),
                  pl.BlockSpec((kh * kw, C, Co), lambda n: (0, 0, 0)),
                  pl.BlockSpec((1, Co), lambda n: (0, 0)),
                  pl.BlockSpec((1, Co), lambda n: (0, 0))],
        out_specs=pl.BlockSpec((1, m_rows, Co), lambda n: (n, 0, 0)),
        scratch_shapes=[pltpu.VMEM((m_rows, Co), jnp.float32)],
        compiler_params=pltpu.CompilerParams(
            dimension_semantics=("parallel",)),
    )(xph, w_taps, scale.reshape(1, Co).astype(jnp.float32),
      bias.reshape(1, Co).astype(jnp.float32))
    return out.reshape(N, Ho, Wq, Co)[:, :, :Wo, :]


# -----------------------------------------------------------------------------
# Parameters (deterministic) and BN folding
# -----------------------------------------------------------------------------
def _init_bn(key, c):
    k1, k2 = jax.random.split(key)
    gamma = 1.0 + 0.1 * jax.random.normal(k1, (c,), jnp.float32)
    beta = 0.1 * jax.random.normal(k2, (c,), jnp.float32)
    mean = jnp.zeros((c,), jnp.float32)
    var = jnp.ones((c,), jnp.float32)
    return gamma, beta, mean, var


def _fold_bn(bn, eps=1e-5):
    gamma, beta, mean, var = bn
    scale = gamma / jnp.sqrt(var + eps)
    return scale, beta - mean * scale


def init_bottleneck_params(key, in_planes, planes, stride):
    ks = jax.random.split(key, 8)

    def he(k, shape, fan_in):
        return jax.random.normal(k, shape, jnp.float32) * jnp.sqrt(2.0 / fan_in)

    out_planes = EXPANSION * planes
    p = {
        'w1': he(ks[0], (in_planes, planes), in_planes),         # 1x1
        'bn1': _init_bn(ks[1], planes),
        'w2': he(ks[2], (3, 3, planes, planes), 9 * planes),     # 3x3 HWIO
        'bn2': _init_bn(ks[3], planes),
        'w3': he(ks[4], (planes, out_planes), planes),           # 1x1
        'bn3': _init_bn(ks[5], out_planes),
    }
    if stride != 1 or in_planes != out_planes:
        p['wsc'] = he(ks[6], (in_planes, out_planes), in_planes)  # 1x1 shortcut
        p['bnsc'] = _init_bn(ks[7], out_planes)
    return p


# -----------------------------------------------------------------------------
# Bottleneck forward (Pallas) and pure-JAX reference
# -----------------------------------------------------------------------------
def bottleneck_pallas(x_nchw, params, *, stride=1):
    N, Cin, H, W = x_nchw.shape
    planes = params['w1'].shape[1]
    Cout = EXPANSION * planes
    Cin_p = _round_up(Cin, LANE)
    P_p = _round_up(planes, LANE)
    Co_p = _round_up(Cout, LANE)

    # one-time boundary layout change: NCHW f32 -> channel-padded NHWC bf16
    x = jnp.transpose(x_nchw, (0, 2, 3, 1))
    x_p = jnp.pad(x, ((0, 0), (0, 0), (0, 0),
                      (0, Cin_p - Cin))).astype(jnp.bfloat16)

    def fold_pad(bn, cp):
        sc, bi = _fold_bn(bn)
        c = sc.shape[0]
        return jnp.pad(sc, (0, cp - c)), jnp.pad(bi, (0, cp - c))

    s1, b1 = fold_pad(params['bn1'], P_p)
    s2, b2 = fold_pad(params['bn2'], P_p)
    s3, b3 = fold_pad(params['bn3'], Co_p)

    w1 = jnp.pad(params['w1'],
                 ((0, Cin_p - Cin), (0, P_p - planes))).astype(jnp.bfloat16)
    w2 = jnp.pad(params['w2'], ((0, 0), (0, 0), (0, P_p - planes),
                                (0, P_p - planes)))
    w2 = w2.reshape(9, P_p, P_p).astype(jnp.bfloat16)
    w3 = jnp.pad(params['w3'],
                 ((0, P_p - planes), (0, Co_p - Cout))).astype(jnp.bfloat16)

    # conv1 (1x1) + bn1 + relu        -- fused matmul epilogue
    xf = x_p.reshape(N * H * W, Cin_p)
    h1 = matmul_fused(xf, w1, s1, b1, relu=True, out_dtype=jnp.bfloat16)
    h1 = h1.reshape(N, H, W, P_p)

    # conv2 (3x3, stride) + bn2 + relu -- direct conv, taps accumulated in VMEM
    h2 = conv3x3_bn_act(h1, w2, s2, b2, stride=stride, relu=True,
                        out_dtype=jnp.bfloat16)
    _, Ho, Wo, _ = h2.shape
    M2 = N * Ho * Wo
    h2f = h2.reshape(M2, P_p)

    # shortcut branch
    if 'wsc' in params:
        wsc = jnp.pad(params['wsc'],
                      ((0, Cin_p - Cin), (0, Co_p - Cout))).astype(jnp.bfloat16)
        ssc, bsc = fold_pad(params['bnsc'], Co_p)
        xs = x_p[:, ::stride, ::stride, :].reshape(M2, Cin_p)
        res = matmul_fused(xs, wsc, ssc, bsc, relu=False,
                           out_dtype=jnp.float32)
    else:
        res = xf                                  # identity shortcut

    # conv3 (1x1) + bn3 + residual add + relu -- all fused in one epilogue
    out = matmul_fused(h2f, w3, s3, b3, relu=True, residual=res,
                       out_dtype=jnp.float32)
    out = out.reshape(N, Ho, Wo, Co_p)[:, :, :, :Cout]
    return jnp.transpose(out, (0, 3, 1, 2))


def bottleneck_ref(x_nchw, params, *, stride=1):
    x = jnp.transpose(x_nchw, (0, 2, 3, 1)).astype(jnp.float32)

    def conv(h, w, s, p):
        return jax.lax.conv_general_dilated(
            h, w, window_strides=(s, s), padding=((p, p), (p, p)),
            dimension_numbers=('NHWC', 'HWIO', 'NHWC'),
            precision=jax.lax.Precision.HIGHEST)

    def bn(h, bnp):
        sc, bi = _fold_bn(bnp)
        return h * sc + bi

    cin = x.shape[-1]
    planes = params['w1'].shape[1]
    h = jax.nn.relu(bn(conv(x, params['w1'].reshape(1, 1, cin, planes), 1, 0),
                       params['bn1']))
    h = jax.nn.relu(bn(conv(h, params['w2'], stride, 1), params['bn2']))
    h = bn(conv(h, params['w3'].reshape(1, 1, planes, -1), 1, 0),
           params['bn3'])
    if 'wsc' in params:
        shortcut = bn(conv(x, params['wsc'].reshape(1, 1, cin, -1), stride, 0),
                      params['bnsc'])
    else:
        shortcut = x
    return jnp.transpose(jax.nn.relu(h + shortcut), (0, 3, 1, 2))


# -----------------------------------------------------------------------------
if __name__ == "__main__":
    key = jax.random.PRNGKey(0)
    kx, kp = jax.random.split(key)
    N, in_planes, H, W = 2, 16, 16, 16
    planes, stride = 16, 1
    x = jax.random.normal(kx, (N, in_planes, H, W), jnp.float32)
    params = init_bottleneck_params(kp, in_planes, planes, stride)

    fwd = jax.jit(bottleneck_pallas, static_argnames=('stride',))
    out = jax.block_until_ready(fwd(x, params, stride=stride))

    Ho = (H + 2 - 3) // stride + 1
    assert out.shape == (N, EXPANSION * planes, Ho, Ho), out.shape
    assert bool(jnp.all(jnp.isfinite(out)))
    assert bool(jnp.all(out >= 0.0))            # final ReLU

    ref = bottleneck_ref(x, params, stride=stride)
    rel = float(jnp.linalg.norm(out - ref) / (jnp.linalg.norm(ref) + 1e-8))
    assert rel < 5e-2, f"relative error too large: {rel}"
    print("KERNEL_OK")
</pallas_src>

<mosaic_0001>
module attributes {stable_mosaic.version = 11 : i64} {
  func.func @_matmul_fused_kernel(%arg0: i32, %arg1: i32, %arg2: i32, %arg3: memref<256x128xbf16, #tpu.memory_space<vmem>>, %arg4: memref<128x128xbf16, #tpu.memory_space<vmem>>, %arg5: memref<1x128xf32, #tpu.memory_space<vmem>>, %arg6: memref<1x128xf32, #tpu.memory_space<vmem>>, %arg7: memref<256x128xbf16, #tpu.memory_space<vmem>>, %arg8: memref<256x128xf32, #tpu.memory_space<vmem>>) attributes {dimension_semantics = [#tpu.dimension_semantics<parallel>, #tpu.dimension_semantics<parallel>, #tpu.dimension_semantics<arbitrary>], iteration_bounds = array<i64: 2, 1, 1>, scalar_prefetch = 0 : i64, scratch_operands = 1 : i64, tpu.core_type = #tpu.core_type<tc>, window_params = [{transform_indices = @transform_0, window_bounds = array<i64: 256, 128>}, {transform_indices = @transform_1, window_bounds = array<i64: 128, 128>}, {transform_indices = @transform_2, window_bounds = array<i64: 1, 128>}, {transform_indices = @transform_3, window_bounds = array<i64: 1, 128>}, {transform_indices = @transform_4, window_bounds = array<i64: 256, 128>}]} {
    %c0_i32 = arith.constant 0 : i32
    %0 = arith.cmpi eq, %arg2, %c0_i32 : i32
    %1 = arith.extui %0 : i1 to i32
    %c0_i32_0 = arith.constant 0 : i32
    %2 = arith.cmpi ne, %1, %c0_i32_0 : i32
    scf.if %2 {
      %cst_10 = arith.constant 0.000000e+00 : f32
      %12 = vector.broadcast %cst_10 : f32 to vector<256x128xf32>
      %c0_11 = arith.constant 0 : index
      %c0_12 = arith.constant 0 : index
      %13 = vector.load %arg8[%c0_11, %c0_12] : memref<256x128xf32, #tpu.memory_space<vmem>>, vector<256x128xf32>
      tpu.vector_store %arg8[%c0_11, %c0_12], %12 {strides = array<i32>} : memref<256x128xf32, #tpu.memory_space<vmem>>, vector<256x128xf32>,
    } else {
    }
    %c0 = arith.constant 0 : index
    %c0_1 = arith.constant 0 : index
    %3 = vector.load %arg8[%c0, %c0_1] : memref<256x128xf32, #tpu.memory_space<vmem>>, vector<256x128xf32>
    %c0_2 = arith.constant 0 : index
    %c0_3 = arith.constant 0 : index
    %4 = vector.load %arg3[%c0_2, %c0_3] : memref<256x128xbf16, #tpu.memory_space<vmem>>, vector<256x128xbf16>
    %c0_4 = arith.constant 0 : index
    %c0_5 = arith.constant 0 : index
    %5 = vector.load %arg4[%c0_4, %c0_5] : memref<128x128xbf16, #tpu.memory_space<vmem>>, vector<128x128xbf16>
    %cst = arith.constant dense<0.000000e+00> : vector<256x128xf32>
    %6 = tpu.matmul %4, %5, %cst {dimension_numbers = #tpu.dot_dimension_numbers<[1], [0], [0], [1], [0, 0, 1, 1], [], []>} : vector<256x128xbf16>, vector<128x128xbf16>, vector<256x128xf32> -> vector<256x128xf32>
    %7 = arith.addf %3, %6 : vector<256x128xf32>
    %c0_6 = arith.constant 0 : index
    %c0_7 = arith.constant 0 : index
    %8 = vector.load %arg8[%c0_6, %c0_7] : memref<256x128xf32, #tpu.memory_space<vmem>>, vector<256x128xf32>
    tpu.vector_store %arg8[%c0_6, %c0_7], %7 {strides = array<i32>} : memref<256x128xf32, #tpu.memory_space<vmem>>, vector<256x128xf32>,
    %c0_i32_8 = arith.constant 0 : i32
    %9 = arith.cmpi eq, %arg2, %c0_i32_8 : i32
    %10 = arith.extui %9 : i1 to i32
    %c0_i32_9 = arith.constant 0 : i32
    %11 = arith.cmpi ne, %10, %c0_i32_9 : i32
    scf.if %11 {
      %c0_10 = arith.constant 0 : index
      %c0_11 = arith.constant 0 : index
      %12 = vector.load %arg8[%c0_10, %c0_11] : memref<256x128xf32, #tpu.memory_space<vmem>>, vector<256x128xf32>
      %c0_12 = arith.constant 0 : index
      %c0_13 = arith.constant 0 : index
      %13 = vector.load %arg5[%c0_12, %c0_13] : memref<1x128xf32, #tpu.memory_space<vmem>>, vector<1x128xf32>
      %14 = vector.broadcast %13 : vector<1x128xf32> to vector<256x128xf32>
      %15 = arith.mulf %12, %14 : vector<256x128xf32>
      %c0_14 = arith.constant 0 : index
      %c0_15 = arith.constant 0 : index
      %16 = vector.load %arg6[%c0_14, %c0_15] : memref<1x128xf32, #tpu.memory_space<vmem>>, vector<1x128xf32>
      %17 = vector.broadcast %16 : vector<1x128xf32> to vector<256x128xf32>
      %18 = arith.addf %15, %17 : vector<256x128xf32>
      %cst_16 = arith.constant 0.000000e+00 : f32
      %19 = vector.broadcast %cst_16 : f32 to vector<256x128xf32>
      %20 = arith.maximumf %18, %19 : vector<256x128xf32>
      %21 = arith.truncf %20 : vector<256x128xf32> to vector<256x128xbf16>
      %c0_17 = arith.constant 0 : index
      %c0_18 = arith.constant 0 : index
      %22 = vector.load %arg7[%c0_17, %c0_18] : memref<256x128xbf16, #tpu.memory_space<vmem>>, vector<256x128xbf16>
      tpu.vector_store %arg7[%c0_17, %c0_18], %21 {strides = array<i32>} : memref<256x128xbf16, #tpu.memory_space<vmem>>, vector<256x128xbf16>,
    } else {
    }
    return
  }
  func.func @transform_0(%arg0: i32, %arg1: i32, %arg2: i32) -> (i32, i32) {
    %c0_i32 = arith.constant 0 : i32
    return %arg0, %arg2 : i32, i32
  }
  func.func @transform_1(%arg0: i32, %arg1: i32, %arg2: i32) -> (i32, i32) {
    %c0_i32 = arith.constant 0 : i32
    return %arg2, %arg1 : i32, i32
  }
  func.func @transform_2(%arg0: i32, %arg1: i32, %arg2: i32) -> (i32, i32) {
    %c0_i32 = arith.constant 0 : i32
    %c0_i32_0 = arith.constant 0 : i32
    return %c0_i32, %arg1 : i32, i32
  }
  func.func @transform_3(%arg0: i32, %arg1: i32, %arg2: i32) -> (i32, i32) {
    %c0_i32 = arith.constant 0 : i32
    %c0_i32_0 = arith.constant 0 : i32
    return %c0_i32, %arg1 : i32, i32
  }
  func.func @transform_4(%arg0: i32, %arg1: i32, %arg2: i32) -> (i32, i32) {
    %c0_i32 = arith.constant 0 : i32
    return %arg0, %arg1 : i32, i32
  }
}

module attributes {stable_mosaic.version = 11 : i64} {
  func.func @_conv3x3_kernel(%arg0: i32, %arg1: memref<1x1x326x128xbf16, #tpu.memory_space<vmem>>, %arg2: memref<9x128x128xbf16, #tpu.memory_space<vmem>>, %arg3: memref<1x128xf32, #tpu.memory_space<vmem>>, %arg4: memref<1x128xf32, #tpu.memory_space<vmem>>, %arg5: memref<1x288x128xbf16, #tpu.memory_space<vmem>>, %arg6: memref<288x128xf32, #tpu.memory_space<vmem>>) attributes {dimension_semantics = [#tpu.dimension_semantics<parallel>], iteration_bounds = array<i64: 2>, scalar_prefetch = 0 : i64, scratch_operands = 1 : i64, tpu.core_type = #tpu.core_type<tc>, window_params = [{transform_indices = @transform_0, window_bounds = array<i64: 1, 1, 326, 128>}, {pipeline_mode = #tpu.pipeline_mode<synchronous>, transform_indices = @transform_1, window_bounds = array<i64: 9, 128, 128>}, {pipeline_mode = #tpu.pipeline_mode<synchronous>, transform_indices = @transform_2, window_bounds = array<i64: 1, 128>}, {pipeline_mode = #tpu.pipeline_mode<synchronous>, transform_indices = @transform_3, window_bounds = array<i64: 1, 128>}, {transform_indices = @transform_4, window_bounds = array<i64: 1, 288, 128>}]} {
    %cst = arith.constant 0.000000e+00 : f32
    %0 = vector.broadcast %cst : f32 to vector<288x128xf32>
    %c0 = arith.constant 0 : index
    %c0_0 = arith.constant 0 : index
    %1 = vector.load %arg6[%c0, %c0_0] : memref<288x128xf32, #tpu.memory_space<vmem>>, vector<288x128xf32>
    tpu.vector_store %arg6[%c0, %c0_0], %0 {strides = array<i32>} : memref<288x128xf32, #tpu.memory_space<vmem>>, vector<288x128xf32>,
    %c0_1 = arith.constant 0 : index
    %c0_2 = arith.constant 0 : index
    %c0_3 = arith.constant 0 : index
    %c0_4 = arith.constant 0 : index
    %2 = vector.load %arg1[%c0_1, %c0_2, %c0_3, %c0_4] : memref<1x1x326x128xbf16, #tpu.memory_space<vmem>>, vector<1x1x288x128xbf16>
    %3 = vector.shape_cast %2 : vector<1x1x288x128xbf16> to vector<288x128xbf16>
    %c0_5 = arith.constant 0 : index
    %c0_6 = arith.constant 0 : index
    %4 = vector.load %arg6[%c0_5, %c0_6] : memref<288x128xf32, #tpu.memory_space<vmem>>, vector<288x128xf32>
    %c0_7 = arith.constant 0 : index
    %c0_8 = arith.constant 0 : index
    %c0_9 = arith.constant 0 : index
    %5 = vector.load %arg2[%c0_7, %c0_8, %c0_9] : memref<9x128x128xbf16, #tpu.memory_space<vmem>>, vector<1x128x128xbf16>
    %6 = vector.shape_cast %5 : vector<1x128x128xbf16> to vector<128x128xbf16>
    %cst_10 = arith.constant dense<0.000000e+00> : vector<288x128xf32>
    %7 = tpu.matmul %3, %6, %cst_10 {dimension_numbers = #tpu.dot_dimension_numbers<[1], [0], [0], [1], [0, 0, 1, 1], [], []>} : vector<288x128xbf16>, vector<128x128xbf16>, vector<288x128xf32> -> vector<288x128xf32>
    %8 = arith.addf %4, %7 : vector<288x128xf32>
    %c0_11 = arith.constant 0 : index
    %c0_12 = arith.constant 0 : index
    %9 = vector.load %arg6[%c0_11, %c0_12] : memref<288x128xf32, #tpu.memory_space<vmem>>, vector<288x128xf32>
    tpu.vector_store %arg6[%c0_11, %c0_12], %8 {strides = array<i32>} : memref<288x128xf32, #tpu.memory_space<vmem>>, vector<288x128xf32>,
    %c0_13 = arith.constant 0 : index
    %c0_14 = arith.constant 0 : index
    %c1 = arith.constant 1 : index
    %c0_15 = arith.constant 0 : index
    %10 = vector.load %arg1[%c0_13, %c0_14, %c1, %c0_15] : memref<1x1x326x128xbf16, #tpu.memory_space<vmem>>, vector<1x1x288x128xbf16>
    %11 = vector.shape_cast %10 : vector<1x1x288x128xbf16> to vector<288x128xbf16>
    %c0_16 = arith.constant 0 : index
    %c0_17 = arith.constant 0 : index
    %12 = vector.load %arg6[%c0_16, %c0_17] : memref<288x128xf32, #tpu.memory_space<vmem>>, vector<288x128xf32>
    %c1_18 = arith.constant 1 : index
    %c0_19 = arith.constant 0 : index
    %c0_20 = arith.constant 0 : index
    %13 = vector.load %arg2[%c1_18, %c0_19, %c0_20] : memref<9x128x128xbf16, #tpu.memory_space<vmem>>, vector<1x128x128xbf16>
    %14 = vector.shape_cast %13 : vector<1x128x128xbf16> to vector<128x128xbf16>
    %cst_21 = arith.constant dense<0.000000e+00> : vector<288x128xf32>
    %15 = tpu.matmul %11, %14, %cst_21 {dimension_numbers = #tpu.dot_dimension_numbers<[1], [0], [0], [1], [0, 0, 1, 1], [], []>} : vector<288x128xbf16>, vector<128x128xbf16>, vector<288x128xf32> -> vector<288x128xf32>
    %16 = arith.addf %12, %15 : vector<288x128xf32>
    %c0_22 = arith.constant 0 : index
    %c0_23 = arith.constant 0 : index
    %17 = vector.load %arg6[%c0_22, %c0_23] : memref<288x128xf32, #tpu.memory_space<vmem>>, vector<288x128xf32>
    tpu.vector_store %arg6[%c0_22, %c0_23], %16 {strides = array<i32>} : memref<288x128xf32, #tpu.memory_space<vmem>>, vector<288x128xf32>,
    %c0_24 = arith.constant 0 : index
    %c0_25 = arith.constant 0 : index
    %c2 = arith.constant 2 : index
    %c0_26 = arith.constant 0 : index
    %18 = vector.load %arg1[%c0_24, %c0_25, %c2, %c0_26] : memref<1x1x326x128xbf16, #tpu.memory_space<vmem>>, vector<1x1x288x128xbf16>
    %19 = vector.shape_cast %18 : vector<1x1x288x128xbf16> to vector<288x128xbf16>
    %c0_27 = arith.constant 0 : index
    %c0_28 = arith.constant 0 : index
    %20 = vector.load %arg6[%c0_27, %c0_28] : memref<288x128xf32, #tpu.memory_space<vmem>>, vector<288x128xf32>
    %c2_29 = arith.constant 2 : index
    %c0_30 = arith.constant 0 : index
    %c0_31 = arith.constant 0 : index
    %21 = vector.load %arg2[%c2_29, %c0_30, %c0_31] : memref<9x128x128xbf16, #tpu.memory_space<vmem>>, vector<1x128x128xbf16>
    %22 = vector.shape_cast %21 : vector<1x128x128xbf16> to vector<128x128xbf16>
    %cst_32 = arith.constant dense<0.000000e+00> : vector<288x128xf32>
    %23 = tpu.matmul %19, %22, %cst_32 {dimension_numbers = #tpu.dot_dimension_numbers<[1], [0], [0], [1], [0, 0, 1, 1], [], []>} : vector<288x128xbf16>, vector<128x128xbf16>, vector<288x128xf32> -> vector<288x128xf32>
    %24 = arith.addf %20, %23 : vector<288x128xf32>
    %c0_33 = arith.constant 0 : index
    %c0_34 = arith.constant 0 : index
    %25 = vector.load %arg6[%c0_33, %c0_34] : memref<288x128xf32, #tpu.memory_space<vmem>>, vector<288x128xf32>
    tpu.vector_store %arg6[%c0_33, %c0_34], %24 {strides = array<i32>} : memref<288x128xf32, #tpu.memory_space<vmem>>, vector<288x128xf32>,
    %c0_35 = arith.constant 0 : index
    %c0_36 = arith.constant 0 : index
    %c18 = arith.constant 18 : index
    %c0_37 = arith.constant 0 : index
    %26 = vector.load %arg1[%c0_35, %c0_36, %c18, %c0_37] : memref<1x1x326x128xbf16, #tpu.memory_space<vmem>>, vector<1x1x288x128xbf16>
    %27 = vector.shape_cast %26 : vector<1x1x288x128xbf16> to vector<288x128xbf16>
    %c0_38 = arith.constant 0 : index
    %c0_39 = arith.constant 0 : index
    %28 = vector.load %arg6[%c0_38, %c0_39] : memref<288x128xf32, #tpu.memory_space<vmem>>, vector<288x128xf32>
    %c3 = arith.constant 3 : index
    %c0_40 = arith.constant 0 : index
    %c0_41 = arith.constant 0 : index
    %29 = vector.load %arg2[%c3, %c0_40, %c0_41] : memref<9x128x128xbf16, #tpu.memory_space<vmem>>, vector<1x128x128xbf16>
    %30 = vector.shape_cast %29 : vector<1x128x128xbf16> to vector<128x128xbf16>
    %cst_42 = arith.constant dense<0.000000e+00> : vector<288x128xf32>
    %31 = tpu.matmul %27, %30, %cst_42 {dimension_numbers = #tpu.dot_dimension_numbers<[1], [0], [0], [1], [0, 0, 1, 1], [], []>} : vector<288x128xbf16>, vector<128x128xbf16>, vector<288x128xf32> -> vector<288x128xf32>
    %32 = arith.addf %28, %31 : vector<288x128xf32>
    %c0_43 = arith.constant 0 : index
    %c0_44 = arith.constant 0 : index
    %33 = vector.load %arg6[%c0_43, %c0_44] : memref<288x128xf32, #tpu.memory_space<vmem>>, vector<288x128xf32>
    tpu.vector_store %arg6[%c0_43, %c0_44], %32 {strides = array<i32>} : memref<288x128xf32, #tpu.memory_space<vmem>>, vector<288x128xf32>,
    %c0_45 = arith.constant 0 : index
    %c0_46 = arith.constant 0 : index
    %c19 = arith.constant 19 : index
    %c0_47 = arith.constant 0 : index
    %34 = vector.load %arg1[%c0_45, %c0_46, %c19, %c0_47] : memref<1x1x326x128xbf16, #tpu.memory_space<vmem>>, vector<1x1x288x128xbf16>
    %35 = vector.shape_cast %34 : vector<1x1x288x128xbf16> to vector<288x128xbf16>
    %c0_48 = arith.constant 0 : index
    %c0_49 = arith.constant 0 : index
    %36 = vector.load %arg6[%c0_48, %c0_49] : memref<288x128xf32, #tpu.memory_space<vmem>>, vector<288x128xf32>
    %c4 = arith.constant 4 : index
    %c0_50 = arith.constant 0 : index
    %c0_51 = arith.constant 0 : index
    %37 = vector.load %arg2[%c4, %c0_50, %c0_51] : memref<9x128x128xbf16, #tpu.memory_space<vmem>>, vector<1x128x128xbf16>
    %38 = vector.shape_cast %37 : vector<1x128x128xbf16> to vector<128x128xbf16>
    %cst_52 = arith.constant dense<0.000000e+00> : vector<288x128xf32>
    %39 = tpu.matmul %35, %38, %cst_52 {dimension_numbers = #tpu.dot_dimension_numbers<[1], [0], [0], [1], [0, 0, 1, 1], [], []>} : vector<288x128xbf16>, vector<128x128xbf16>, vector<288x128xf32> -> vector<288x128xf32>
    %40 = arith.addf %36, %39 : vector<288x128xf32>
    %c0_53 = arith.constant 0 : index
    %c0_54 = arith.constant 0 : index
    %41 = vector.load %arg6[%c0_53, %c0_54] : memref<288x128xf32, #tpu.memory_space<vmem>>, vector<288x128xf32>
    tpu.vector_store %arg6[%c0_53, %c0_54], %40 {strides = array<i32>} : memref<288x128xf32, #tpu.memory_space<vmem>>, vector<288x128xf32>,
    %c0_55 = arith.constant 0 : index
    %c0_56 = arith.constant 0 : index
    %c20 = arith.constant 20 : index
    %c0_57 = arith.constant 0 : index
    %42 = vector.load %arg1[%c0_55, %c0_56, %c20, %c0_57] : memref<1x1x326x128xbf16, #tpu.memory_space<vmem>>, vector<1x1x288x128xbf16>
    %43 = vector.shape_cast %42 : vector<1x1x288x128xbf16> to vector<288x128xbf16>
    %c0_58 = arith.constant 0 : index
    %c0_59 = arith.constant 0 : index
    %44 = vector.load %arg6[%c0_58, %c0_59] : memref<288x128xf32, #tpu.memory_space<vmem>>, vector<288x128xf32>
    %c5 = arith.constant 5 : index
    %c0_60 = arith.constant 0 : index
    %c0_61 = arith.constant 0 : index
    %45 = vector.load %arg2[%c5, %c0_60, %c0_61] : memref<9x128x128xbf16, #tpu.memory_space<vmem>>, vector<1x128x128xbf16>
    %46 = vector.shape_cast %45 : vector<1x128x128xbf16> to vector<128x128xbf16>
    %cst_62 = arith.constant dense<0.000000e+00> : vector<288x128xf32>
    %47 = tpu.matmul %43, %46, %cst_62 {dimension_numbers = #tpu.dot_dimension_numbers<[1], [0], [0], [1], [0, 0, 1, 1], [], []>} : vector<288x128xbf16>, vector<128x128xbf16>, vector<288x128xf32> -> vector<288x128xf32>
    %48 = arith.addf %44, %47 : vector<288x128xf32>
    %c0_63 = arith.constant 0 : index
    %c0_64 = arith.constant 0 : index
    %49 = vector.load %arg6[%c0_63, %c0_64] : memref<288x128xf32, #tpu.memory_space<vmem>>, vector<288x128xf32>
    tpu.vector_store %arg6[%c0_63, %c0_64], %48 {strides = array<i32>} : memref<288x128xf32, #tpu.memory_space<vmem>>, vector<288x128xf32>,
    %c0_65 = arith.constant 0 : index
    %c0_66 = arith.constant 0 : index
    %c36 = arith.constant 36 : index
    %c0_67 = arith.constant 0 : index
    %50 = vector.load %arg1[%c0_65, %c0_66, %c36, %c0_67] : memref<1x1x326x128xbf16, #tpu.memory_space<vmem>>, vector<1x1x288x128xbf16>
    %51 = vector.shape_cast %50 : vector<1x1x288x128xbf16> to vector<288x128xbf16>
    %c0_68 = arith.constant 0 : index
    %c0_69 = arith.constant 0 : index
    %52 = vector.load %arg6[%c0_68, %c0_69] : memref<288x128xf32, #tpu.memory_space<vmem>>, vector<288x128xf32>
    %c6 = arith.constant 6 : index
    %c0_70 = arith.constant 0 : index
    %c0_71 = arith.constant 0 : index
    %53 = vector.load %arg2[%c6, %c0_70, %c0_71] : memref<9x128x128xbf16, #tpu.memory_space<vmem>>, vector<1x128x128xbf16>
    %54 = vector.shape_cast %53 : vector<1x128x128xbf16> to vector<128x128xbf16>
    %cst_72 = arith.constant dense<0.000000e+00> : vector<288x128xf32>
    %55 = tpu.matmul %51, %54, %cst_72 {dimension_numbers = #tpu.dot_dimension_numbers<[1], [0], [0], [1], [0, 0, 1, 1], [], []>} : vector<288x128xbf16>, vector<128x128xbf16>, vector<288x128xf32> -> vector<288x128xf32>
    %56 = arith.addf %52, %55 : vector<288x128xf32>
    %c0_73 = arith.constant 0 : index
    %c0_74 = arith.constant 0 : index
    %57 = vector.load %arg6[%c0_73, %c0_74] : memref<288x128xf32, #tpu.memory_space<vmem>>, vector<288x128xf32>
    tpu.vector_store %arg6[%c0_73, %c0_74], %56 {strides = array<i32>} : memref<288x128xf32, #tpu.memory_space<vmem>>, vector<288x128xf32>,
    %c0_75 = arith.constant 0 : index
    %c0_76 = arith.constant 0 : index
    %c37 = arith.constant 37 : index
    %c0_77 = arith.constant 0 : index
    %58 = vector.load %arg1[%c0_75, %c0_76, %c37, %c0_77] : memref<1x1x326x128xbf16, #tpu.memory_space<vmem>>, vector<1x1x288x128xbf16>
    %59 = vector.shape_cast %58 : vector<1x1x288x128xbf16> to vector<288x128xbf16>
    %c0_78 = arith.constant 0 : index
    %c0_79 = arith.constant 0 : index
    %60 = vector.load %arg6[%c0_78, %c0_79] : memref<288x128xf32, #tpu.memory_space<vmem>>, vector<288x128xf32>
    %c7 = arith.constant 7 : index
    %c0_80 = arith.constant 0 : index
    %c0_81 = arith.constant 0 : index
    %61 = vector.load %arg2[%c7, %c0_80, %c0_81] : memref<9x128x128xbf16, #tpu.memory_space<vmem>>, vector<1x128x128xbf16>
    %62 = vector.shape_cast %61 : vector<1x128x128xbf16> to vector<128x128xbf16>
    %cst_82 = arith.constant dense<0.000000e+00> : vector<288x128xf32>
    %63 = tpu.matmul %59, %62, %cst_82 {dimension_numbers = #tpu.dot_dimension_numbers<[1], [0], [0], [1], [0, 0, 1, 1], [], []>} : vector<288x128xbf16>, vector<128x128xbf16>, vector<288x128xf32> -> vector<288x128xf32>
    %64 = arith.addf %60, %63 : vector<288x128xf32>
    %c0_83 = arith.constant 0 : index
    %c0_84 = arith.constant 0 : index
    %65 = vector.load %arg6[%c0_83, %c0_84] : memref<288x128xf32, #tpu.memory_space<vmem>>, vector<288x128xf32>
    tpu.vector_store %arg6[%c0_83, %c0_84], %64 {strides = array<i32>} : memref<288x128xf32, #tpu.memory_space<vmem>>, vector<288x128xf32>,
    %c0_85 = arith.constant 0 : index
    %c0_86 = arith.constant 0 : index
    %c38 = arith.constant 38 : index
    %c0_87 = arith.constant 0 : index
    %66 = vector.load %arg1[%c0_85, %c0_86, %c38, %c0_87] : memref<1x1x326x128xbf16, #tpu.memory_space<vmem>>, vector<1x1x288x128xbf16>
    %67 = vector.shape_cast %66 : vector<1x1x288x128xbf16> to vector<288x128xbf16>
    %c0_88 = arith.constant 0 : index
    %c0_89 = arith.constant 0 : index
    %68 = vector.load %arg6[%c0_88, %c0_89] : memref<288x128xf32, #tpu.memory_space<vmem>>, vector<288x128xf32>
    %c8 = arith.constant 8 : index
    %c0_90 = arith.constant 0 : index
    %c0_91 = arith.constant 0 : index
    %69 = vector.load %arg2[%c8, %c0_90, %c0_91] : memref<9x128x128xbf16, #tpu.memory_space<vmem>>, vector<1x128x128xbf16>
    %70 = vector.shape_cast %69 : vector<1x128x128xbf16> to vector<128x128xbf16>
    %cst_92 = arith.constant dense<0.000000e+00> : vector<288x128xf32>
    %71 = tpu.matmul %67, %70, %cst_92 {dimension_numbers = #tpu.dot_dimension_numbers<[1], [0], [0], [1], [0, 0, 1, 1], [], []>} : vector<288x128xbf16>, vector<128x128xbf16>, vector<288x128xf32> -> vector<288x128xf32>
    %72 = arith.addf %68, %71 : vector<288x128xf32>
    %c0_93 = arith.constant 0 : index
    %c0_94 = arith.constant 0 : index
    %73 = vector.load %arg6[%c0_93, %c0_94] : memref<288x128xf32, #tpu.memory_space<vmem>>, vector<288x128xf32>
    tpu.vector_store %arg6[%c0_93, %c0_94], %72 {strides = array<i32>} : memref<288x128xf32, #tpu.memory_space<vmem>>, vector<288x128xf32>,
    %c0_95 = arith.constant 0 : index
    %c0_96 = arith.constant 0 : index
    %74 = vector.load %arg6[%c0_95, %c0_96] : memref<288x128xf32, #tpu.memory_space<vmem>>, vector<288x128xf32>
    %c0_97 = arith.constant 0 : index
    %c0_98 = arith.constant 0 : index
    %75 = vector.load %arg3[%c0_97, %c0_98] : memref<1x128xf32, #tpu.memory_space<vmem>>, vector<1x128xf32>
    %76 = vector.broadcast %75 : vector<1x128xf32> to vector<288x128xf32>
    %77 = arith.mulf %74, %76 : vector<288x128xf32>
    %c0_99 = arith.constant 0 : index
    %c0_100 = arith.constant 0 : index
    %78 = vector.load %arg4[%c0_99, %c0_100] : memref<1x128xf32, #tpu.memory_space<vmem>>, vector<1x128xf32>
    %79 = vector.broadcast %78 : vector<1x128xf32> to vector<288x128xf32>
    %80 = arith.addf %77, %79 : vector<288x128xf32>
    %cst_101 = arith.constant 0.000000e+00 : f32
    %81 = vector.broadcast %cst_101 : f32 to vector<288x128xf32>
    %82 = arith.maximumf %80, %81 : vector<288x128xf32>
    %83 = arith.truncf %82 : vector<288x128xf32> to vector<288x128xbf16>
    %c0_102 = arith.constant 0 : index
    %c0_103 = arith.constant 0 : index
    %c0_104 = arith.constant 0 : index
    %84 = vector.load %arg5[%c0_102, %c0_103, %c0_104] : memref<1x288x128xbf16, #tpu.memory_space<vmem>>, vector<1x288x128xbf16>
    %85 = vector.shape_cast %84 : vector<1x288x128xbf16> to vector<288x128xbf16>
    %86 = vector.shape_cast %83 : vector<288x128xbf16> to vector<1x288x128xbf16>
    tpu.vector_store %arg5[%c0_102, %c0_103, %c0_104], %86 {strides = array<i32>} : memref<1x288x128xbf16, #tpu.memory_space<vmem>>, vector<1x288x128xbf16>,
    return
  }
  func.func @transform_0(%arg0: i32) -> (i32, i32, i32, i32) {
    %c0_i32 = arith.constant 0 : i32
    %c0_i32_0 = arith.constant 0 : i32
    %c0_i32_1 = arith.constant 0 : i32
    %c0_i32_2 = arith.constant 0 : i32
    return %arg0, %c0_i32, %c0_i32_0, %c0_i32_1 : i32, i32, i32, i32
  }
  func.func @transform_1(%arg0: i32) -> (i32, i32, i32) {
    %c0_i32 = arith.constant 0 : i32
    %c0_i32_0 = arith.constant 0 : i32
    %c0_i32_1 = arith.constant 0 : i32
    %c0_i32_2 = arith.constant 0 : i32
    return %c0_i32, %c0_i32_0, %c0_i32_1 : i32, i32, i32
  }
  func.func @transform_2(%arg0: i32) -> (i32, i32) {
    %c0_i32 = arith.constant 0 : i32
    %c0_i32_0 = arith.constant 0 : i32
    %c0_i32_1 = arith.constant 0 : i32
    return %c0_i32, %c0_i32_0 : i32, i32
  }
  func.func @transform_3(%arg0: i32) -> (i32, i32) {
    %c0_i32 = arith.constant 0 : i32
    %c0_i32_0 = arith.constant 0 : i32
    %c0_i32_1 = arith.constant 0 : i32
    return %c0_i32, %c0_i32_0 : i32, i32
  }
  func.func @transform_4(%arg0: i32) -> (i32, i32, i32) {
    %c0_i32 = arith.constant 0 : i32
    %c0_i32_0 = arith.constant 0 : i32
    %c0_i32_1 = arith.constant 0 : i32
    return %arg0, %c0_i32, %c0_i32_0 : i32, i32, i32
  }
}

module attributes {stable_mosaic.version = 11 : i64} {
  func.func @_matmul_fused_kernel(%arg0: i32, %arg1: i32, %arg2: i32, %arg3: memref<256x128xbf16, #tpu.memory_space<vmem>>, %arg4: memref<128x128xbf16, #tpu.memory_space<vmem>>, %arg5: memref<1x128xf32, #tpu.memory_space<vmem>>, %arg6: memref<1x128xf32, #tpu.memory_space<vmem>>, %arg7: memref<256x128xf32, #tpu.memory_space<vmem>>, %arg8: memref<256x128xf32, #tpu.memory_space<vmem>>) attributes {dimension_semantics = [#tpu.dimension_semantics<parallel>, #tpu.dimension_semantics<parallel>, #tpu.dimension_semantics<arbitrary>], iteration_bounds = array<i64: 2, 1, 1>, scalar_prefetch = 0 : i64, scratch_operands = 1 : i64, tpu.core_type = #tpu.core_type<tc>, window_params = [{transform_indices = @transform_0, window_bounds = array<i64: 256, 128>}, {transform_indices = @transform_1, window_bounds = array<i64: 128, 128>}, {transform_indices = @transform_2, window_bounds = array<i64: 1, 128>}, {transform_indices = @transform_3, window_bounds = array<i64: 1, 128>}, {transform_indices = @transform_4, window_bounds = array<i64: 256, 128>}]} {
    %c0_i32 = arith.constant 0 : i32
    %0 = arith.cmpi eq, %arg2, %c0_i32 : i32
    %1 = arith.extui %0 : i1 to i32
    %c0_i32_0 = arith.constant 0 : i32
    %2 = arith.cmpi ne, %1, %c0_i32_0 : i32
    scf.if %2 {
      %cst_10 = arith.constant 0.000000e+00 : f32
      %12 = vector.broadcast %cst_10 : f32 to vector<256x128xf32>
      %c0_11 = arith.constant 0 : index
      %c0_12 = arith.constant 0 : index
      %13 = vector.load %arg8[%c0_11, %c0_12] : memref<256x128xf32, #tpu.memory_space<vmem>>, vector<256x128xf32>
      tpu.vector_store %arg8[%c0_11, %c0_12], %12 {strides = array<i32>} : memref<256x128xf32, #tpu.memory_space<vmem>>, vector<256x128xf32>,
    } else {
    }
    %c0 = arith.constant 0 : index
    %c0_1 = arith.constant 0 : index
    %3 = vector.load %arg8[%c0, %c0_1] : memref<256x128xf32, #tpu.memory_space<vmem>>, vector<256x128xf32>
    %c0_2 = arith.constant 0 : index
    %c0_3 = arith.constant 0 : index
    %4 = vector.load %arg3[%c0_2, %c0_3] : memref<256x128xbf16, #tpu.memory_space<vmem>>, vector<256x128xbf16>
    %c0_4 = arith.constant 0 : index
    %c0_5 = arith.constant 0 : index
    %5 = vector.load %arg4[%c0_4, %c0_5] : memref<128x128xbf16, #tpu.memory_space<vmem>>, vector<128x128xbf16>
    %cst = arith.constant dense<0.000000e+00> : vector<256x128xf32>
    %6 = tpu.matmul %4, %5, %cst {dimension_numbers = #tpu.dot_dimension_numbers<[1], [0], [0], [1], [0, 0, 1, 1], [], []>} : vector<256x128xbf16>, vector<128x128xbf16>, vector<256x128xf32> -> vector<256x128xf32>
    %7 = arith.addf %3, %6 : vector<256x128xf32>
    %c0_6 = arith.constant 0 : index
    %c0_7 = arith.constant 0 : index
    %8 = vector.load %arg8[%c0_6, %c0_7] : memref<256x128xf32, #tpu.memory_space<vmem>>, vector<256x128xf32>
    tpu.vector_store %arg8[%c0_6, %c0_7], %7 {strides = array<i32>} : memref<256x128xf32, #tpu.memory_space<vmem>>, vector<256x128xf32>,
    %c0_i32_8 = arith.constant 0 : i32
    %9 = arith.cmpi eq, %arg2, %c0_i32_8 : i32
    %10 = arith.extui %9 : i1 to i32
    %c0_i32_9 = arith.constant 0 : i32
    %11 = arith.cmpi ne, %10, %c0_i32_9 : i32
    scf.if %11 {
      %c0_10 = arith.constant 0 : index
      %c0_11 = arith.constant 0 : index
      %12 = vector.load %arg8[%c0_10, %c0_11] : memref<256x128xf32, #tpu.memory_space<vmem>>, vector<256x128xf32>
      %c0_12 = arith.constant 0 : index
      %c0_13 = arith.constant 0 : index
      %13 = vector.load %arg5[%c0_12, %c0_13] : memref<1x128xf32, #tpu.memory_space<vmem>>, vector<1x128xf32>
      %14 = vector.broadcast %13 : vector<1x128xf32> to vector<256x128xf32>
      %15 = arith.mulf %12, %14 : vector<256x128xf32>
      %c0_14 = arith.constant 0 : index
      %c0_15 = arith.constant 0 : index
      %16 = vector.load %arg6[%c0_14, %c0_15] : memref<1x128xf32, #tpu.memory_space<vmem>>, vector<1x128xf32>
      %17 = vector.broadcast %16 : vector<1x128xf32> to vector<256x128xf32>
      %18 = arith.addf %15, %17 : vector<256x128xf32>
      %c0_16 = arith.constant 0 : index
      %c0_17 = arith.constant 0 : index
      %19 = vector.load %arg7[%c0_16, %c0_17] : memref<256x128xf32, #tpu.memory_space<vmem>>, vector<256x128xf32>
      tpu.vector_store %arg7[%c0_16, %c0_17], %18 {strides = array<i32>} : memref<256x128xf32, #tpu.memory_space<vmem>>, vector<256x128xf32>,
    } else {
    }
    return
  }
  func.func @transform_0(%arg0: i32, %arg1: i32, %arg2: i32) -> (i32, i32) {
    %c0_i32 = arith.constant 0 : i32
    return %arg0, %arg2 : i32, i32
  }
  func.func @transform_1(%arg0: i32, %arg1: i32, %arg2: i32) -> (i32, i32) {
    %c0_i32 = arith.constant 0 : i32
    return %arg2, %arg1 : i32, i32
  }
  func.func @transform_2(%arg0: i32, %arg1: i32, %arg2: i32) -> (i32, i32) {
    %c0_i32 = arith.constant 0 : i32
    %c0_i32_0 = arith.constant 0 : i32
    return %c0_i32, %arg1 : i32, i32
  }
  func.func @transform_3(%arg0: i32, %arg1: i32, %arg2: i32) -> (i32, i32) {
    %c0_i32 = arith.constant 0 : i32
    %c0_i32_0 = arith.constant 0 : i32
    return %c0_i32, %arg1 : i32, i32
  }
  func.func @transform_4(%arg0: i32, %arg1: i32, %arg2: i32) -> (i32, i32) {
    %c0_i32 = arith.constant 0 : i32
    return %arg0, %arg1 : i32, i32
  }
}

module attributes {stable_mosaic.version = 11 : i64} {
  func.func @_matmul_fused_kernel(%arg0: i32, %arg1: i32, %arg2: i32, %arg3: memref<256x128xbf16, #tpu.memory_space<vmem>>, %arg4: memref<128x128xbf16, #tpu.memory_space<vmem>>, %arg5: memref<1x128xf32, #tpu.memory_space<vmem>>, %arg6: memref<1x128xf32, #tpu.memory_space<vmem>>, %arg7: memref<256x128xf32, #tpu.memory_space<vmem>>, %arg8: memref<256x128xf32, #tpu.memory_space<vmem>>, %arg9: memref<256x128xf32, #tpu.memory_space<vmem>>) attributes {dimension_semantics = [#tpu.dimension_semantics<parallel>, #tpu.dimension_semantics<parallel>, #tpu.dimension_semantics<arbitrary>], iteration_bounds = array<i64: 2, 1, 1>, scalar_prefetch = 0 : i64, scratch_operands = 1 : i64, tpu.core_type = #tpu.core_type<tc>, window_params = [{transform_indices = @transform_0, window_bounds = array<i64: 256, 128>}, {transform_indices = @transform_1, window_bounds = array<i64: 128, 128>}, {transform_indices = @transform_2, window_bounds = array<i64: 1, 128>}, {transform_indices = @transform_3, window_bounds = array<i64: 1, 128>}, {transform_indices = @transform_4, window_bounds = array<i64: 256, 128>}, {transform_indices = @transform_5, window_bounds = array<i64: 256, 128>}]} {
    %c0_i32 = arith.constant 0 : i32
    %0 = arith.cmpi eq, %arg2, %c0_i32 : i32
    %1 = arith.extui %0 : i1 to i32
    %c0_i32_0 = arith.constant 0 : i32
    %2 = arith.cmpi ne, %1, %c0_i32_0 : i32
    scf.if %2 {
      %cst_10 = arith.constant 0.000000e+00 : f32
      %12 = vector.broadcast %cst_10 : f32 to vector<256x128xf32>
      %c0_11 = arith.constant 0 : index
      %c0_12 = arith.constant 0 : index
      %13 = vector.load %arg9[%c0_11, %c0_12] : memref<256x128xf32, #tpu.memory_space<vmem>>, vector<256x128xf32>
      tpu.vector_store %arg9[%c0_11, %c0_12], %12 {strides = array<i32>} : memref<256x128xf32, #tpu.memory_space<vmem>>, vector<256x128xf32>,
    } else {
    }
    %c0 = arith.constant 0 : index
    %c0_1 = arith.constant 0 : index
    %3 = vector.load %arg9[%c0, %c0_1] : memref<256x128xf32, #tpu.memory_space<vmem>>, vector<256x128xf32>
    %c0_2 = arith.constant 0 : index
    %c0_3 = arith.constant 0 : index
    %4 = vector.load %arg3[%c0_2, %c0_3] : memref<256x128xbf16, #tpu.memory_space<vmem>>, vector<256x128xbf16>
    %c0_4 = arith.constant 0 : index
    %c0_5 = arith.constant 0 : index
    %5 = vector.load %arg4[%c0_4, %c0_5] : memref<128x128xbf16, #tpu.memory_space<vmem>>, vector<128x128xbf16>
    %cst = arith.constant dense<0.000000e+00> : vector<256x128xf32>
    %6 = tpu.matmul %4, %5, %cst {dimension_numbers = #tpu.dot_dimension_numbers<[1], [0], [0], [1], [0, 0, 1, 1], [], []>} : vector<256x128xbf16>, vector<128x128xbf16>, vector<256x128xf32> -> vector<256x128xf32>
    %7 = arith.addf %3, %6 : vector<256x128xf32>
    %c0_6 = arith.constant 0 : index
    %c0_7 = arith.constant 0 : index
    %8 = vector.load %arg9[%c0_6, %c0_7] : memref<256x128xf32, #tpu.memory_space<vmem>>, vector<256x128xf32>
    tpu.vector_store %arg9[%c0_6, %c0_7], %7 {strides = array<i32>} : memref<256x128xf32, #tpu.memory_space<vmem>>, vector<256x128xf32>,
    %c0_i32_8 = arith.constant 0 : i32
    %9 = arith.cmpi eq, %arg2, %c0_i32_8 : i32
    %10 = arith.extui %9 : i1 to i32
    %c0_i32_9 = arith.constant 0 : i32
    %11 = arith.cmpi ne, %10, %c0_i32_9 : i32
    scf.if %11 {
      %c0_10 = arith.constant 0 : index
      %c0_11 = arith.constant 0 : index
      %12 = vector.load %arg9[%c0_10, %c0_11] : memref<256x128xf32, #tpu.memory_space<vmem>>, vector<256x128xf32>
      %c0_12 = arith.constant 0 : index
      %c0_13 = arith.constant 0 : index
      %13 = vector.load %arg5[%c0_12, %c0_13] : memref<1x128xf32, #tpu.memory_space<vmem>>, vector<1x128xf32>
      %14 = vector.broadcast %13 : vector<1x128xf32> to vector<256x128xf32>
      %15 = arith.mulf %12, %14 : vector<256x128xf32>
      %c0_14 = arith.constant 0 : index
      %c0_15 = arith.constant 0 : index
      %16 = vector.load %arg6[%c0_14, %c0_15] : memref<1x128xf32, #tpu.memory_space<vmem>>, vector<1x128xf32>
      %17 = vector.broadcast %16 : vector<1x128xf32> to vector<256x128xf32>
      %18 = arith.addf %15, %17 : vector<256x128xf32>
      %c0_16 = arith.constant 0 : index
      %c0_17 = arith.constant 0 : index
      %19 = vector.load %arg7[%c0_16, %c0_17] : memref<256x128xf32, #tpu.memory_space<vmem>>, vector<256x128xf32>
      %20 = arith.addf %18, %19 : vector<256x128xf32>
      %cst_18 = arith.constant 0.000000e+00 : f32
      %21 = vector.broadcast %cst_18 : f32 to vector<256x128xf32>
      %22 = arith.maximumf %20, %21 : vector<256x128xf32>
      %c0_19 = arith.constant 0 : index
      %c0_20 = arith.constant 0 : index
      %23 = vector.load %arg8[%c0_19, %c0_20] : memref<256x128xf32, #tpu.memory_space<vmem>>, vector<256x128xf32>
      tpu.vector_store %arg8[%c0_19, %c0_20], %22 {strides = array<i32>} : memref<256x128xf32, #tpu.memory_space<vmem>>, vector<256x128xf32>,
    } else {
    }
    return
  }
  func.func @transform_0(%arg0: i32, %arg1: i32, %arg2: i32) -> (i32, i32) {
    %c0_i32 = arith.constant 0 : i32
    return %arg0, %arg2 : i32, i32
  }
  func.func @transform_1(%arg0: i32, %arg1: i32, %arg2: i32) -> (i32, i32) {
    %c0_i32 = arith.constant 0 : i32
    return %arg2, %arg1 : i32, i32
  }
  func.func @transform_2(%arg0: i32, %arg1: i32, %arg2: i32) -> (i32, i32) {
    %c0_i32 = arith.constant 0 : i32
    %c0_i32_0 = arith.constant 0 : i32
    return %c0_i32, %arg1 : i32, i32
  }
  func.func @transform_3(%arg0: i32, %arg1: i32, %arg2: i32) -> (i32, i32) {
    %c0_i32 = arith.constant 0 : i32
    %c0_i32_0 = arith.constant 0 : i32
    return %c0_i32, %arg1 : i32, i32
  }
  func.func @transform_4(%arg0: i32, %arg1: i32, %arg2: i32) -> (i32, i32) {
    %c0_i32 = arith.constant 0 : i32
    return %arg0, %arg1 : i32, i32
  }
  func.func @transform_5(%arg0: i32, %arg1: i32, %arg2: i32) -> (i32, i32) {
    %c0_i32 = arith.constant 0 : i32
    return %arg0, %arg1 : i32, i32
  }
}

</mosaic_0001>

<bundles_post_ra>
// kernel: bottleneck_pallas.4
= control target key start
LH: loop header
LB: loop body
LE: loop exit
PB: predicated region body
PF: predicated region fallthrough
CT: control target
= control target key end

     0   :  { %s1598_s15 = smov 0   ;;  %s1600_s16 = smov 0   ;;  %s1772_s0 = inlined_call_operand.vmem [shape: bf16[512,128], index: 0, kind: input, shape index: {}]   ;;  %s1773_s1 = inlined_call_operand.vmem [shape: bf16[128,128], index: 1, kind: input, shape index: {}]   ;;  %s1774_s2 = inlined_call_operand.vmem [shape: f32[1,128], index: 2, kind: input, shape index: {}]   ;;  %s1775_s3 = inlined_call_operand.vmem [shape: f32[1,128], index: 3, kind: input, shape index: {}]   ;;  %s1776_s4 = inlined_call_operand.vmem [shape: bf16[512,128], index: 4, kind: output, shape index: {}]  }
   0x1   :  { %s1602_s17 = smov 0  }
   0x2 LB: > { %s33_s18 = sadd.s32 1, %s1567_s16  ;;  %p1221_p0 = scmp.ge.s32.totalorder %s1571_s17, 1  ;;  %s1571_s17 = sphi %s1602_s17, %s14_s17   ;;  %s1567_s16 = sphi %s1600_s16, %s1778_s16   ;;  %s1563_s15 = sphi %s1598_s15, %s1777_s15  }
   0x3   : > { %p35_p1 = scmp.ge.s32.totalorder %s33_s18, 2  ;;  %p221_p2 = scmp.lt.s32.totalorder %s1571_s17, 3 }
   0x5   : > { %s1780_s18 = smov (%p35_p1, %s33_s18), 0  ;;  %p222_p3 = pnand %p1221_p0, %p221_p2 }
   0x6   : > { %v1525_v0 = vld [vmem:[%s1773_s1] sm:$0xff] (!%p222_p3)   ;;  %s1222_s21 = sshll.u32 (!%p222_p3), %s1563_s15, 5  ;;  %v1526_v1 = vld [vmem:[%s1773_s1 + $0x8] sm:$0xff] (!%p222_p3)   ;;  %v1527_v2 = vld [vmem:[%s1773_s1 + $0x10] sm:$0xff] (!%p222_p3)  }
   0x7   : > { %225 = sbr.rel (%p222_p3) target bundleno = 288 (0x120), region = 36  ;;  %p268_p4 = scmp.lt.s32.totalorder (!%p222_p3), %s1222_s21, 63  ;;  %1437 = vmatprep.subr.bf16.mxu0 (!%p222_p3), %v1525_v0  ;;  %1485 = vmatprep.subr.bf16.mxu1 (!%p222_p3), %v1525_v0  ;;  %v1528_v3 = vld [vmem:[%s1773_s1 + $0x18] sm:$0xff] (!%p222_p3)   ;;  %v1529_v6 = vld [vmem:[%s1773_s1 + $0x20] sm:$0xff] (!%p222_p3)   ;;  %v1530_v7 = vld [vmem:[%s1773_s1 + $0x28] sm:$0xff] (!%p222_p3)  }
   0x8   : > { %1438 = vmatpush3.bf16.msra.mxu0 (!%p222_p3), %v1525_v0  ;;  %1493 = vmatpush3.bf16.msra.mxu1 (!%p222_p3), %v1525_v0  ;;  %v1531_v8 = vld [vmem:[%s1773_s1 + $0x30] sm:$0xff] (!%p222_p3)   ;;  %v1532_v9 = vld [vmem:[%s1773_s1 + $0x38] sm:$0xff] (!%p222_p3)   ;;  %v1669_v24 = vld [vmem:[%s1774_s2] ss:$0 sm:$0xff] (!%p222_p3) }
   0x9   : > { %1439 = vmatprep.subr.bf16.mxu0 (!%p222_p3), %v1526_v1  ;;  %1486 = vmatprep.subr.bf16.mxu1 (!%p222_p3), %v1526_v1  ;;  %v1674_v26 = vld [vmem:[%s1775_s3] ss:$0 sm:$0xff] (!%p222_p3) }
   0xc   : > { %1440 = vmatpush3.bf16.msra.mxu0 (!%p222_p3), %v1526_v1  ;;  %1494 = vmatpush3.bf16.msra.mxu1 (!%p222_p3), %v1526_v1 }
   0xd   : > { %1441 = vmatprep.subr.bf16.mxu0 (!%p222_p3), %v1527_v2  ;;  %1487 = vmatprep.subr.bf16.mxu1 (!%p222_p3), %v1527_v2 }
   0xe   : > { %s1782_s21 = smov (!%p268_p4, %s1222_s21), 63 }
   0xf   : > { %s1223_s26 = sshll.u32 %s1782_s21, 2 }
  0x10   : > { %s1633_s29 = scalar_lea.vmem %s1772_s0, %s1223_s26  ;;  %1442 = vmatpush3.bf16.msra.mxu0 %v1527_v2  ;;  %1495 = vmatpush3.bf16.msra.mxu1 %v1527_v2  ;;  %s1697_s24 = scalar_lea.vmem %s1776_s4, %s1223_s26 }
  0x11   : > { %v1533_v4 = vld [vmem:[%s1633_s29] sm:$0xff]   ;;  %1443 = vmatprep.subr.bf16.mxu0 %v1528_v3  ;;  %1488 = vmatprep.subr.bf16.mxu1 %v1528_v3  ;;  %v1535_v10 = vld [vmem:[%s1633_s29 + $0x8] sm:$0xff]   ;;  %v1537_v12 = vld [vmem:[%s1633_s29 + $0x10] sm:$0xff]  }
  0x12   : > { %v1534_v5 = vld [vmem:[%s1633_s29 + $0x40] sm:$0xff]   ;;  %1453 = vmatprep.mubr.bf16.mxu0 %v1533_v4  ;;  %v1536_v11 = vld [vmem:[%s1633_s29 + $0x48] sm:$0xff]   ;;  %v1538_v13 = vld [vmem:[%s1633_s29 + $0x50] sm:$0xff]  }
  0x13   : > { %1469 = vmatprep.mubr.bf16.mxu1 %v1534_v5  ;;  %v1539_v14 = vld [vmem:[%s1633_s29 + $0x18] sm:$0xff]   ;;  %v1541_v16 = vld [vmem:[%s1633_s29 + $0x20] sm:$0xff]   ;;  %v1543_v18 = vld [vmem:[%s1633_s29 + $0x28] sm:$0xff]  }
  0x14   : > { %1444 = vmatpush3.bf16.msra.mxu0 %v1528_v3  ;;  %1496 = vmatpush3.bf16.msra.mxu1 %v1528_v3  ;;  %v1540_v15 = vld [vmem:[%s1633_s29 + $0x58] sm:$0xff]   ;;  %v1542_v17 = vld [vmem:[%s1633_s29 + $0x60] sm:$0xff]   ;;  %v1544_v19 = vld [vmem:[%s1633_s29 + $0x68] sm:$0xff]  }
  0x15   : > { %1445 = vmatprep.subr.bf16.mxu0 %v1529_v6  ;;  %1489 = vmatprep.subr.bf16.mxu1 %v1529_v6  ;;  %v1545_v20 = vld [vmem:[%s1633_s29 + $0x30] sm:$0xff]   ;;  %v1547_v22 = vld [vmem:[%s1633_s29 + $0x38] sm:$0xff]  }
  0x16   : > { %v1546_v21 = vld [vmem:[%s1633_s29 + $0x70] sm:$0xff]   ;;  %v1548_v23 = vld [vmem:[%s1633_s29 + $0x78] sm:$0xff]  }
  0x18   : > { %1446 = vmatpush3.bf16.msra.mxu0 %v1529_v6  ;;  %1497 = vmatpush3.bf16.msra.mxu1 %v1529_v6 }
  0x19   : > { %1447 = vmatprep.subr.bf16.mxu0 %v1530_v7  ;;  %1490 = vmatprep.subr.bf16.mxu1 %v1530_v7 }
  0x1c   : > { %1448 = vmatpush3.bf16.msra.mxu0 %v1530_v7  ;;  %1498 = vmatpush3.bf16.msra.mxu1 %v1530_v7 }
  0x1d   : > { %1449 = vmatprep.subr.bf16.mxu0 %v1531_v8  ;;  %1491 = vmatprep.subr.bf16.mxu1 %v1531_v8 }
  0x20   : > { %1450 = vmatpush3.bf16.msra.mxu0 %v1531_v8  ;;  %1499 = vmatpush3.bf16.msra.mxu1 %v1531_v8 }
  0x21   : > { %1451 = vmatprep.subr.bf16.mxu0 %v1532_v9  ;;  %1492 = vmatprep.subr.bf16.mxu1 %v1532_v9 }
  0x24   : > { %1452 = vmatpush3.bf16.msra.mxu0 %v1532_v9  ;;  %1500 = vmatpush3.bf16.msra.mxu1 %v1532_v9 }
  0x27   : > { %1454 = vmatmul.mubr.bf16.vlgmr.msra.gmra.mrb[0].mxu0 %v1535_v10  ;;  %1470 = vmatmul.mubr.bf16.vlgmr.msra.gmra.mrb[0].mxu1 %v1536_v11 }
  0x28   : > { %1457 = vmatprep.mubr.bf16.mxu0 %v1537_v12  ;;  %1473 = vmatprep.mubr.bf16.mxu1 %v1538_v13 }
  0x2f   : > { %1458 = vmatmul.mubr.bf16.gmra.mrb[4].mxu0 %v1539_v14  ;;  %1474 = vmatmul.mubr.bf16.gmra.mrb[4].mxu1 %v1540_v15 }
  0x30   : > { %1461 = vmatprep.mubr.bf16.mxu0 %v1541_v16  ;;  %1477 = vmatprep.mubr.bf16.mxu1 %v1542_v17 }
  0x37   : > { %1462 = vmatmul.mubr.bf16.gmra.mrb[8].mxu0 %v1543_v18  ;;  %1478 = vmatmul.mubr.bf16.gmra.mrb[8].mxu1 %v1544_v19 }
  0x38   : > { %1465 = vmatprep.mubr.bf16.mxu0 %v1545_v20  ;;  %1481 = vmatprep.mubr.bf16.mxu1 %v1546_v21 }
  0x3f   : > { %1466 = vmatmul.mubr.bf16.gmra.mrb[12].mxu0 %v1547_v22  ;;  %1482 = vmatmul.mubr.bf16.gmra.mrb[12].mxu1 %v1548_v23 }
  0xfa   : > { %v1455_v25 = vpop.f32.mrb[0].mxu0  ;;  %v1471_v27 = vpop.f32.mrb[0].mxu1 }
  0xfb   : > { %v830_v28 = vmul.f32 %v1455_v25, %v1669_v24  ;;  %v846_v29 = vmul.f32 %v1471_v27, %v1669_v24  ;;  %v595_v30 = vpop.f32.mrb[1].mxu0  ;;  %v659_v31 = vpop.f32.mrb[1].mxu1 }
  0xfc   : > { %v828_v32 = vmul.f32 %v1669_v24, %v595_v30  ;;  %v844_v33 = vmul.f32 %v1669_v24, %v659_v31  ;;  %v1456_v34 = vpop.f32.mrb[2].mxu0  ;;  %v1472_v35 = vpop.f32.mrb[2].mxu1 }
  0xfd   : > { %v869_v36 = vadd.f32 %v1674_v26, %v830_v28  ;;  %v885_v37 = vadd.f32 %v1674_v26, %v846_v29  ;;  %v831_v38 = vmul.f32 %v1456_v34, %v1669_v24  ;;  %v847_v39 = vmul.f32 %v1472_v35, %v1669_v24  ;;  %v598_v40 = vpop.f32.mrb[3].mxu0  ;;  %v662_v41 = vpop.f32.mrb[3].mxu1 }
  0xfe   : > { %v867_v42 = vadd.f32 %v1674_v26, %v828_v32  ;;  %v883_v43 = vadd.f32 %v1674_v26, %v844_v33  ;;  %v829_v44 = vmul.f32 %v1669_v24, %v598_v40  ;;  %v845_v45 = vmul.f32 %v1669_v24, %v662_v41 }
  0xff   : > { %v870_v46 = vadd.f32 %v1674_v26, %v831_v38  ;;  %v886_v47 = vadd.f32 %v1674_v26, %v847_v39  ;;  %v901_v50 = vmax.f32 %v869_v36, 0.0  ;;  %v917_v51 = vmax.f32 %v885_v37, 0.0 }
 0x100   : > { %v868_v48 = vadd.f32 %v1674_v26, %v829_v44  ;;  %v884_v49 = vadd.f32 %v1674_v26, %v845_v45  ;;  %v899_v54 = vmax.f32 %v867_v42, 0.0  ;;  %v915_v55 = vmax.f32 %v883_v43, 0.0 }
 0x101   : > { %v902_v52 = vmax.f32 %v870_v46, 0.0  ;;  %v918_v53 = vmax.f32 %v886_v47, 0.0 }
 0x102   : > { %v900_v56 = vmax.f32 %v868_v48, 0.0  ;;  %v916_v57 = vmax.f32 %v884_v49, 0.0  ;;  %v1459_v58 = vpop.f32.mrb[4].mxu0  ;;  %v1475_v59 = vpop.f32.mrb[4].mxu1 }
 0x103   : > { %v1326_v60 = vpack.c.bf16 %v902_v52, %v901_v50  ;;  %v1366_v61 = vpack.c.bf16 %v918_v53, %v917_v51  ;;  %v834_v62 = vmul.f32 %v1459_v58, %v1669_v24  ;;  %v850_v63 = vmul.f32 %v1475_v59, %v1669_v24  ;;  %v611_v0 = vpop.f32.mrb[5].mxu0  ;;  %v675_v1 = vpop.f32.mrb[5].mxu1 }
 0x104   : > { %v1321_v2 = vpack.c.bf16 %v900_v56, %v899_v54  ;;  %v1361_v3 = vpack.c.bf16 %v916_v57, %v915_v55  ;;  %v832_v4 = vmul.f32 %v1669_v24, %v611_v0  ;;  %v848_v5 = vmul.f32 %v1669_v24, %v675_v1  ;;  %v1460_v6 = vpop.f32.mrb[6].mxu0  ;;  %v1476_v7 = vpop.f32.mrb[6].mxu1 }
 0x105   : > { %1398 = vst [vmem:[%s1697_s24 + $0x8] sm:$0xff] %v1326_v60   ;;  %1406 = vst [vmem:[%s1697_s24 + $0x48] sm:$0xff] %v1366_v61   ;;  %v873_v8 = vadd.f32 %v1674_v26, %v834_v62  ;;  %v889_v9 = vadd.f32 %v1674_v26, %v850_v63  ;;  %v835_v10 = vmul.f32 %v1460_v6, %v1669_v24  ;;  %v614_v12 = vpop.f32.mrb[7].mxu0  ;;  %v678_v13 = vpop.f32.mrb[7].mxu1 }
 0x106   : > { %v851_v11 = vmul.f32 %v1476_v7, %v1669_v24  ;;  %1322 = vst [vmem:[%s1697_s24] sm:$0xff] %v1321_v2   ;;  %1405 = vst [vmem:[%s1697_s24 + $0x40] sm:$0xff] %v1361_v3   ;;  %v871_v14 = vadd.f32 %v1674_v26, %v832_v4  ;;  %v887_v15 = vadd.f32 %v1674_v26, %v848_v5 }
 0x107   : > { %v833_v16 = vmul.f32 %v1669_v24, %v614_v12  ;;  %v849_v17 = vmul.f32 %v1669_v24, %v678_v13  ;;  %v874_v18 = vadd.f32 %v1674_v26, %v835_v10  ;;  %v905_v22 = vmax.f32 %v873_v8, 0.0 }
 0x108   : > { %v890_v19 = vadd.f32 %v1674_v26, %v851_v11  ;;  %v921_v23 = vmax.f32 %v889_v9, 0.0  ;;  %v903_v28 = vmax.f32 %v871_v14, 0.0  ;;  %v919_v29 = vmax.f32 %v887_v15, 0.0 }
 0x109   : > { %v872_v20 = vadd.f32 %v1674_v26, %v833_v16  ;;  %v888_v21 = vadd.f32 %v1674_v26, %v849_v17  ;;  %v906_v25 = vmax.f32 %v874_v18, 0.0 }
 0x10a   : > { %v922_v27 = vmax.f32 %v890_v19, 0.0  ;;  %v1463_v32 = vpop.f32.mrb[8].mxu0  ;;  %v1479_v33 = vpop.f32.mrb[8].mxu1 }
 0x10b   : > { %v904_v30 = vmax.f32 %v872_v20, 0.0  ;;  %v920_v31 = vmax.f32 %v888_v21, 0.0  ;;  %v1336_v34 = vpack.c.bf16 %v906_v25, %v905_v22  ;;  %v838_v36 = vmul.f32 %v1463_v32, %v1669_v24  ;;  %v627_v38 = vpop.f32.mrb[9].mxu0  ;;  %v691_v39 = vpop.f32.mrb[9].mxu1 }
 0x10c   : > { %v1376_v35 = vpack.c.bf16 %v922_v27, %v921_v23  ;;  %v854_v37 = vmul.f32 %v1479_v33, %v1669_v24  ;;  %v836_v42 = vmul.f32 %v1669_v24, %v627_v38  ;;  %v852_v43 = vmul.f32 %v1669_v24, %v691_v39  ;;  %v1464_v44 = vpop.f32.mrb[10].mxu0  ;;  %v1480_v45 = vpop.f32.mrb[10].mxu1 }
 0x10d   : > { %v1331_v40 = vpack.c.bf16 %v904_v30, %v903_v28  ;;  %v1371_v41 = vpack.c.bf16 %v920_v31, %v919_v29  ;;  %1400 = vst [vmem:[%s1697_s24 + $0x18] sm:$0xff] %v1336_v34   ;;  %v877_v46 = vadd.f32 %v1674_v26, %v838_v36  ;;  %v839_v48 = vmul.f32 %v1464_v44, %v1669_v24  ;;  %v630_v50 = vpop.f32.mrb[11].mxu0  ;;  %v694_v51 = vpop.f32.mrb[11].mxu1 }
 0x10e   : > { %1408 = vst [vmem:[%s1697_s24 + $0x58] sm:$0xff] %v1376_v35   ;;  %v893_v47 = vadd.f32 %v1674_v26, %v854_v37  ;;  %v855_v49 = vmul.f32 %v1480_v45, %v1669_v24  ;;  %v875_v52 = vadd.f32 %v1674_v26, %v836_v42  ;;  %v891_v53 = vadd.f32 %v1674_v26, %v852_v43 }
 0x10f   : > { %1399 = vst [vmem:[%s1697_s24 + $0x10] sm:$0xff] %v1331_v40   ;;  %1407 = vst [vmem:[%s1697_s24 + $0x50] sm:$0xff] %v1371_v41   ;;  %v837_v54 = vmul.f32 %v1669_v24, %v630_v50  ;;  %v853_v55 = vmul.f32 %v1669_v24, %v694_v51  ;;  %v878_v56 = vadd.f32 %v1674_v26, %v839_v48  ;;  %v909_v60 = vmax.f32 %v877_v46, 0.0 }
 0x110   : > { %v894_v57 = vadd.f32 %v1674_v26, %v855_v49  ;;  %v925_v61 = vmax.f32 %v893_v47, 0.0  ;;  %v907_v0 = vmax.f32 %v875_v52, 0.0  ;;  %v923_v1 = vmax.f32 %v891_v53, 0.0 }
 0x111   : > { %v876_v58 = vadd.f32 %v1674_v26, %v837_v54  ;;  %v892_v59 = vadd.f32 %v1674_v26, %v853_v55  ;;  %v910_v62 = vmax.f32 %v878_v56, 0.0 }
 0x112   : > { %v926_v63 = vmax.f32 %v894_v57, 0.0  ;;  %v1467_v4 = vpop.f32.mrb[12].mxu0  ;;  %v1483_v5 = vpop.f32.mrb[12].mxu1 }
 0x113   : > { %v908_v2 = vmax.f32 %v876_v58, 0.0  ;;  %v924_v3 = vmax.f32 %v892_v59, 0.0  ;;  %v1346_v6 = vpack.c.bf16 %v910_v62, %v909_v60  ;;  %v842_v8 = vmul.f32 %v1467_v4, %v1669_v24  ;;  %v643_v10 = vpop.f32.mrb[13].mxu0  ;;  %v707_v11 = vpop.f32.mrb[13].mxu1 }
 0x114   : > { %v1386_v7 = vpack.c.bf16 %v926_v63, %v925_v61  ;;  %v858_v9 = vmul.f32 %v1483_v5, %v1669_v24  ;;  %v840_v14 = vmul.f32 %v1669_v24, %v643_v10  ;;  %v856_v15 = vmul.f32 %v1669_v24, %v707_v11  ;;  %v1468_v16 = vpop.f32.mrb[14].mxu0  ;;  %v1484_v17 = vpop.f32.mrb[14].mxu1 }
 0x115   : > { %v1341_v12 = vpack.c.bf16 %v908_v2, %v907_v0  ;;  %v1381_v13 = vpack.c.bf16 %v924_v3, %v923_v1  ;;  %1402 = vst [vmem:[%s1697_s24 + $0x28] sm:$0xff] %v1346_v6   ;;  %v881_v18 = vadd.f32 %v1674_v26, %v842_v8  ;;  %v843_v20 = vmul.f32 %v1468_v16, %v1669_v24  ;;  %v646_v22 = vpop.f32.mrb[15].mxu0  ;;  %v710_v23 = vpop.f32.mrb[15].mxu1 }
 0x116   : > { %1410 = vst [vmem:[%s1697_s24 + $0x68] sm:$0xff] %v1386_v7   ;;  %v897_v19 = vadd.f32 %v1674_v26, %v858_v9  ;;  %v859_v21 = vmul.f32 %v1484_v17, %v1669_v24  ;;  %v879_v25 = vadd.f32 %v1674_v26, %v840_v14  ;;  %v895_v27 = vadd.f32 %v1674_v26, %v856_v15 }
 0x117   : > { %1401 = vst [vmem:[%s1697_s24 + $0x20] sm:$0xff] %v1341_v12   ;;  %1409 = vst [vmem:[%s1697_s24 + $0x60] sm:$0xff] %v1381_v13   ;;  %v841_v28 = vmul.f32 %v1669_v24, %v646_v22  ;;  %v857_v29 = vmul.f32 %v1669_v24, %v710_v23  ;;  %v882_v30 = vadd.f32 %v1674_v26, %v843_v20  ;;  %v913_v34 = vmax.f32 %v881_v18, 0.0 }
 0x118   : > { %v898_v31 = vadd.f32 %v1674_v26, %v859_v21  ;;  %v929_v35 = vmax.f32 %v897_v19, 0.0  ;;  %v911_v38 = vmax.f32 %v879_v25, 0.0  ;;  %v927_v39 = vmax.f32 %v895_v27, 0.0 }
 0x119   : > { %v880_v32 = vadd.f32 %v1674_v26, %v841_v28  ;;  %v896_v33 = vadd.f32 %v1674_v26, %v857_v29  ;;  %v914_v36 = vmax.f32 %v882_v30, 0.0 }
 0x11a   : > { %v930_v37 = vmax.f32 %v898_v31, 0.0 }
 0x11b   : > { %v912_v40 = vmax.f32 %v880_v32, 0.0  ;;  %v928_v24 = vmax.f32 %v896_v33, 0.0  ;;  %v1356_v41 = vpack.c.bf16 %v914_v36, %v913_v34 }
 0x11c   : > { %v1396_v42 = vpack.c.bf16 %v930_v37, %v929_v35 }
 0x11d   : > { %v1351_v43 = vpack.c.bf16 %v912_v40, %v911_v38  ;;  %v1391_v44 = vpack.c.bf16 %v928_v24, %v927_v39  ;;  %1404 = vst [vmem:[%s1697_s24 + $0x38] sm:$0xff] %v1356_v41  }
 0x11e   : > { %1412 = vst [vmem:[%s1697_s24 + $0x78] sm:$0xff] %v1396_v42  }
 0x11f   : > { %1403 = vst [vmem:[%s1697_s24 + $0x30] sm:$0xff] %v1351_v43   ;;  %1411 = vst [vmem:[%s1697_s24 + $0x70] sm:$0xff] %v1391_v44  }
 0x120 PF: > { %s14_s17 = sadd.s32 1, %s1571_s17   ;;  %s1777_s15 = smov %s1567_s16 }
 0x121   : > { %p11_p5 = scmp.ge.s32.totalorder %s14_s17, 4   ;;  %s1778_s16 = smov %s1780_s18 }
 0x123   :  { %13 = sbr.rel (!%p11_p5) target bundleno = 2 (0x2), region = 83 }

// kernel: bottleneck_pallas.6
= control target key start
LH: loop header
LB: loop body
LE: loop exit
PB: predicated region body
PF: predicated region fallthrough
CT: control target
= control target key end

     0   :  { %s1279_s15 = smov 0   ;;  %s1281_s16 = smov 0   ;;  %s1466_s0 = inlined_call_operand.vmem [shape: bf16[512,128], index: 0, kind: input, shape index: {}]   ;;  %s1467_s1 = inlined_call_operand.vmem [shape: bf16[128,128], index: 1, kind: input, shape index: {}]   ;;  %s1468_s2 = inlined_call_operand.vmem [shape: f32[1,128], index: 2, kind: input, shape index: {}]   ;;  %s1469_s3 = inlined_call_operand.vmem [shape: f32[1,128], index: 3, kind: input, shape index: {}]   ;;  %s1470_s4 = inlined_call_operand.vmem [shape: f32[512,128], index: 4, kind: output, shape index: {}]  }
   0x1   :  { %s1283_s17 = smov 0  }
   0x2 LB: > { %s33_s18 = sadd.s32 1, %s1248_s16  ;;  %p1061_p0 = scmp.ge.s32.totalorder %s1252_s17, 1  ;;  %s1252_s17 = sphi %s1283_s17, %s14_s17   ;;  %s1248_s16 = sphi %s1281_s16, %s1472_s16   ;;  %s1244_s15 = sphi %s1279_s15, %s1471_s15  }
   0x3   : > { %p35_p1 = scmp.ge.s32.totalorder %s33_s18, 2  ;;  %p221_p2 = scmp.lt.s32.totalorder %s1252_s17, 3 }
   0x5   : > { %s1474_s18 = smov (%p35_p1, %s33_s18), 0  ;;  %p222_p3 = pnand %p1061_p0, %p221_p2 }
   0x6   : > { %v1206_v0 = vld [vmem:[%s1467_s1] sm:$0xff] (!%p222_p3)   ;;  %s1062_s21 = sshll.u32 (!%p222_p3), %s1244_s15, 5  ;;  %v1207_v1 = vld [vmem:[%s1467_s1 + $0x8] sm:$0xff] (!%p222_p3)   ;;  %v1208_v2 = vld [vmem:[%s1467_s1 + $0x10] sm:$0xff] (!%p222_p3)  }
   0x7   : > { %225 = sbr.rel (%p222_p3) target bundleno = 283 (0x11b), region = 36  ;;  %p268_p4 = scmp.lt.s32.totalorder (!%p222_p3), %s1062_s21, 63  ;;  %1118 = vmatprep.subr.bf16.mxu0 (!%p222_p3), %v1206_v0  ;;  %1166 = vmatprep.subr.bf16.mxu1 (!%p222_p3), %v1206_v0  ;;  %v1209_v3 = vld [vmem:[%s1467_s1 + $0x18] sm:$0xff] (!%p222_p3)   ;;  %v1210_v6 = vld [vmem:[%s1467_s1 + $0x20] sm:$0xff] (!%p222_p3)   ;;  %v1211_v7 = vld [vmem:[%s1467_s1 + $0x28] sm:$0xff] (!%p222_p3)  }
   0x8   : > { %1119 = vmatpush3.bf16.msra.mxu0 (!%p222_p3), %v1206_v0  ;;  %1174 = vmatpush3.bf16.msra.mxu1 (!%p222_p3), %v1206_v0  ;;  %v1212_v8 = vld [vmem:[%s1467_s1 + $0x30] sm:$0xff] (!%p222_p3)   ;;  %v1213_v9 = vld [vmem:[%s1467_s1 + $0x38] sm:$0xff] (!%p222_p3)   ;;  %v1348_v24 = vld [vmem:[%s1468_s2] ss:$0 sm:$0xff] (!%p222_p3) }
   0x9   : > { %1120 = vmatprep.subr.bf16.mxu0 (!%p222_p3), %v1207_v1  ;;  %1167 = vmatprep.subr.bf16.mxu1 (!%p222_p3), %v1207_v1  ;;  %v1354_v26 = vld [vmem:[%s1469_s3] ss:$0 sm:$0xff] (!%p222_p3) }
   0xc   : > { %1121 = vmatpush3.bf16.msra.mxu0 (!%p222_p3), %v1207_v1  ;;  %1175 = vmatpush3.bf16.msra.mxu1 (!%p222_p3), %v1207_v1 }
   0xd   : > { %1122 = vmatprep.subr.bf16.mxu0 (!%p222_p3), %v1208_v2  ;;  %1168 = vmatprep.subr.bf16.mxu1 (!%p222_p3), %v1208_v2 }
   0xe   : > { %s1476_s21 = smov (!%p268_p4, %s1062_s21), 63 }
   0xf   : > { %s1063_s26 = sshll.u32 %s1476_s21, 2  ;;  %s1065_s19 = sshll.u32 %s1476_s21, 3 }
  0x10   : > { %s1312_s29 = scalar_lea.vmem %s1466_s0, %s1063_s26  ;;  %1123 = vmatpush3.bf16.msra.mxu0 %v1208_v2  ;;  %1176 = vmatpush3.bf16.msra.mxu1 %v1208_v2  ;;  %s1361_s25 = scalar_lea.vmem %s1470_s4, %s1065_s19 }
  0x11   : > { %v1214_v4 = vld [vmem:[%s1312_s29] sm:$0xff]   ;;  %1124 = vmatprep.subr.bf16.mxu0 %v1209_v3  ;;  %1169 = vmatprep.subr.bf16.mxu1 %v1209_v3  ;;  %v1216_v10 = vld [vmem:[%s1312_s29 + $0x8] sm:$0xff]   ;;  %v1218_v12 = vld [vmem:[%s1312_s29 + $0x10] sm:$0xff]  }
  0x12   : > { %v1215_v5 = vld [vmem:[%s1312_s29 + $0x40] sm:$0xff]   ;;  %1134 = vmatprep.mubr.bf16.mxu0 %v1214_v4  ;;  %v1217_v11 = vld [vmem:[%s1312_s29 + $0x48] sm:$0xff]   ;;  %v1219_v13 = vld [vmem:[%s1312_s29 + $0x50] sm:$0xff]  }
  0x13   : > { %1150 = vmatprep.mubr.bf16.mxu1 %v1215_v5  ;;  %v1220_v14 = vld [vmem:[%s1312_s29 + $0x18] sm:$0xff]   ;;  %v1222_v16 = vld [vmem:[%s1312_s29 + $0x20] sm:$0xff]   ;;  %v1224_v18 = vld [vmem:[%s1312_s29 + $0x28] sm:$0xff]  }
  0x14   : > { %1125 = vmatpush3.bf16.msra.mxu0 %v1209_v3  ;;  %1177 = vmatpush3.bf16.msra.mxu1 %v1209_v3  ;;  %v1221_v15 = vld [vmem:[%s1312_s29 + $0x58] sm:$0xff]   ;;  %v1223_v17 = vld [vmem:[%s1312_s29 + $0x60] sm:$0xff]   ;;  %v1225_v19 = vld [vmem:[%s1312_s29 + $0x68] sm:$0xff]  }
  0x15   : > { %1126 = vmatprep.subr.bf16.mxu0 %v1210_v6  ;;  %1170 = vmatprep.subr.bf16.mxu1 %v1210_v6  ;;  %v1226_v20 = vld [vmem:[%s1312_s29 + $0x30] sm:$0xff]   ;;  %v1228_v22 = vld [vmem:[%s1312_s29 + $0x38] sm:$0xff]  }
  0x16   : > { %v1227_v21 = vld [vmem:[%s1312_s29 + $0x70] sm:$0xff]   ;;  %v1229_v23 = vld [vmem:[%s1312_s29 + $0x78] sm:$0xff]  }
  0x18   : > { %1127 = vmatpush3.bf16.msra.mxu0 %v1210_v6  ;;  %1178 = vmatpush3.bf16.msra.mxu1 %v1210_v6 }
  0x19   : > { %1128 = vmatprep.subr.bf16.mxu0 %v1211_v7  ;;  %1171 = vmatprep.subr.bf16.mxu1 %v1211_v7 }
  0x1c   : > { %1129 = vmatpush3.bf16.msra.mxu0 %v1211_v7  ;;  %1179 = vmatpush3.bf16.msra.mxu1 %v1211_v7 }
  0x1d   : > { %1130 = vmatprep.subr.bf16.mxu0 %v1212_v8  ;;  %1172 = vmatprep.subr.bf16.mxu1 %v1212_v8 }
  0x20   : > { %1131 = vmatpush3.bf16.msra.mxu0 %v1212_v8  ;;  %1180 = vmatpush3.bf16.msra.mxu1 %v1212_v8 }
  0x21   : > { %1132 = vmatprep.subr.bf16.mxu0 %v1213_v9  ;;  %1173 = vmatprep.subr.bf16.mxu1 %v1213_v9 }
  0x24   : > { %1133 = vmatpush3.bf16.msra.mxu0 %v1213_v9  ;;  %1181 = vmatpush3.bf16.msra.mxu1 %v1213_v9 }
  0x27   : > { %1135 = vmatmul.mubr.bf16.vlgmr.msra.gmra.mrb[0].mxu0 %v1216_v10  ;;  %1151 = vmatmul.mubr.bf16.vlgmr.msra.gmra.mrb[0].mxu1 %v1217_v11 }
  0x28   : > { %1138 = vmatprep.mubr.bf16.mxu0 %v1218_v12  ;;  %1154 = vmatprep.mubr.bf16.mxu1 %v1219_v13 }
  0x2f   : > { %1139 = vmatmul.mubr.bf16.gmra.mrb[4].mxu0 %v1220_v14  ;;  %1155 = vmatmul.mubr.bf16.gmra.mrb[4].mxu1 %v1221_v15 }
  0x30   : > { %1142 = vmatprep.mubr.bf16.mxu0 %v1222_v16  ;;  %1158 = vmatprep.mubr.bf16.mxu1 %v1223_v17 }
  0x37   : > { %1143 = vmatmul.mubr.bf16.gmra.mrb[8].mxu0 %v1224_v18  ;;  %1159 = vmatmul.mubr.bf16.gmra.mrb[8].mxu1 %v1225_v19 }
  0x38   : > { %1146 = vmatprep.mubr.bf16.mxu0 %v1226_v20  ;;  %1162 = vmatprep.mubr.bf16.mxu1 %v1227_v21 }
  0x3f   : > { %1147 = vmatmul.mubr.bf16.gmra.mrb[12].mxu0 %v1228_v22  ;;  %1163 = vmatmul.mubr.bf16.gmra.mrb[12].mxu1 %v1229_v23 }
  0xfa   : > { %v1136_v25 = vpop.f32.mrb[0].mxu0  ;;  %v1152_v27 = vpop.f32.mrb[0].mxu1 }
  0xfb   : > { %v830_v28 = vmul.f32 %v1136_v25, %v1348_v24  ;;  %v846_v29 = vmul.f32 %v1152_v27, %v1348_v24  ;;  %v595_v30 = vpop.f32.mrb[1].mxu0  ;;  %v659_v31 = vpop.f32.mrb[1].mxu1 }
  0xfc   : > { %v828_v32 = vmul.f32 %v1348_v24, %v595_v30  ;;  %v844_v33 = vmul.f32 %v1348_v24, %v659_v31  ;;  %v1137_v34 = vpop.f32.mrb[2].mxu0  ;;  %v1153_v35 = vpop.f32.mrb[2].mxu1 }
  0xfd   : > { %v869_v36 = vadd.f32 %v1354_v26, %v830_v28  ;;  %v885_v37 = vadd.f32 %v1354_v26, %v846_v29  ;;  %v831_v38 = vmul.f32 %v1137_v34, %v1348_v24  ;;  %v847_v39 = vmul.f32 %v1153_v35, %v1348_v24  ;;  %v598_v40 = vpop.f32.mrb[3].mxu0  ;;  %v662_v41 = vpop.f32.mrb[3].mxu1 }
  0xfe   : > { %v867_v42 = vadd.f32 %v1354_v26, %v828_v32  ;;  %v883_v43 = vadd.f32 %v1354_v26, %v844_v33  ;;  %v829_v44 = vmul.f32 %v1348_v24, %v598_v40  ;;  %v845_v45 = vmul.f32 %v1348_v24, %v662_v41 }
  0xff   : > { %901 = vst [vmem:[%s1361_s25 + $0x10] sm:$0xff] %v869_v36  ;;  %917 = vst [vmem:[%s1361_s25 + $0x90] sm:$0xff] %v885_v37  ;;  %v870_v46 = vadd.f32 %v1354_v26, %v831_v38  ;;  %v886_v47 = vadd.f32 %v1354_v26, %v847_v39 }
 0x100   : > { %899 = vst [vmem:[%s1361_s25] sm:$0xff] %v867_v42  ;;  %915 = vst [vmem:[%s1361_s25 + $0x80] sm:$0xff] %v883_v43  ;;  %v868_v48 = vadd.f32 %v1354_v26, %v829_v44  ;;  %v884_v49 = vadd.f32 %v1354_v26, %v845_v45 }
 0x101   : > { %902 = vst [vmem:[%s1361_s25 + $0x18] sm:$0xff] %v870_v46  ;;  %918 = vst [vmem:[%s1361_s25 + $0x98] sm:$0xff] %v886_v47 }
 0x102   : > { %900 = vst [vmem:[%s1361_s25 + $0x8] sm:$0xff] %v868_v48  ;;  %916 = vst [vmem:[%s1361_s25 + $0x88] sm:$0xff] %v884_v49  ;;  %v1140_v50 = vpop.f32.mrb[4].mxu0  ;;  %v1156_v51 = vpop.f32.mrb[4].mxu1 }
 0x103   : > { %v834_v52 = vmul.f32 %v1140_v50, %v1348_v24  ;;  %v850_v53 = vmul.f32 %v1156_v51, %v1348_v24  ;;  %v611_v54 = vpop.f32.mrb[5].mxu0  ;;  %v675_v55 = vpop.f32.mrb[5].mxu1 }
 0x104   : > { %v832_v56 = vmul.f32 %v1348_v24, %v611_v54  ;;  %v848_v57 = vmul.f32 %v1348_v24, %v675_v55  ;;  %v1141_v58 = vpop.f32.mrb[6].mxu0  ;;  %v1157_v59 = vpop.f32.mrb[6].mxu1 }
 0x105   : > { %v873_v60 = vadd.f32 %v1354_v26, %v834_v52  ;;  %v889_v61 = vadd.f32 %v1354_v26, %v850_v53  ;;  %v835_v62 = vmul.f32 %v1141_v58, %v1348_v24  ;;  %v851_v63 = vmul.f32 %v1157_v59, %v1348_v24  ;;  %v614_v0 = vpop.f32.mrb[7].mxu0  ;;  %v678_v1 = vpop.f32.mrb[7].mxu1 }
 0x106   : > { %v871_v2 = vadd.f32 %v1354_v26, %v832_v56  ;;  %v887_v3 = vadd.f32 %v1354_v26, %v848_v57  ;;  %v833_v4 = vmul.f32 %v1348_v24, %v614_v0  ;;  %v849_v5 = vmul.f32 %v1348_v24, %v678_v1 }
 0x107   : > { %905 = vst [vmem:[%s1361_s25 + $0x30] sm:$0xff] %v873_v60  ;;  %921 = vst [vmem:[%s1361_s25 + $0xb0] sm:$0xff] %v889_v61  ;;  %v874_v6 = vadd.f32 %v1354_v26, %v835_v62  ;;  %v890_v7 = vadd.f32 %v1354_v26, %v851_v63 }
 0x108   : > { %903 = vst [vmem:[%s1361_s25 + $0x20] sm:$0xff] %v871_v2  ;;  %919 = vst [vmem:[%s1361_s25 + $0xa0] sm:$0xff] %v887_v3  ;;  %v872_v8 = vadd.f32 %v1354_v26, %v833_v4  ;;  %v888_v9 = vadd.f32 %v1354_v26, %v849_v5 }
 0x109   : > { %906 = vst [vmem:[%s1361_s25 + $0x38] sm:$0xff] %v874_v6  ;;  %922 = vst [vmem:[%s1361_s25 + $0xb8] sm:$0xff] %v890_v7 }
 0x10a   : > { %904 = vst [vmem:[%s1361_s25 + $0x28] sm:$0xff] %v872_v8  ;;  %920 = vst [vmem:[%s1361_s25 + $0xa8] sm:$0xff] %v888_v9  ;;  %v1144_v10 = vpop.f32.mrb[8].mxu0  ;;  %v1160_v11 = vpop.f32.mrb[8].mxu1 }
 0x10b   : > { %v838_v12 = vmul.f32 %v1144_v10, %v1348_v24  ;;  %v854_v13 = vmul.f32 %v1160_v11, %v1348_v24  ;;  %v627_v14 = vpop.f32.mrb[9].mxu0  ;;  %v691_v15 = vpop.f32.mrb[9].mxu1 }
 0x10c   : > { %v836_v16 = vmul.f32 %v1348_v24, %v627_v14  ;;  %v852_v17 = vmul.f32 %v1348_v24, %v691_v15  ;;  %v1145_v18 = vpop.f32.mrb[10].mxu0  ;;  %v1161_v19 = vpop.f32.mrb[10].mxu1 }
 0x10d   : > { %v877_v20 = vadd.f32 %v1354_v26, %v838_v12  ;;  %v893_v21 = vadd.f32 %v1354_v26, %v854_v13  ;;  %v839_v22 = vmul.f32 %v1145_v18, %v1348_v24  ;;  %v855_v23 = vmul.f32 %v1161_v19, %v1348_v24  ;;  %v630_v25 = vpop.f32.mrb[11].mxu0  ;;  %v694_v27 = vpop.f32.mrb[11].mxu1 }
 0x10e   : > { %v875_v28 = vadd.f32 %v1354_v26, %v836_v16  ;;  %v891_v29 = vadd.f32 %v1354_v26, %v852_v17  ;;  %v837_v30 = vmul.f32 %v1348_v24, %v630_v25  ;;  %v853_v31 = vmul.f32 %v1348_v24, %v694_v27 }
 0x10f   : > { %909 = vst [vmem:[%s1361_s25 + $0x50] sm:$0xff] %v877_v20  ;;  %925 = vst [vmem:[%s1361_s25 + $0xd0] sm:$0xff] %v893_v21  ;;  %v878_v32 = vadd.f32 %v1354_v26, %v839_v22  ;;  %v894_v33 = vadd.f32 %v1354_v26, %v855_v23 }
 0x110   : > { %907 = vst [vmem:[%s1361_s25 + $0x40] sm:$0xff] %v875_v28  ;;  %923 = vst [vmem:[%s1361_s25 + $0xc0] sm:$0xff] %v891_v29  ;;  %v876_v34 = vadd.f32 %v1354_v26, %v837_v30  ;;  %v892_v35 = vadd.f32 %v1354_v26, %v853_v31 }
 0x111   : > { %910 = vst [vmem:[%s1361_s25 + $0x58] sm:$0xff] %v878_v32  ;;  %926 = vst [vmem:[%s1361_s25 + $0xd8] sm:$0xff] %v894_v33 }
 0x112   : > { %908 = vst [vmem:[%s1361_s25 + $0x48] sm:$0xff] %v876_v34  ;;  %924 = vst [vmem:[%s1361_s25 + $0xc8] sm:$0xff] %v892_v35  ;;  %v1148_v36 = vpop.f32.mrb[12].mxu0  ;;  %v1164_v37 = vpop.f32.mrb[12].mxu1 }
 0x113   : > { %v842_v38 = vmul.f32 %v1148_v36, %v1348_v24  ;;  %v858_v39 = vmul.f32 %v1164_v37, %v1348_v24  ;;  %v643_v40 = vpop.f32.mrb[13].mxu0  ;;  %v707_v41 = vpop.f32.mrb[13].mxu1 }
 0x114   : > { %v840_v42 = vmul.f32 %v1348_v24, %v643_v40  ;;  %v856_v43 = vmul.f32 %v1348_v24, %v707_v41  ;;  %v1149_v44 = vpop.f32.mrb[14].mxu0  ;;  %v1165_v45 = vpop.f32.mrb[14].mxu1 }
 0x115   : > { %v881_v46 = vadd.f32 %v1354_v26, %v842_v38  ;;  %v897_v47 = vadd.f32 %v1354_v26, %v858_v39  ;;  %v843_v48 = vmul.f32 %v1149_v44, %v1348_v24  ;;  %v859_v49 = vmul.f32 %v1165_v45, %v1348_v24  ;;  %v646_v50 = vpop.f32.mrb[15].mxu0  ;;  %v710_v51 = vpop.f32.mrb[15].mxu1 }
 0x116   : > { %v879_v52 = vadd.f32 %v1354_v26, %v840_v42  ;;  %v895_v53 = vadd.f32 %v1354_v26, %v856_v43  ;;  %v841_v54 = vmul.f32 %v1348_v24, %v646_v50  ;;  %v857_v55 = vmul.f32 %v1348_v24, %v710_v51 }
 0x117   : > { %913 = vst [vmem:[%s1361_s25 + $0x70] sm:$0xff] %v881_v46  ;;  %929 = vst [vmem:[%s1361_s25 + $0xf0] sm:$0xff] %v897_v47  ;;  %v882_v56 = vadd.f32 %v1354_v26, %v843_v48  ;;  %v898_v57 = vadd.f32 %v1354_v26, %v859_v49 }
 0x118   : > { %911 = vst [vmem:[%s1361_s25 + $0x60] sm:$0xff] %v879_v52  ;;  %927 = vst [vmem:[%s1361_s25 + $0xe0] sm:$0xff] %v895_v53  ;;  %v880_v58 = vadd.f32 %v1354_v26, %v841_v54  ;;  %v896_v59 = vadd.f32 %v1354_v26, %v857_v55 }
 0x119   : > { %914 = vst [vmem:[%s1361_s25 + $0x78] sm:$0xff] %v882_v56  ;;  %930 = vst [vmem:[%s1361_s25 + $0xf8] sm:$0xff] %v898_v57 }
 0x11a   : > { %912 = vst [vmem:[%s1361_s25 + $0x68] sm:$0xff] %v880_v58  ;;  %928 = vst [vmem:[%s1361_s25 + $0xe8] sm:$0xff] %v896_v59 }
 0x11b PF: > { %s14_s17 = sadd.s32 1, %s1252_s17   ;;  %s1471_s15 = smov %s1248_s16 }
 0x11c   : > { %p11_p5 = scmp.ge.s32.totalorder %s14_s17, 4   ;;  %s1472_s16 = smov %s1474_s18 }
 0x11e   :  { %13 = sbr.rel (!%p11_p5) target bundleno = 2 (0x2), region = 83 }

// kernel: bottleneck_pallas.7
= control target key start
LH: loop header
LB: loop body
LE: loop exit
PB: predicated region body
PF: predicated region fallthrough
CT: control target
= control target key end

     0   :  { %s1457_s18 = smov 0   ;;  %s1459_s19 = smov 0   ;;  %s1685_s0 = inlined_call_operand.vmem [shape: bf16[512,128], index: 0, kind: input, shape index: {}]   ;;  %s1686_s1 = inlined_call_operand.vmem [shape: bf16[128,128], index: 1, kind: input, shape index: {}]   ;;  %s1687_s2 = inlined_call_operand.vmem [shape: f32[1,128], index: 2, kind: input, shape index: {}]   ;;  %s1688_s3 = inlined_call_operand.vmem [shape: f32[1,128], index: 3, kind: input, shape index: {}]   ;;  %s1689_s4 = inlined_call_operand.vmem [shape: f32[512,128], index: 4, kind: input, shape index: {}]   ;;  %s1690_s5 = inlined_call_operand.vmem [shape: f32[512,128], index: 5, kind: output, shape index: {}]  }
   0x1   :  { %s1461_s20 = smov 0  }
   0x2 LB: > { %s34_s21 = sadd.s32 1, %s1421_s19  ;;  %p1232_p0 = scmp.ge.s32.totalorder %s1425_s20, 1  ;;  %s1425_s20 = sphi %s1461_s20, %s15_s20   ;;  %s1421_s19 = sphi %s1459_s19, %s1692_s19   ;;  %s1417_s18 = sphi %s1457_s18, %s1691_s18  }
   0x3   : > { %p36_p1 = scmp.ge.s32.totalorder %s34_s21, 2  ;;  %p262_p2 = scmp.lt.s32.totalorder %s1425_s20, 3 }
   0x5   : > { %s1694_s21 = smov (%p36_p1, %s34_s21), 0  ;;  %p263_p3 = pnand %p1232_p0, %p262_p2 }
   0x6   : > { %v1379_v0 = vld [vmem:[%s1686_s1] sm:$0xff] (!%p263_p3)   ;;  %s1233_s24 = sshll.u32 (!%p263_p3), %s1417_s18, 5  ;;  %v1380_v1 = vld [vmem:[%s1686_s1 + $0x8] sm:$0xff] (!%p263_p3)   ;;  %v1381_v2 = vld [vmem:[%s1686_s1 + $0x10] sm:$0xff] (!%p263_p3)  }
   0x7   : > { %266 = sbr.rel (%p263_p3) target bundleno = 289 (0x121), region = 40  ;;  %p319_p4 = scmp.lt.s32.totalorder (!%p263_p3), %s1233_s24, 63  ;;  %1291 = vmatprep.subr.bf16.mxu0 (!%p263_p3), %v1379_v0  ;;  %1339 = vmatprep.subr.bf16.mxu1 (!%p263_p3), %v1379_v0  ;;  %v1382_v3 = vld [vmem:[%s1686_s1 + $0x18] sm:$0xff] (!%p263_p3)   ;;  %v1383_v6 = vld [vmem:[%s1686_s1 + $0x20] sm:$0xff] (!%p263_p3)   ;;  %v1384_v7 = vld [vmem:[%s1686_s1 + $0x28] sm:$0xff] (!%p263_p3)  }
   0x8   : > { %1292 = vmatpush3.bf16.msra.mxu0 (!%p263_p3), %v1379_v0  ;;  %1347 = vmatpush3.bf16.msra.mxu1 (!%p263_p3), %v1379_v0  ;;  %v1385_v8 = vld [vmem:[%s1686_s1 + $0x30] sm:$0xff] (!%p263_p3)   ;;  %v1386_v9 = vld [vmem:[%s1686_s1 + $0x38] sm:$0xff] (!%p263_p3)   ;;  %v1527_v24 = vld [vmem:[%s1687_s2] ss:$0 sm:$0xff] (!%p263_p3) }
   0x9   : > { %1293 = vmatprep.subr.bf16.mxu0 (!%p263_p3), %v1380_v1  ;;  %1340 = vmatprep.subr.bf16.mxu1 (!%p263_p3), %v1380_v1  ;;  %v1539_v26 = vld [vmem:[%s1688_s3] ss:$0 sm:$0xff] (!%p263_p3) }
   0xc   : > { %1294 = vmatpush3.bf16.msra.mxu0 (!%p263_p3), %v1380_v1  ;;  %1348 = vmatpush3.bf16.msra.mxu1 (!%p263_p3), %v1380_v1 }
   0xd   : > { %1295 = vmatprep.subr.bf16.mxu0 (!%p263_p3), %v1381_v2  ;;  %1341 = vmatprep.subr.bf16.mxu1 (!%p263_p3), %v1381_v2 }
   0xe   : > { %s1696_s24 = smov (!%p319_p4, %s1233_s24), 63 }
   0xf   : > { %s1234_s29 = sshll.u32 %s1696_s24, 2  ;;  %s1236_s18 = sshll.u32 %s1696_s24, 3 }
  0x10   : > { %s1490_s7 = scalar_lea.vmem %s1685_s0, %s1234_s29  ;;  %1296 = vmatpush3.bf16.msra.mxu0 %v1381_v2  ;;  %1349 = vmatpush3.bf16.msra.mxu1 %v1381_v2  ;;  %s1534_s27 = scalar_lea.vmem %s1689_s4, %s1236_s18 }
  0x11   : > { %v1387_v4 = vld [vmem:[%s1490_s7] sm:$0xff]   ;;  %1297 = vmatprep.subr.bf16.mxu0 %v1382_v3  ;;  %1342 = vmatprep.subr.bf16.mxu1 %v1382_v3  ;;  %v1389_v10 = vld [vmem:[%s1490_s7 + $0x8] sm:$0xff]   ;;  %v1391_v12 = vld [vmem:[%s1490_s7 + $0x10] sm:$0xff]  }
  0x12   : > { %v1388_v5 = vld [vmem:[%s1490_s7 + $0x40] sm:$0xff]   ;;  %1307 = vmatprep.mubr.bf16.mxu0 %v1387_v4  ;;  %v1390_v11 = vld [vmem:[%s1490_s7 + $0x48] sm:$0xff]   ;;  %v1392_v13 = vld [vmem:[%s1490_s7 + $0x50] sm:$0xff]  }
  0x13   : > { %1323 = vmatprep.mubr.bf16.mxu1 %v1388_v5  ;;  %v1393_v14 = vld [vmem:[%s1490_s7 + $0x18] sm:$0xff]   ;;  %v1395_v16 = vld [vmem:[%s1490_s7 + $0x20] sm:$0xff]   ;;  %v1397_v18 = vld [vmem:[%s1490_s7 + $0x28] sm:$0xff]  }
  0x14   : > { %1298 = vmatpush3.bf16.msra.mxu0 %v1382_v3  ;;  %1350 = vmatpush3.bf16.msra.mxu1 %v1382_v3  ;;  %v1394_v15 = vld [vmem:[%s1490_s7 + $0x58] sm:$0xff]   ;;  %v1396_v17 = vld [vmem:[%s1490_s7 + $0x60] sm:$0xff]   ;;  %v1398_v19 = vld [vmem:[%s1490_s7 + $0x68] sm:$0xff]  }
  0x15   : > { %1299 = vmatprep.subr.bf16.mxu0 %v1383_v6  ;;  %1343 = vmatprep.subr.bf16.mxu1 %v1383_v6  ;;  %v1399_v20 = vld [vmem:[%s1490_s7 + $0x30] sm:$0xff]   ;;  %v1401_v22 = vld [vmem:[%s1490_s7 + $0x38] sm:$0xff]   ;;  %v959_v40 = vld [vmem:[%s1534_s27] sm:$0xff] }
  0x16   : > { %v1400_v21 = vld [vmem:[%s1490_s7 + $0x70] sm:$0xff]   ;;  %v1402_v23 = vld [vmem:[%s1490_s7 + $0x78] sm:$0xff]   ;;  %v975_v41 = vld [vmem:[%s1534_s27 + $0x80] sm:$0xff]  ;;  %s1568_s7 = scalar_lea.vmem %s1690_s5, %s1236_s18 }
  0x17   : > { %v961_v32 = vld [vmem:[%s1534_s27 + $0x10] sm:$0xff]  ;;  %v962_v48 = vld [vmem:[%s1534_s27 + $0x18] sm:$0xff]  ;;  %v960_v56 = vld [vmem:[%s1534_s27 + $0x8] sm:$0xff] }
  0x18   : > { %1300 = vmatpush3.bf16.msra.mxu0 %v1383_v6  ;;  %1351 = vmatpush3.bf16.msra.mxu1 %v1383_v6  ;;  %v977_v33 = vld [vmem:[%s1534_s27 + $0x90] sm:$0xff]  ;;  %v978_v49 = vld [vmem:[%s1534_s27 + $0x98] sm:$0xff]  ;;  %v976_v57 = vld [vmem:[%s1534_s27 + $0x88] sm:$0xff] }
  0x19   : > { %1301 = vmatprep.subr.bf16.mxu0 %v1384_v7  ;;  %1344 = vmatprep.subr.bf16.mxu1 %v1384_v7 }
  0x1c   : > { %1302 = vmatpush3.bf16.msra.mxu0 %v1384_v7  ;;  %1352 = vmatpush3.bf16.msra.mxu1 %v1384_v7 }
  0x1d   : > { %1303 = vmatprep.subr.bf16.mxu0 %v1385_v8  ;;  %1345 = vmatprep.subr.bf16.mxu1 %v1385_v8 }
  0x20   : > { %1304 = vmatpush3.bf16.msra.mxu0 %v1385_v8  ;;  %1353 = vmatpush3.bf16.msra.mxu1 %v1385_v8 }
  0x21   : > { %1305 = vmatprep.subr.bf16.mxu0 %v1386_v9  ;;  %1346 = vmatprep.subr.bf16.mxu1 %v1386_v9 }
  0x24   : > { %1306 = vmatpush3.bf16.msra.mxu0 %v1386_v9  ;;  %1354 = vmatpush3.bf16.msra.mxu1 %v1386_v9 }
  0x27   : > { %1308 = vmatmul.mubr.bf16.vlgmr.msra.gmra.mrb[0].mxu0 %v1389_v10  ;;  %1324 = vmatmul.mubr.bf16.vlgmr.msra.gmra.mrb[0].mxu1 %v1390_v11 }
  0x28   : > { %1311 = vmatprep.mubr.bf16.mxu0 %v1391_v12  ;;  %1327 = vmatprep.mubr.bf16.mxu1 %v1392_v13 }
  0x2f   : > { %1312 = vmatmul.mubr.bf16.gmra.mrb[4].mxu0 %v1393_v14  ;;  %1328 = vmatmul.mubr.bf16.gmra.mrb[4].mxu1 %v1394_v15 }
  0x30   : > { %1315 = vmatprep.mubr.bf16.mxu0 %v1395_v16  ;;  %1331 = vmatprep.mubr.bf16.mxu1 %v1396_v17  ;;  %v965_v16 = vld [vmem:[%s1534_s27 + $0x30] sm:$0xff] }
  0x31   : > { %v981_v17 = vld [vmem:[%s1534_s27 + $0xb0] sm:$0xff] }
  0x37   : > { %1316 = vmatmul.mubr.bf16.gmra.mrb[8].mxu0 %v1397_v18  ;;  %1332 = vmatmul.mubr.bf16.gmra.mrb[8].mxu1 %v1398_v19 }
  0x38   : > { %1319 = vmatprep.mubr.bf16.mxu0 %v1399_v20  ;;  %1335 = vmatprep.mubr.bf16.mxu1 %v1400_v21 }
  0x3f   : > { %1320 = vmatmul.mubr.bf16.gmra.mrb[12].mxu0 %v1401_v22  ;;  %1336 = vmatmul.mubr.bf16.gmra.mrb[12].mxu1 %v1402_v23 }
  0xfa   : > { %v1309_v25 = vpop.f32.mrb[0].mxu0  ;;  %v1325_v27 = vpop.f32.mrb[0].mxu1 }
  0xfb   : > { %v890_v28 = vmul.f32 %v1309_v25, %v1527_v24  ;;  %v906_v29 = vmul.f32 %v1325_v27, %v1527_v24  ;;  %v655_v30 = vpop.f32.mrb[1].mxu0  ;;  %v719_v31 = vpop.f32.mrb[1].mxu1  ;;  %v963_v25 = vld [vmem:[%s1534_s27 + $0x20] sm:$0xff] }
  0xfc   : > { %v888_v34 = vmul.f32 %v1527_v24, %v655_v30  ;;  %v904_v35 = vmul.f32 %v1527_v24, %v719_v31  ;;  %v1310_v36 = vpop.f32.mrb[2].mxu0  ;;  %v1326_v37 = vpop.f32.mrb[2].mxu1  ;;  %v979_v27 = vld [vmem:[%s1534_s27 + $0xa0] sm:$0xff] }
  0xfd   : > { %v929_v38 = vadd.f32 %v1539_v26, %v890_v28  ;;  %v945_v39 = vadd.f32 %v1539_v26, %v906_v29  ;;  %v891_v42 = vmul.f32 %v1310_v36, %v1527_v24  ;;  %v907_v43 = vmul.f32 %v1326_v37, %v1527_v24  ;;  %v658_v44 = vpop.f32.mrb[3].mxu0  ;;  %v722_v45 = vpop.f32.mrb[3].mxu1 }
  0xfe   : > { %v927_v46 = vadd.f32 %v1539_v26, %v888_v34  ;;  %v943_v47 = vadd.f32 %v1539_v26, %v904_v35  ;;  %v889_v50 = vmul.f32 %v1527_v24, %v658_v44  ;;  %v905_v51 = vmul.f32 %v1527_v24, %v722_v45  ;;  %v966_v34 = vld [vmem:[%s1534_s27 + $0x38] sm:$0xff] }
  0xff   : > { %v993_v52 = vadd.f32 %v961_v32, %v929_v38  ;;  %v1009_v53 = vadd.f32 %v977_v33, %v945_v39  ;;  %v930_v54 = vadd.f32 %v1539_v26, %v891_v42  ;;  %v946_v55 = vadd.f32 %v1539_v26, %v907_v43  ;;  %v982_v35 = vld [vmem:[%s1534_s27 + $0xb8] sm:$0xff]  ;;  %v964_v42 = vld [vmem:[%s1534_s27 + $0x28] sm:$0xff] }
 0x100   : > { %v991_v58 = vadd.f32 %v959_v40, %v927_v46  ;;  %v1007_v59 = vadd.f32 %v975_v41, %v943_v47  ;;  %v928_v60 = vadd.f32 %v1539_v26, %v889_v50  ;;  %v944_v61 = vadd.f32 %v1539_v26, %v905_v51  ;;  %v980_v43 = vld [vmem:[%s1534_s27 + $0xa8] sm:$0xff] }
 0x101   : > { %v1025_v62 = vmax.f32 %v993_v52, 0.0  ;;  %v1041_v63 = vmax.f32 %v1009_v53, 0.0  ;;  %v994_v0 = vadd.f32 %v962_v48, %v930_v54  ;;  %v1010_v1 = vadd.f32 %v978_v49, %v946_v55 }
 0x102   : > { %v1023_v2 = vmax.f32 %v991_v58, 0.0  ;;  %v1039_v3 = vmax.f32 %v1007_v59, 0.0  ;;  %v992_v4 = vadd.f32 %v960_v56, %v928_v60  ;;  %v1008_v5 = vadd.f32 %v976_v57, %v944_v61  ;;  %v1313_v6 = vpop.f32.mrb[4].mxu0  ;;  %v1329_v7 = vpop.f32.mrb[4].mxu1 }
 0x103   : > { %1057 = vst [vmem:[%s1568_s7 + $0x10] sm:$0xff] %v1025_v62  ;;  %1073 = vst [vmem:[%s1568_s7 + $0x90] sm:$0xff] %v1041_v63  ;;  %v1026_v8 = vmax.f32 %v994_v0, 0.0  ;;  %v1042_v9 = vmax.f32 %v1010_v1, 0.0  ;;  %v894_v10 = vmul.f32 %v1313_v6, %v1527_v24  ;;  %v910_v11 = vmul.f32 %v1329_v7, %v1527_v24  ;;  %v671_v12 = vpop.f32.mrb[5].mxu0  ;;  %v735_v13 = vpop.f32.mrb[5].mxu1 }
 0x104   : > { %1055 = vst [vmem:[%s1568_s7] sm:$0xff] %v1023_v2  ;;  %1071 = vst [vmem:[%s1568_s7 + $0x80] sm:$0xff] %v1039_v3  ;;  %v1024_v14 = vmax.f32 %v992_v4, 0.0  ;;  %v1040_v15 = vmax.f32 %v1008_v5, 0.0  ;;  %v892_v18 = vmul.f32 %v1527_v24, %v671_v12  ;;  %v908_v19 = vmul.f32 %v1527_v24, %v735_v13  ;;  %v1314_v20 = vpop.f32.mrb[6].mxu0  ;;  %v1330_v21 = vpop.f32.mrb[6].mxu1  ;;  %v969_v2 = vld [vmem:[%s1534_s27 + $0x50] sm:$0xff] }
 0x105   : > { %1058 = vst [vmem:[%s1568_s7 + $0x18] sm:$0xff] %v1026_v8  ;;  %1074 = vst [vmem:[%s1568_s7 + $0x98] sm:$0xff] %v1042_v9  ;;  %v933_v22 = vadd.f32 %v1539_v26, %v894_v10  ;;  %v949_v23 = vadd.f32 %v1539_v26, %v910_v11  ;;  %v895_v28 = vmul.f32 %v1314_v20, %v1527_v24  ;;  %v674_v30 = vpop.f32.mrb[7].mxu0  ;;  %v738_v31 = vpop.f32.mrb[7].mxu1  ;;  %v985_v3 = vld [vmem:[%s1534_s27 + $0xd0] sm:$0xff]  ;;  %v967_v10 = vld [vmem:[%s1534_s27 + $0x40] sm:$0xff] }
 0x106   : > { %v911_v29 = vmul.f32 %v1330_v21, %v1527_v24  ;;  %1056 = vst [vmem:[%s1568_s7 + $0x8] sm:$0xff] %v1024_v14  ;;  %1072 = vst [vmem:[%s1568_s7 + $0x88] sm:$0xff] %v1040_v15  ;;  %v931_v32 = vadd.f32 %v1539_v26, %v892_v18  ;;  %v947_v33 = vadd.f32 %v1539_v26, %v908_v19  ;;  %v983_v11 = vld [vmem:[%s1534_s27 + $0xc0] sm:$0xff]  ;;  %v970_v18 = vld [vmem:[%s1534_s27 + $0x58] sm:$0xff] }
 0x107   : > { %v893_v36 = vmul.f32 %v1527_v24, %v674_v30  ;;  %v909_v37 = vmul.f32 %v1527_v24, %v738_v31  ;;  %v997_v38 = vadd.f32 %v965_v16, %v933_v22  ;;  %v1013_v39 = vadd.f32 %v981_v17, %v949_v23  ;;  %v986_v19 = vld [vmem:[%s1534_s27 + $0xd8] sm:$0xff] }
 0x108   : > { %v934_v40 = vadd.f32 %v1539_v26, %v895_v28  ;;  %v950_v41 = vadd.f32 %v1539_v26, %v911_v29  ;;  %v995_v44 = vadd.f32 %v963_v25, %v931_v32  ;;  %v1011_v45 = vadd.f32 %v979_v27, %v947_v33  ;;  %v968_v28 = vld [vmem:[%s1534_s27 + $0x48] sm:$0xff] }
 0x109   : > { %v932_v46 = vadd.f32 %v1539_v26, %v893_v36  ;;  %v948_v47 = vadd.f32 %v1539_v26, %v909_v37  ;;  %v1029_v48 = vmax.f32 %v997_v38, 0.0  ;;  %v1045_v49 = vmax.f32 %v1013_v39, 0.0  ;;  %v984_v29 = vld [vmem:[%s1534_s27 + $0xc8] sm:$0xff] }
 0x10a   : > { %v998_v50 = vadd.f32 %v966_v34, %v934_v40  ;;  %v1014_v51 = vadd.f32 %v982_v35, %v950_v41  ;;  %v1027_v52 = vmax.f32 %v995_v44, 0.0  ;;  %v1043_v53 = vmax.f32 %v1011_v45, 0.0  ;;  %v1317_v56 = vpop.f32.mrb[8].mxu0  ;;  %v1333_v57 = vpop.f32.mrb[8].mxu1 }
 0x10b   : > { %v996_v54 = vadd.f32 %v964_v42, %v932_v46  ;;  %v1012_v55 = vadd.f32 %v980_v43, %v948_v47  ;;  %1061 = vst [vmem:[%s1568_s7 + $0x30] sm:$0xff] %v1029_v48  ;;  %1077 = vst [vmem:[%s1568_s7 + $0xb0] sm:$0xff] %v1045_v49  ;;  %v898_v60 = vmul.f32 %v1317_v56, %v1527_v24  ;;  %v687_v62 = vpop.f32.mrb[9].mxu0  ;;  %v751_v63 = vpop.f32.mrb[9].mxu1 }
 0x10c   : > { %v1030_v58 = vmax.f32 %v998_v50, 0.0  ;;  %v1046_v59 = vmax.f32 %v1014_v51, 0.0  ;;  %v914_v61 = vmul.f32 %v1333_v57, %v1527_v24  ;;  %1059 = vst [vmem:[%s1568_s7 + $0x20] sm:$0xff] %v1027_v52  ;;  %1075 = vst [vmem:[%s1568_s7 + $0xa0] sm:$0xff] %v1043_v53  ;;  %v896_v4 = vmul.f32 %v1527_v24, %v687_v62  ;;  %v1318_v6 = vpop.f32.mrb[10].mxu0  ;;  %v1334_v7 = vpop.f32.mrb[10].mxu1 }
 0x10d   : > { %v1028_v0 = vmax.f32 %v996_v54, 0.0  ;;  %v1044_v1 = vmax.f32 %v1012_v55, 0.0  ;;  %v912_v5 = vmul.f32 %v1527_v24, %v751_v63  ;;  %v937_v8 = vadd.f32 %v1539_v26, %v898_v60  ;;  %v690_v14 = vpop.f32.mrb[11].mxu0  ;;  %v754_v15 = vpop.f32.mrb[11].mxu1  ;;  %v973_v52 = vld [vmem:[%s1534_s27 + $0x70] sm:$0xff]  ;;  %v971_v60 = vld [vmem:[%s1534_s27 + $0x60] sm:$0xff] }
 0x10e   : > { %1062 = vst [vmem:[%s1568_s7 + $0x38] sm:$0xff] %v1030_v58  ;;  %1078 = vst [vmem:[%s1568_s7 + $0xb8] sm:$0xff] %v1046_v59  ;;  %v953_v9 = vadd.f32 %v1539_v26, %v914_v61  ;;  %v899_v12 = vmul.f32 %v1318_v6, %v1527_v24  ;;  %v915_v13 = vmul.f32 %v1334_v7, %v1527_v24  ;;  %v989_v53 = vld [vmem:[%s1534_s27 + $0xf0] sm:$0xff]  ;;  %v987_v61 = vld [vmem:[%s1534_s27 + $0xe0] sm:$0xff] }
 0x10f   : > { %1060 = vst [vmem:[%s1568_s7 + $0x28] sm:$0xff] %v1028_v0  ;;  %1076 = vst [vmem:[%s1568_s7 + $0xa8] sm:$0xff] %v1044_v1  ;;  %v935_v16 = vadd.f32 %v1539_v26, %v896_v4  ;;  %v951_v17 = vadd.f32 %v1539_v26, %v912_v5  ;;  %v897_v20 = vmul.f32 %v1527_v24, %v690_v14  ;;  %v974_v4 = vld [vmem:[%s1534_s27 + $0x78] sm:$0xff] }
 0x110   : > { %v913_v21 = vmul.f32 %v1527_v24, %v754_v15  ;;  %v1001_v22 = vadd.f32 %v969_v2, %v937_v8  ;;  %v1017_v23 = vadd.f32 %v985_v3, %v953_v9  ;;  %v938_v25 = vadd.f32 %v1539_v26, %v899_v12  ;;  %v990_v5 = vld [vmem:[%s1534_s27 + $0xf8] sm:$0xff]  ;;  %v972_v12 = vld [vmem:[%s1534_s27 + $0x68] sm:$0xff] }
 0x111   : > { %v954_v27 = vadd.f32 %v1539_v26, %v915_v13  ;;  %v999_v30 = vadd.f32 %v967_v10, %v935_v16  ;;  %v1015_v31 = vadd.f32 %v983_v11, %v951_v17  ;;  %v936_v32 = vadd.f32 %v1539_v26, %v897_v20  ;;  %v988_v13 = vld [vmem:[%s1534_s27 + $0xe8] sm:$0xff] }
 0x112   : > { %v952_v33 = vadd.f32 %v1539_v26, %v913_v21  ;;  %v1033_v34 = vmax.f32 %v1001_v22, 0.0  ;;  %v1049_v35 = vmax.f32 %v1017_v23, 0.0  ;;  %v1002_v36 = vadd.f32 %v970_v18, %v938_v25  ;;  %v1321_v42 = vpop.f32.mrb[12].mxu0  ;;  %v1337_v43 = vpop.f32.mrb[12].mxu1 }
 0x113   : > { %v1018_v37 = vadd.f32 %v986_v19, %v954_v27  ;;  %v1031_v38 = vmax.f32 %v999_v30, 0.0  ;;  %v1047_v39 = vmax.f32 %v1015_v31, 0.0  ;;  %v1000_v40 = vadd.f32 %v968_v28, %v936_v32  ;;  %v703_v48 = vpop.f32.mrb[13].mxu0  ;;  %v767_v49 = vpop.f32.mrb[13].mxu1 }
 0x114   : > { %v1016_v41 = vadd.f32 %v984_v29, %v952_v33  ;;  %1065 = vst [vmem:[%s1568_s7 + $0x50] sm:$0xff] %v1033_v34  ;;  %1081 = vst [vmem:[%s1568_s7 + $0xd0] sm:$0xff] %v1049_v35  ;;  %v1034_v44 = vmax.f32 %v1002_v36, 0.0  ;;  %v902_v46 = vmul.f32 %v1321_v42, %v1527_v24  ;;  %v918_v47 = vmul.f32 %v1337_v43, %v1527_v24  ;;  %v1322_v56 = vpop.f32.mrb[14].mxu0  ;;  %v1338_v57 = vpop.f32.mrb[14].mxu1 }
 0x115   : > { %v1050_v45 = vmax.f32 %v1018_v37, 0.0  ;;  %1063 = vst [vmem:[%s1568_s7 + $0x40] sm:$0xff] %v1031_v38  ;;  %1079 = vst [vmem:[%s1568_s7 + $0xc0] sm:$0xff] %v1047_v39  ;;  %v1032_v50 = vmax.f32 %v1000_v40, 0.0  ;;  %v900_v54 = vmul.f32 %v1527_v24, %v703_v48  ;;  %v916_v55 = vmul.f32 %v1527_v24, %v767_v49  ;;  %v706_v0 = vpop.f32.mrb[15].mxu0  ;;  %v770_v1 = vpop.f32.mrb[15].mxu1 }
 0x116   : > { %v1048_v51 = vmax.f32 %v1016_v41, 0.0  ;;  %1066 = vst [vmem:[%s1568_s7 + $0x58] sm:$0xff] %v1034_v44  ;;  %v941_v58 = vadd.f32 %v1539_v26, %v902_v46  ;;  %v957_v59 = vadd.f32 %v1539_v26, %v918_v47  ;;  %v903_v62 = vmul.f32 %v1322_v56, %v1527_v24 }
 0x117   : > { %1082 = vst [vmem:[%s1568_s7 + $0xd8] sm:$0xff] %v1050_v45  ;;  %v919_v63 = vmul.f32 %v1338_v57, %v1527_v24  ;;  %1064 = vst [vmem:[%s1568_s7 + $0x48] sm:$0xff] %v1032_v50  ;;  %v939_v2 = vadd.f32 %v1539_v26, %v900_v54  ;;  %v955_v3 = vadd.f32 %v1539_v26, %v916_v55 }
 0x118   : > { %1080 = vst [vmem:[%s1568_s7 + $0xc8] sm:$0xff] %v1048_v51  ;;  %v901_v6 = vmul.f32 %v1527_v24, %v706_v0  ;;  %v917_v7 = vmul.f32 %v1527_v24, %v770_v1  ;;  %v1005_v8 = vadd.f32 %v973_v52, %v941_v58  ;;  %v1021_v9 = vadd.f32 %v989_v53, %v957_v59 }
 0x119   : > { %v942_v10 = vadd.f32 %v1539_v26, %v903_v62  ;;  %v958_v11 = vadd.f32 %v1539_v26, %v919_v63  ;;  %v1003_v14 = vadd.f32 %v971_v60, %v939_v2  ;;  %v1019_v15 = vadd.f32 %v987_v61, %v955_v3 }
 0x11a   : > { %v940_v16 = vadd.f32 %v1539_v26, %v901_v6  ;;  %v956_v17 = vadd.f32 %v1539_v26, %v917_v7  ;;  %v1037_v18 = vmax.f32 %v1005_v8, 0.0  ;;  %v1053_v24 = vmax.f32 %v1021_v9, 0.0 }
 0x11b   : > { %v1006_v19 = vadd.f32 %v974_v4, %v942_v10  ;;  %v1022_v20 = vadd.f32 %v990_v5, %v958_v11  ;;  %v1035_v21 = vmax.f32 %v1003_v14, 0.0  ;;  %v1051_v22 = vmax.f32 %v1019_v15, 0.0 }
 0x11c   : > { %v1004_v23 = vadd.f32 %v972_v12, %v940_v16  ;;  %v1020_v25 = vadd.f32 %v988_v13, %v956_v17  ;;  %1069 = vst [vmem:[%s1568_s7 + $0x70] sm:$0xff] %v1037_v18  ;;  %1085 = vst [vmem:[%s1568_s7 + $0xf0] sm:$0xff] %v1053_v24 }
 0x11d   : > { %v1038_v27 = vmax.f32 %v1006_v19, 0.0  ;;  %v1054_v28 = vmax.f32 %v1022_v20, 0.0  ;;  %1067 = vst [vmem:[%s1568_s7 + $0x60] sm:$0xff] %v1035_v21  ;;  %1083 = vst [vmem:[%s1568_s7 + $0xe0] sm:$0xff] %v1051_v22 }
 0x11e   : > { %v1036_v29 = vmax.f32 %v1004_v23, 0.0  ;;  %v1052_v26 = vmax.f32 %v1020_v25, 0.0 }
 0x11f   : > { %1070 = vst [vmem:[%s1568_s7 + $0x78] sm:$0xff] %v1038_v27  ;;  %1086 = vst [vmem:[%s1568_s7 + $0xf8] sm:$0xff] %v1054_v28 }
 0x120   : > { %1068 = vst [vmem:[%s1568_s7 + $0x68] sm:$0xff] %v1036_v29  ;;  %1084 = vst [vmem:[%s1568_s7 + $0xe8] sm:$0xff] %v1052_v26 }
 0x121 PF: > { %s15_s20 = sadd.s32 1, %s1425_s20   ;;  %s1691_s18 = smov %s1421_s19 }
 0x122   : > { %p12_p5 = scmp.ge.s32.totalorder %s15_s20, 4   ;;  %s1692_s19 = smov %s1694_s21 }
 0x124   :  { %14 = sbr.rel (!%p12_p5) target bundleno = 2 (0x2), region = 90 }

// kernel: bottleneck_pallas.5
= control target key start
LH: loop header
LB: loop body
LE: loop exit
PB: predicated region body
PF: predicated region fallthrough
CT: control target
= control target key end

     0   :  { %s7643_s15 = smov 0   ;;  %s8380_s0 = inlined_call_operand.vmem [shape: bf16[2,1,326,128], index: 0, kind: input, shape index: {}]   ;;  %s8381_s1 = inlined_call_operand.vmem [shape: bf16[9,128,128], index: 1, kind: input, shape index: {}]   ;;  %s8382_s2 = inlined_call_operand.vmem [shape: f32[1,128], index: 2, kind: input, shape index: {}]   ;;  %s8383_s3 = inlined_call_operand.vmem [shape: f32[1,128], index: 3, kind: input, shape index: {}]   ;;  %s8384_s4 = inlined_call_operand.vmem [shape: bf16[2,288,128], index: 4, kind: output, shape index: {}]  }
   0x1 LB: > { %s5784_s16 = sadd.s32 4294967295, %s7616_s15   ;;  %p5788_p0 = scmp.ge.s32.totalorder %s7616_s15, 1  ;;  %s7616_s15 = sphi %s7643_s15, %s14_s15  }
   0x2   : > { %p162_p1 = scmp.lt.s32.totalorder %s7616_s15, 3 }
   0x4   : > { %p163_p2 = pnand %p5788_p0, %p162_p1 }
   0x5   : > { %v7360_v0 = vld [vmem:[%s8381_s1] sm:$0xff] (!%p163_p2)   ;;  %v7362_v2 = vld [vmem:[%s8381_s1 + $0x8] sm:$0xff] (!%p163_p2)   ;;  %p188_p3 = scmp.lt.s32.totalorder (!%p163_p2), %s5784_s16, 1  ;;  %v7364_v4 = vld [vmem:[%s8381_s1 + $0x10] sm:$0xff] (!%p163_p2)   ;;  %vm2629_vm0 = vsmask.f32 (!%p163_p2), 6400 }
   0x6   : > { %166 = sbr.rel (%p163_p2) target bundleno = 584 (0x248), region = 36  ;;  %v7361_v1 = vld [vmem:[%s8381_s1 + $0x100] sm:$0xff] (!%p163_p2)   ;;  %6578 = vmatprep.subr.bf16.mxu1 (!%p163_p2), %v7360_v0  ;;  %v7363_v3 = vld [vmem:[%s8381_s1 + $0x108] sm:$0xff] (!%p163_p2)   ;;  %v7365_v5 = vld [vmem:[%s8381_s1 + $0x110] sm:$0xff] (!%p163_p2)   ;;  %vm3298_vm1 = vcmask (!%p163_p2), 1045504   ;;  %vm1558_vm3 = vcmask (!%p163_p2), 1046528  }
   0x7   : > { %6786 = vmatprep.subr.bf16.mxu0 (!%p163_p2), %v7361_v1  ;;  %6579 = vmatpush3.bf16.msra.mxu1 (!%p163_p2), %v7360_v0  ;;  %v7366_v6 = vld [vmem:[%s8381_s1 + $0x18] sm:$0xff] (!%p163_p2)   ;;  %v7368_v8 = vld [vmem:[%s8381_s1 + $0x20] sm:$0xff] (!%p163_p2)   ;;  %v7370_v10 = vld [vmem:[%s8381_s1 + $0x28] sm:$0xff] (!%p163_p2)   ;;  %vm911_vm2 = vsmask.f32 (!%p163_p2), 7424  ;;  %vm5038_vm5 = vcmask (!%p163_p2), 1044480  }
   0x8   : > { %6787 = vmatpush3.bf16.msra.mxu0 (!%p163_p2), %v7361_v1  ;;  %6580 = vmatprep.subr.bf16.mxu1 (!%p163_p2), %v7362_v2  ;;  %v7367_v7 = vld [vmem:[%s8381_s1 + $0x118] sm:$0xff] (!%p163_p2)   ;;  %v7369_v9 = vld [vmem:[%s8381_s1 + $0x120] sm:$0xff] (!%p163_p2)   ;;  %v7371_v11 = vld [vmem:[%s8381_s1 + $0x128] sm:$0xff] (!%p163_p2)   ;;  %vm4369_vm4 = vsmask.f32 (!%p163_p2), 5376 }
   0x9   : > { %6788 = vmatprep.subr.bf16.mxu0 (!%p163_p2), %v7363_v3  ;;  %v7372_v15 = vld [vmem:[%s8381_s1 + $0x30] sm:$0xff] (!%p163_p2)   ;;  %v7374_v26 = vld [vmem:[%s8381_s1 + $0x38] sm:$0xff] (!%p163_p2)   ;;  %v7380_v33 = vld [vmem:[%s8381_s1 + $0x40] sm:$0xff] (!%p163_p2)  }
   0xa   : > { %v7373_v16 = vld [vmem:[%s8381_s1 + $0x130] sm:$0xff] (!%p163_p2)   ;;  %v7375_v29 = vld [vmem:[%s8381_s1 + $0x138] sm:$0xff] (!%p163_p2)   ;;  %v7382_v39 = vld [vmem:[%s8381_s1 + $0x140] sm:$0xff] (!%p163_p2)  }
   0xb   : > { %6581 = vmatpush3.bf16.msra.mxu1 (!%p163_p2), %v7362_v2  ;;  %v7383_v43 = vld [vmem:[%s8381_s1 + $0x148] sm:$0xff] (!%p163_p2)   ;;  %v7388_v58 = vld [vmem:[%s8381_s1 + $0x150] sm:$0xff] (!%p163_p2)  }
   0xc   : > { %6789 = vmatpush3.bf16.msra.mxu0 (!%p163_p2), %v7363_v3  ;;  %6582 = vmatprep.subr.bf16.mxu1 (!%p163_p2), %v7364_v4  ;;  %v7389_v52 = vld [vmem:[%s8381_s1 + $0x48] sm:$0xff] (!%p163_p2)   ;;  %v7396_v1 = vld [vmem:[%s8381_s1 + $0x50] sm:$0xff] (!%p163_p2)  }
   0xd   : > { %s8386_s16 = smov (!%p188_p3, %s5784_s16), 1  ;;  %6790 = vmatprep.subr.bf16.mxu0 %v7365_v5 }
   0xe   : > { %s7350_s7 = smul.u32 164, %s8386_s16 }
   0xf   : > { %6583 = vmatpush3.bf16.msra.mxu1 %v7364_v4  ;;  %s7351_s22 = smul.u32 144, %s8386_s16 }
  0x10   : > { %6791 = vmatpush3.bf16.msra.mxu0 %v7365_v5  ;;  %6584 = vmatprep.subr.bf16.mxu1 %v7366_v6  ;;  %s7693_s20 = scalar_lea.vmem %s8380_s0, %s7350_s7  ;;  %v7390_v5 = vld [vmem:[%s8381_s1 + $0x158] sm:$0xff]  }
  0x11   : > { %6792 = vmatprep.subr.bf16.mxu0 %v7367_v7  ;;  %v7376_v12 = vld [vmem:[%s7693_s20] sm:$0xff]   ;;  %v7377_v13 = vld [vmem:[%s7693_s20 + $0x8] sm:$0xfe]   ;;  %v7378_v14 = vld [vmem:[%s7693_s20 + $0x10] sm:$0xff]   ;;  %s8288_s25 = scalar_lea.vmem %s8384_s4, %s7351_s22 }
  0x12   : > { %6594 = vmatprep.mubr.bf16.mxu1 %v7376_v12  ;;  %v2631_v17 = vshrl.u32 %v7377_v13, 16  ;;  %v2634_v18 = vshll.u32 %v7377_v13, 16  ;;  %v2639_v19 = vshrl.u32 %v7378_v14, 16  ;;  %v2642_v20 = vshll.u32 %v7378_v14, 16  ;;  %v7381_v25 = vld [vmem:[%s7693_s20 + $0x18] sm:$0xff]   ;;  %v7385_v36 = vld [vmem:[%s7693_s20 + $0x20] sm:$0xff]  }
  0x13   : > { %6585 = vmatpush3.bf16.msra.mxu1 %v7366_v6  ;;  %v2648_v30 = vshrl.u32 %v7381_v25, 16  ;;  %v2651_v31 = vshll.u32 %v7381_v25, 16  ;;  %v7379_v37 = vld [vmem:[%s7693_s20 + $0x8] sm:$0xff]   ;;  %v2657_v40 = vshrl.u32 %v7385_v36, 16  ;;  %v2660_v41 = vshll.u32 %v7385_v36, 16  ;;  %v7384_v48 = vld [vmem:[%s7693_s20 + $0x10] sm:$0xff]  }
  0x14   : > { %6793 = vmatpush3.bf16.msra.mxu0 %v7367_v7  ;;  %6586 = vmatprep.subr.bf16.mxu1 %v7368_v8  ;;  %v2633_v21 = vrot.slane %v2631_v17, 1  ;;  %v2636_v22 = vrot.slane %v2634_v18, 2  ;;  %v2641_v23 = vrot.slane %v2639_v19, 1  ;;  %v2644_v24 = vrot.slane %v2642_v20, 2  ;;  %v7387_v42 = vld [vmem:[%s7693_s20 + $0x28] sm:$0xff]   ;;  %v7392_v54 = vld [vmem:[%s7693_s20 + $0x30] sm:$0xff]  }
  0x15   : > { %6794 = vmatprep.subr.bf16.mxu0 %v7369_v9  ;;  %v2650_v34 = vrot.slane %v2648_v30, 1  ;;  %v2653_v35 = vrot.slane %v2651_v31, 2  ;;  %v2659_v44 = vrot.slane %v2657_v40, 1  ;;  %v2662_v45 = vrot.slane %v2660_v41, 2  ;;  %v7386_v56 = vld [vmem:[%s7693_s20 + $0x18] sm:$0xff]   ;;  %v7391_v2 = vld [vmem:[%s7693_s20 + $0x20] sm:$0xff]  }
  0x16   : > { %v2637_v27 = vor.u32 %v2636_v22, %v2633_v21  ;;  %v2645_v28 = vor.u32 %v2644_v24, %v2641_v23  ;;  %v2666_v46 = vshrl.u32 %v7387_v42, 16  ;;  %v2669_v49 = vshll.u32 %v7387_v42, 16  ;;  %v7394_v61 = vld [vmem:[%s7693_s20 + $0x38] sm:$0xff]   ;;  %v7393_v13 = vld [vmem:[%s7693_s20 + $0x28] sm:$0xff]   ;;  %v7398_v22 = vld [vmem:[%s7693_s20 + $0x30] sm:$0xff]  }
  0x17   : > { %6587 = vmatpush3.bf16.msra.mxu1 %v7368_v8  ;;  %v2654_v38 = vor.u32 %v2653_v35, %v2650_v34  ;;  %v2663_v50 = vor.u32 %v2662_v45, %v2659_v44  ;;  %v2675_v59 = vshrl.u32 %v7392_v54, 16  ;;  %v2678_v60 = vshll.u32 %v7392_v54, 16  ;;  %v7403_v19 = vld [vmem:[%s8381_s1 + $0x58] sm:$0xff]   ;;  %v7397_v25 = vld [vmem:[%s8381_s1 + $0x168] sm:$0xff]   ;;  %v7410_v35 = vld [vmem:[%s8381_s1 + $0x60] sm:$0xff]  }
  0x18   : > { %6795 = vmatpush3.bf16.msra.mxu0 %v7369_v9  ;;  %6588 = vmatprep.subr.bf16.mxu1 %v7370_v10  ;;  %v2646_v32 = vsel %vm2629_vm0, %v2637_v27, %v2645_v28  ;;  %v2668_v51 = vrot.slane %v2666_v46, 1  ;;  %v2671_v53 = vrot.slane %v2669_v49, 2  ;;  %v2684_v0 = vshrl.u32 %v7394_v61, 16  ;;  %v7399_v9 = vld [vmem:[%s7693_s20 + $0x40] sm:$0xff]   ;;  %v7406_v30 = vld [vmem:[%s7693_s20 + $0x8] sm:$0xfc]  }
  0x19   : > { %6796 = vmatprep.subr.bf16.mxu0 %v7371_v11  ;;  %6802 = vmatprep.mubr.bf16.mxu0 %v2646_v32  ;;  %v2655_v47 = vsel %vm2629_vm0, %v2645_v28, %v2654_v38  ;;  %v2664_v55 = vsel %vm2629_vm0, %v2654_v38, %v2663_v50  ;;  %v2677_v62 = vrot.slane %v2675_v59, 1  ;;  %v2680_v63 = vrot.slane %v2678_v60, 2  ;;  %v7407_v28 = vld [vmem:[%s7693_s20 + $0x10] sm:$0xff]   ;;  %v7400_v36 = vld [vmem:[%s7693_s20 + $0x38] sm:$0xff]   ;;  %v7405_v38 = vld [vmem:[%s7693_s20 + $0x40] sm:$0xff]  }
  0x1a   : > { %v2672_v57 = vor.u32 %v2671_v53, %v2668_v51  ;;  %v2687_v3 = vshll.u32 %v7394_v61, 16  ;;  %v2686_v7 = vrot.slane %v2684_v0, 1  ;;  %v2696_v12 = vshll.u32 %v7399_v9, 16  ;;  %v7402_v32 = vld [vmem:[%s8381_s1 + $0x170] sm:$0xff]   ;;  %v7409_v40 = vld [vmem:[%s7693_s20 + $0x18] sm:$0xff]   ;;  %v7412_v42 = vld [vmem:[%s7693_s20 + $0x20] sm:$0xff]  }
  0x1b   : > { %6589 = vmatpush3.bf16.msra.mxu1 %v7370_v10  ;;  %v2681_v6 = vor.u32 %v2680_v63, %v2677_v62  ;;  %v3299_v34 = vrot.slane %v7406_v30, 2  ;;  %v7408_v44 = vld [vmem:[%s7693_s20 + $0x48] sm:$0xff]   ;;  %v3302_v45 = vrot.slane %v7409_v40, 2  ;;  %v7411_v46 = vld [vmem:[%s7693_s20 + $0x50] sm:$0xff]   ;;  %v7420_v60 = vld [vmem:[%s7693_s20 + $0x38] sm:$0xff]  }
  0x1c   : > { %6797 = vmatpush3.bf16.msra.mxu0 %v7371_v11  ;;  %6590 = vmatprep.subr.bf16.mxu1 %v7372_v15  ;;  %v2673_v4 = vsel %vm2629_vm0, %v2663_v50, %v2672_v57  ;;  %v2689_v8 = vrot.slane %v2687_v3, 2  ;;  %v2693_v11 = vshrl.u32 %v7399_v9, 16  ;;  %v2698_v18 = vrot.slane %v2696_v12, 2  ;;  %v7414_v49 = vld [vmem:[%s7693_s20 + $0x28] sm:$0xff]   ;;  %v7418_v50 = vld [vmem:[%s7693_s20 + $0x30] sm:$0xff]   ;;  %v7429_v62 = vld [vmem:[%s8381_s1 + $0x78] sm:$0xff]  }
  0x1d   : > { %6798 = vmatprep.subr.bf16.mxu0 %v7373_v16  ;;  %v2682_v10 = vsel %vm2629_vm0, %v2672_v57, %v2681_v6  ;;  %v7422_v54 = vld [vmem:[%s8381_s1 + $0x70] sm:$0xff]   ;;  %v7417_v57 = vld [vmem:[%s7693_s20 + $0x60] sm:$0xff]  }
  0x1e   : > { %v2690_v14 = vor.u32 %v2689_v8, %v2686_v7  ;;  %v2695_v17 = vrot.slane %v2693_v11, 1  ;;  %v7427_v59 = vld [vmem:[%s8381_s1 + $0x190] sm:$0xff]   ;;  %v7424_v0 = vld [vmem:[%s7693_s20 + $0x40] sm:$0xff]  }
  0x1f   : > { %6591 = vmatpush3.bf16.msra.mxu1 %v7372_v15  ;;  %v7401_v15 = vld [vmem:[%s7693_s20 + $0x48] sm:$0xff]   ;;  %v3312_v3 = vrot.slane %v7424_v0, 2  ;;  %v7430_v8 = vld [vmem:[%s7693_s20 + $0x50] sm:$0xff]   ;;  %v7434_v9 = vld [vmem:[%s7693_s20] sm:$0xff]  }
  0x20   : > { %6799 = vmatpush3.bf16.msra.mxu0 %v7373_v16  ;;  %6592 = vmatprep.subr.bf16.mxu1 %v7374_v26  ;;  %v7395_v16 = vld [vmem:[%s8381_s1 + $0x160] sm:$0xff]   ;;  %v2702_v20 = vshrl.u32 %v7401_v15, 16  ;;  %v2705_v21 = vshll.u32 %v7401_v15, 16  ;;  %v2699_v23 = vor.u32 %v2698_v18, %v2695_v17  ;;  %v2691_v24 = vsel %vm2629_vm0, %v2681_v6, %v2690_v14  ;;  %v7426_v6 = vld [vmem:[%s7693_s20 + $0x48] sm:$0xff]   ;;  %v7425_v17 = vld [vmem:[%s7693_s20 + $0x78] sm:$0xff]  }
  0x21   : > { %6800 = vmatprep.subr.bf16.mxu0 %v7375_v29  ;;  %v7823_v11 = vld [vmem:[%s8381_s1 + $0x80] sm:$0xff]   ;;  %v3314_v12 = vrot.slane %v7426_v6, 2  ;;  %v7445_v0 = vld [vmem:[%s8381_s1 + $0x88] sm:$0xff]  }
  0x22   : > { %v2707_v27 = vrot.slane %v2705_v21, 2  ;;  %v7440_v15 = vld [vmem:[%s8381_s1 + $0x1a0] sm:$0xff]  }
  0x23   : > { %6593 = vmatpush3.bf16.msra.mxu1 %v7374_v26  ;;  %v2704_v26 = vrot.slane %v2702_v20, 1  ;;  %v7428_v18 = vld [vmem:[%s7693_s20 + $0x80] sm:$0xff]   ;;  %v913_v20 = vshrl.u32 %v7434_v9, 16  ;;  %v3315_v21 = vsel %vm3298_vm1, %v3312_v3, %v3314_v12 }
  0x24   : > { %6801 = vmatpush3.bf16.msra.mxu0 %v7375_v29  ;;  %6630 = vmatprep.subr.bf16.mxu1 %v7380_v33  ;;  %v2700_v29 = vsel %vm2629_vm0, %v2690_v14, %v2699_v23  ;;  %v915_v14 = vshll.u32 %v7434_v9, 16  ;;  %v7453_v9 = vld [vmem:[%s7693_s20 + $0x38] sm:$0xff]  }
  0x25   : > { %6838 = vmatprep.subr.bf16.mxu0 %v7382_v39  ;;  %v7762_v31 = vor.u32 %v2707_v27, %v2704_v26  ;;  %v7446_v26 = vld [vmem:[%s8381_s1 + $0x1a8] sm:$0xff]   ;;  %v7437_v27 = vld [vmem:[%s7693_s20 + $0x10] sm:$0xff]  }
  0x26   : > { %6595 = vmatmul.mubr.bf16.vlgmr.msra.gmra.mrb[0].mxu1 %v7379_v37  ;;  %v7404_v37 = vld [vmem:[%s8381_s1 + $0x178] sm:$0xff]  }
  0x27   : > { %6803 = vmatmul.mubr.bf16.vlgmr.msra.gmra.mrb[0].mxu0 %v2655_v47  ;;  %6631 = vmatpush3.bf16.msra.mxu1 %v7380_v33  ;;  %v3300_v33 = vrot.slane %v7407_v28, 2  ;;  %v3304_v47 = vrot.slane %v7412_v42, 2  ;;  %v932_v42 = vshrl.u32 %v7437_v27, 16 }
  0x28   : > { %6839 = vmatpush3.bf16.msra.mxu0 %v7382_v39  ;;  %6598 = vmatprep.mubr.bf16.mxu1 %v7384_v48  ;;  %v2709_v39 = vsel %vm2629_vm0, %v2699_v23, %v7762_v31  ;;  %v7415_v48 = vld [vmem:[%s8381_s1 + $0x180] sm:$0xff]  }
  0x29   : > { %6840 = vmatprep.subr.bf16.mxu0 %v7383_v43  ;;  %6806 = vmatprep.mubr.bf16.mxu0 %v2664_v55  ;;  %v3301_v41 = vsel %vm3298_vm1, %v3299_v34, %v3300_v33  ;;  %v3303_v51 = vsel %vm3298_vm1, %v3300_v33, %v3302_v45  ;;  %v3305_v53 = vsel %vm3298_vm1, %v3302_v45, %v3304_v47  ;;  %v7413_v55 = vld [vmem:[%s7693_s20 + $0x58] sm:$0xff]   ;;  %v7431_v34 = vld [vmem:[%s7693_s20 + $0x88] sm:$0xff]   ;;  %v7452_v45 = vld [vmem:[%s8381_s1 + $0x1b0] sm:$0xff]  }
  0x2a   : > { %6632 = vmatprep.subr.bf16.mxu1 %v7389_v52  ;;  %v7441_v33 = vld [vmem:[%s7693_s20 + $0x18] sm:$0xff]  }
  0x2b   : > { %6633 = vmatpush3.bf16.msra.mxu1 %v7389_v52  ;;  %v7421_v52 = vld [vmem:[%s8381_s1 + $0x188] sm:$0xff]  }
  0x2c   : > { %6841 = vmatpush3.bf16.msra.mxu0 %v7383_v43  ;;  %6634 = vmatprep.subr.bf16.mxu1 %v7396_v1  ;;  %v7416_v43 = vld [vmem:[%s8381_s1 + $0x68] sm:$0xff]  }
  0x2d   : > { %6842 = vmatprep.subr.bf16.mxu0 %v7388_v58 }
  0x2e   : > { %6599 = vmatmul.mubr.bf16.gmra.mrb[4].mxu1 %v7386_v56  ;;  %v3306_v56 = vrot.slane %v7414_v49, 2  ;;  %v7447_v49 = vld [vmem:[%s7693_s20 + $0x28] sm:$0xff]  }
  0x2f   : > { %6807 = vmatmul.mubr.bf16.gmra.mrb[4].mxu0 %v2673_v4  ;;  %6602 = vmatprep.mubr.bf16.mxu1 %v7391_v2  ;;  %v7433_v2 = vld [vmem:[%s8381_s1 + $0x198] sm:$0xff]   ;;  %v7419_v4 = vld [vmem:[%s7693_s20 + $0x68] sm:$0xff]  }
  0x30   : > { %6843 = vmatpush3.bf16.msra.mxu0 %v7388_v58  ;;  %6810 = vmatprep.mubr.bf16.mxu0 %v2682_v10  ;;  %v3308_v58 = vrot.slane %v7418_v50, 2  ;;  %v3307_v61 = vsel %vm3298_vm1, %v3304_v47, %v3306_v56 }
  0x31   : > { %6844 = vmatprep.subr.bf16.mxu0 %v7390_v5  ;;  %6635 = vmatpush3.bf16.msra.mxu1 %v7396_v1  ;;  %v3310_v1 = vrot.slane %v7420_v60, 2  ;;  %v952_v60 = vshll.u32 %v7447_v49, 16 }
  0x32   : > { %6636 = vmatprep.subr.bf16.mxu1 %v7403_v19  ;;  %v3309_v63 = vsel %vm3298_vm1, %v3306_v56, %v3308_v58  ;;  %v7444_v56 = vld [vmem:[%s7693_s20 + $0x78] sm:$0xff]  }
  0x33   : > { %v3311_v7 = vsel %vm3298_vm1, %v3308_v58, %v3310_v1  ;;  %v3313_v10 = vsel %vm3298_vm1, %v3310_v1, %v3312_v3  ;;  %v7458_v58 = vld [vmem:[%s8381_s1 + $0x1b8] sm:$0xff]   ;;  %v954_v6 = vrot.slane %v952_v60, 1 }
  0x34   : > { %6845 = vmatpush3.bf16.msra.mxu0 %v7390_v5  ;;  %v7423_v5 = vld [vmem:[%s7693_s20 + $0x70] sm:$0xff]  }
  0x35   : > { %6846 = vmatprep.subr.bf16.mxu0 %v7395_v16  ;;  %6637 = vmatpush3.bf16.msra.mxu1 %v7403_v19  ;;  %v7432_v19 = vld [vmem:[%s7693_s20 + $0x58] sm:$0xff]  }
  0x36   : > { %6603 = vmatmul.mubr.bf16.gmra.mrb[8].mxu1 %v7393_v13  ;;  %6638 = vmatprep.subr.bf16.mxu1 %v7410_v35  ;;  %v7435_v13 = vld [vmem:[%s7693_s20 + $0x8] sm:$0xff]   ;;  %v3318_v28 = vrot.slane %v7432_v19, 2  ;;  %v7455_v19 = vld [vmem:[%s7693_s20 + $0x40] sm:$0xff]  }
  0x37   : > { %6811 = vmatmul.mubr.bf16.gmra.mrb[8].mxu0 %v2691_v24  ;;  %6606 = vmatprep.mubr.bf16.mxu1 %v7398_v22  ;;  %v917_v22 = vrot.slane %v915_v14, 1  ;;  %v920_v23 = vshll.u32 %v7435_v13, 16 }
  0x38   : > { %6847 = vmatpush3.bf16.msra.mxu0 %v7395_v16  ;;  %6814 = vmatprep.mubr.bf16.mxu0 %v2700_v29  ;;  %v3316_v16 = vrot.slane %v7430_v8, 2  ;;  %v7451_v8 = vld [vmem:[%s8381_s1 + $0x90] sm:$0xff]  }
  0x39   : > { %6848 = vmatprep.subr.bf16.mxu0 %v7397_v25  ;;  %6639 = vmatpush3.bf16.msra.mxu1 %v7410_v35  ;;  %v918_v29 = vor.u32 %v917_v22, %v913_v20  ;;  %v922_v30 = vrot.slane %v920_v23, 1  ;;  %v924_v35 = vshrl.u32 %v7435_v13, 16  ;;  %v7450_v13 = vld [vmem:[%s7693_s20 + $0x88] sm:$0xff]  }
  0x3a   : > { %6640 = vmatprep.subr.bf16.mxu1 %v7416_v43  ;;  %v3317_v24 = vsel %vm3298_vm1, %v3314_v12, %v3316_v16  ;;  %v7881_v23 = vld [vmem:[%s7693_s20 + $0x48] sm:$0xff]  }
  0x3b   : > { %v923_v40 = vsel %vm911_vm2, %v918_v29, %v922_v30 }
  0x3c   : > { %6849 = vmatpush3.bf16.msra.mxu0 %v7397_v25  ;;  %v7436_v25 = vld [vmem:[%s7693_s20 + $0x60] sm:$0xff]  }
  0x3d   : > { %6850 = vmatprep.subr.bf16.mxu0 %v7402_v32  ;;  %6641 = vmatpush3.bf16.msra.mxu1 %v7416_v43  ;;  %v936_v43 = vshll.u32 %v7441_v33, 16 }
  0x3e   : > { %6607 = vmatmul.mubr.bf16.gmra.mrb[12].mxu1 %v7400_v36  ;;  %6642 = vmatprep.subr.bf16.mxu1 %v7422_v54  ;;  %v928_v36 = vshll.u32 %v7437_v27, 16 }
  0x3f   : > { %6815 = vmatmul.mubr.bf16.gmra.mrb[12].mxu0 %v2709_v39  ;;  %6610 = vmatprep.mubr.bf16.mxu1 %v7405_v38  ;;  %v7442_v38 = vld [vmem:[%s7693_s20 + $0x70] sm:$0xff]   ;;  %v3319_v39 = vsel %vm3298_vm1, %v3316_v16, %v3318_v28 }
  0x40   : > { %6851 = vmatpush3.bf16.msra.mxu0 %v7402_v32  ;;  %6854 = vmatprep.mubr.bf16.mxu0 %v3301_v41  ;;  %v3320_v32 = vrot.slane %v7436_v25, 2  ;;  %v930_v47 = vrot.slane %v928_v36, 1 }
  0x41   : > { %6852 = vmatprep.subr.bf16.mxu0 %v7404_v37  ;;  %6643 = vmatpush3.bf16.msra.mxu1 %v7422_v54 }
  0x42   : > { %6644 = vmatprep.subr.bf16.mxu1 %v7429_v62  ;;  %v3321_v41 = vsel %vm3298_vm1, %v3318_v28, %v3320_v32  ;;  %v934_v50 = vor.u32 %v932_v42, %v930_v47 }
  0x44   : > { %6853 = vmatpush3.bf16.msra.mxu0 %v7404_v37  ;;  %v7439_v37 = vld [vmem:[%s7693_s20 + $0x68] sm:$0xff]  }
  0x45   : > { %6890 = vmatprep.subr.bf16.mxu0 %v7415_v48  ;;  %6645 = vmatpush3.bf16.msra.mxu1 %v7429_v62 }
  0x46   : > { %6611 = vmatmul.mubr.bf16.gmra.mrb[16].mxu1 %v7408_v44  ;;  %6682 = vmatprep.subr.bf16.mxu1 %v7823_v11  ;;  %v7443_v44 = vld [vmem:[%s7693_s20 + $0x20] sm:$0xff]  }
  0x47   : > { %6855 = vmatmul.mubr.bf16.vlgmr.msra.gmra.mrb[0].mxu0 %v3303_v51  ;;  %6614 = vmatprep.mubr.bf16.mxu1 %v7411_v46  ;;  %v926_v46 = vor.u32 %v924_v35, %v922_v30  ;;  %v938_v51 = vrot.slane %v936_v43, 1  ;;  %v972_v30 = vshrl.u32 %v7453_v9, 16  ;;  %v980_v35 = vshrl.u32 %v7455_v19, 16  ;;  %v7470_v43 = vld [vmem:[%s8381_s1 + $0xa8] sm:$0xff]  }
  0x48   : > { %6858 = vmatprep.mubr.bf16.mxu0 %v3305_v53  ;;  %6891 = vmatpush3.bf16.msra.mxu0 %v7415_v48  ;;  %v3322_v48 = vrot.slane %v7439_v37, 2  ;;  %v944_v53 = vshll.u32 %v7443_v44, 16  ;;  %v984_v37 = vshll.u32 %v7881_v23, 16 }
  0x49   : > { %6892 = vmatprep.subr.bf16.mxu0 %v7421_v52  ;;  %v931_v54 = vsel %vm911_vm2, %v926_v46, %v930_v47  ;;  %v939_v62 = vsel %vm911_vm2, %v934_v50, %v938_v51 }
  0x4a   : > { %v946_v1 = vrot.slane %v944_v53, 1  ;;  %v7476_v53 = vld [vmem:[%s8381_s1 + $0xb0] sm:$0xff]  }
  0x4c   : > { %6893 = vmatpush3.bf16.msra.mxu0 %v7421_v52  ;;  %v3324_v52 = vrot.slane %v7442_v38, 2  ;;  %v7461_v38 = vld [vmem:[%s7693_s20 + $0x18] sm:$0xff]  }
  0x4d   : > { %6894 = vmatprep.subr.bf16.mxu0 %v7427_v59  ;;  %v3835_v50 = vrot.slane %v7461_v38, 2 }
  0x4e   : > { %6615 = vmatmul.mubr.bf16.gmra.mrb[20].mxu1 %v7413_v55  ;;  %v940_v55 = vshrl.u32 %v7441_v33, 16  ;;  %v7464_v33 = vld [vmem:[%s8381_s1 + $0xa0] sm:$0xff]  }
  0x4f   : > { %6859 = vmatmul.mubr.bf16.gmra.mrb[4].mxu0 %v3307_v61  ;;  %6618 = vmatprep.mubr.bf16.mxu1 %v7417_v57  ;;  %v948_v57 = vshrl.u32 %v7443_v44, 16  ;;  %v7448_v61 = vld [vmem:[%s7693_s20 + $0x80] sm:$0xff]  }
  0x50   : > { %6862 = vmatprep.mubr.bf16.mxu0 %v3309_v63  ;;  %6895 = vmatpush3.bf16.msra.mxu0 %v7427_v59  ;;  %v3323_v59 = vsel %vm3298_vm1, %v3320_v32, %v3322_v48  ;;  %v3325_v63 = vsel %vm3298_vm1, %v3322_v48, %v3324_v52  ;;  %v942_v3 = vor.u32 %v940_v55, %v938_v51  ;;  %v7456_v32 = vld [vmem:[%s7693_s20 + $0x98] ss:$0 sps:$4 sm:$0x33]   ;;  %v986_v48 = vrot.slane %v984_v37, 1 }
  0x51   : > { %6896 = vmatprep.subr.bf16.mxu0 %v7433_v2  ;;  %v3334_v47 = vrot.slane %v7456_v32, 2  ;;  %v7465_v51 = vld [vmem:[%s7693_s20 + $0x58] sm:$0xff]  }
  0x54   : > { %6897 = vmatpush3.bf16.msra.mxu0 %v7433_v2  ;;  %v7449_v2 = vld [vmem:[%s7693_s20 + $0x30] sm:$0xff]  }
  0x55   : > { %6898 = vmatprep.subr.bf16.mxu0 %v7440_v15  ;;  %v960_v12 = vshll.u32 %v7449_v2, 16  ;;  %v964_v14 = vshrl.u32 %v7449_v2, 16 }
  0x56   : > { %6619 = vmatmul.mubr.bf16.gmra.mrb[24].mxu1 %v7419_v4  ;;  %v3326_v4 = vrot.slane %v7444_v56, 2  ;;  %v988_v56 = vshrl.u32 %v7881_v23, 16  ;;  %v7933_v23 = vld [vmem:[%s8381_s1 + $0xc0] sm:$0xff]  }
  0x57   : > { %6863 = vmatmul.mubr.bf16.gmra.mrb[8].mxu0 %v3311_v7  ;;  %6622 = vmatprep.mubr.bf16.mxu1 %v7423_v5  ;;  %v950_v5 = vor.u32 %v948_v57, %v946_v1  ;;  %v3328_v7 = vrot.slane %v7448_v61, 2  ;;  %v962_v22 = vrot.slane %v960_v12, 1  ;;  %v7463_v57 = vld [vmem:[%s7693_s20 + $0x20] sm:$0xff]   ;;  %v1000_v61 = vshll.u32 %v7465_v51, 16 }
  0x58   : > { %6866 = vmatprep.mubr.bf16.mxu0 %v3313_v10  ;;  %6899 = vmatpush3.bf16.msra.mxu0 %v7440_v15  ;;  %v956_v10 = vshrl.u32 %v7447_v49, 16  ;;  %v7454_v15 = vld [vmem:[%s7693_s20 + $0x90] sm:$0xff]   ;;  %v3327_v16 = vsel %vm3298_vm1, %v3324_v52, %v3326_v4 }
  0x59   : > { %6900 = vmatprep.subr.bf16.mxu0 %v7446_v26  ;;  %v3329_v20 = vsel %vm3298_vm1, %v3326_v4, %v3328_v7  ;;  %v966_v27 = vor.u32 %v964_v14, %v962_v22  ;;  %v3332_v29 = vrot.slane %v7454_v15, 2  ;;  %v7471_v4 = vld [vmem:[%s7693_s20 + $0x68] sm:$0xff]  }
  0x5a   : > { %v958_v25 = vor.u32 %v956_v10, %v954_v6  ;;  %v7468_v10 = vld [vmem:[%s7693_s20 + $0x30] sm:$0xff]   ;;  %v1020_v32 = vshrl.u32 %v7471_v4, 16 }
  0x5c   : > { %6901 = vmatpush3.bf16.msra.mxu0 %v7446_v26  ;;  %v3330_v26 = vrot.slane %v7450_v13, 2  ;;  %v963_v36 = vsel %vm911_vm2, %v958_v25, %v962_v22  ;;  %v1004_v13 = vshrl.u32 %v7465_v51, 16  ;;  %v3841_v22 = vrot.slane %v7468_v10, 2 }
  0x5d   : > { %6902 = vmatprep.subr.bf16.mxu0 %v7452_v45 }
  0x5e   : > { %6623 = vmatmul.mubr.bf16.gmra.mrb[28].mxu1 %v7425_v17  ;;  %v955_v17 = vsel %vm911_vm2, %v950_v5, %v954_v6  ;;  %v3333_v42 = vsel %vm3298_vm1, %v3330_v26, %v3332_v29  ;;  %v3837_v5 = vrot.slane %v7463_v57, 2 }
  0x5f   : > { %6867 = vmatmul.mubr.bf16.gmra.mrb[12].mxu0 %v3315_v21  ;;  %6626 = vmatprep.mubr.bf16.mxu1 %v7428_v18  ;;  %v968_v18 = vshll.u32 %v7453_v9, 16  ;;  %v7457_v21 = vld [vmem:[%s8381_s1 + $0x98] sm:$0xff]  }
  0x60   : > { %6870 = vmatprep.mubr.bf16.mxu0 %v3317_v24  ;;  %6903 = vmatpush3.bf16.msra.mxu0 %v7452_v45  ;;  %v7886_v24 = vld [vmem:[%s8381_s1 + $0x1c0] sm:$0xff]   ;;  %v7462_v45 = vld [vmem:[%s7693_s20 + $0x50] sm:$0xff]   ;;  %v3838_v14 = vsel %vm3298_vm1, %v3835_v50, %v3837_v5 }
  0x61   : > { %6904 = vmatprep.subr.bf16.mxu0 %v7458_v58  ;;  %v970_v28 = vrot.slane %v968_v18, 1  ;;  %v996_v60 = vshrl.u32 %v7462_v45, 16 }
  0x63   : > { %v974_v46 = vor.u32 %v972_v30, %v970_v28  ;;  %v7481_v30 = vld [vmem:[%s8381_s1 + $0x1d0] sm:$0xff]  }
  0x64   : > { %6905 = vmatpush3.bf16.msra.mxu0 %v7458_v58  ;;  %v3335_v58 = vsel %vm3298_vm1, %v3332_v29, %v3334_v47 }
  0x65   : > { %6942 = vmatprep.subr.bf16.mxu0 %v7886_v24 }
  0x66   : > { %6627 = vmatmul.mubr.bf16.gmra.mrb[32].mxu1 %v7431_v34  ;;  %v976_v34 = vshll.u32 %v7455_v19, 16 }
  0x67   : > { %6871 = vmatmul.mubr.bf16.gmra.mrb[16].mxu0 %v3319_v39  ;;  %6646 = vmatprep.mubr.bf16.mxu1 %v923_v40  ;;  %v3331_v39 = vsel %vm3298_vm1, %v3328_v7, %v3330_v26  ;;  %v971_v40 = vsel %vm911_vm2, %v966_v27, %v970_v28  ;;  %v1002_v7 = vrot.slane %v1000_v61, 1  ;;  %v7477_v27 = vld [vmem:[%s7693_s20 + $0x78] sm:$0xff]   ;;  %v7485_v61 = vld [vmem:[%s7693_s20 + $0x90] ss:$0 sps:$4 sm:$0x11]  }
  0x68   : > { %6874 = vmatprep.mubr.bf16.mxu0 %v3321_v41  ;;  %v7460_v41 = vld [vmem:[%s7693_s20 + $0x10] sm:$0xfc]   ;;  %v978_v44 = vrot.slane %v976_v34, 1  ;;  %v1032_v38 = vshll.u32 %v7477_v27, 16  ;;  %v1036_v51 = vshrl.u32 %v7477_v27, 16  ;;  %v1056_v10 = vshll.u32 %v7485_v61, 16 }
  0x69   : > { %v3834_v52 = vrot.slane %v7460_v41, 2  ;;  %v1006_v25 = vor.u32 %v1004_v13, %v1002_v7  ;;  %v7487_v41 = vld [vmem:[%s8381_s1 + $0x1d8] sm:$0xff]   ;;  %v7493_v27 = vld [vmem:[%s7693_s20 + $0x70] sm:$0xff]  }
  0x6a   : > { %v982_v49 = vor.u32 %v980_v35, %v978_v44  ;;  %v979_v55 = vsel %vm911_vm2, %v974_v46, %v978_v44  ;;  %v7474_v35 = vld [vmem:[%s7693_s20 + $0x40] sm:$0xff]   ;;  %v1034_v47 = vrot.slane %v1032_v38, 1  ;;  %v7511_v61 = vld [vmem:[%s8381_s1 + $0xd8] sm:$0xff]  }
  0x6b   : > { %v7497_v38 = vld [vmem:[%s7693_s20 + $0x20] sm:$0xff]  }
  0x6e   : > { %6647 = vmatmul.mubr.bf16.vlgmr.msra.gmra.mrb[0].mxu1 %v931_v54  ;;  %v992_v54 = vshll.u32 %v7462_v45, 16  ;;  %v3845_v45 = vrot.slane %v7474_v35, 2  ;;  %v3857_v35 = vrot.slane %v7493_v27, 2 }
  0x6f   : > { %6875 = vmatmul.mubr.bf16.gmra.mrb[20].mxu0 %v3323_v59  ;;  %6683 = vmatpush3.bf16.msra.mxu1 %v7823_v11  ;;  %v947_v11 = vsel %vm911_vm2, %v942_v3, %v946_v1  ;;  %v987_v59 = vsel %vm911_vm2, %v982_v49, %v986_v48  ;;  %v7483_v1 = vld [vmem:[%s8381_s1 + $0xb8] sm:$0xff]   ;;  %v990_v3 = vor.u32 %v988_v56, %v986_v48  ;;  %v7482_v48 = vld [vmem:[%s7693_s20 + $0x88] sm:$0xff]  }
  0x70   : > { %6650 = vmatprep.mubr.bf16.mxu1 %v939_v62  ;;  %6878 = vmatprep.mubr.bf16.mxu0 %v3325_v63  ;;  %v7466_v62 = vld [vmem:[%s7693_s20 + $0x28] sm:$0xff]   ;;  %v7467_v63 = vld [vmem:[%s7693_s20 + $0x60] sm:$0xff]   ;;  %v994_v2 = vrot.slane %v992_v54, 1  ;;  %v7480_v54 = vld [vmem:[%s7693_s20 + $0x50] sm:$0xff]  }
  0x71   : > { %6684 = vmatprep.subr.bf16.mxu1 %v7445_v0  ;;  %v1008_v9 = vshll.u32 %v7467_v63, 16 }
  0x72   : > { %v998_v6 = vor.u32 %v996_v60, %v994_v2  ;;  %v995_v12 = vsel %vm911_vm2, %v990_v3, %v994_v2 }
  0x73   : > { %6685 = vmatpush3.bf16.msra.mxu1 %v7445_v0  ;;  %v3836_v0 = vsel %vm3298_vm1, %v3834_v52, %v3835_v50  ;;  %v1010_v19 = vrot.slane %v1008_v9, 1  ;;  %v7494_v50 = vld [vmem:[%s8381_s1 + $0x1e0] sm:$0xff]  }
  0x74   : > { %6686 = vmatprep.subr.bf16.mxu1 %v7451_v8  ;;  %v1003_v15 = vsel %vm911_vm2, %v998_v6, %v1002_v7  ;;  %v1052_v6 = vshrl.u32 %v7482_v48, 16  ;;  %v7486_v7 = vld [vmem:[%s7693_s20 + $0x60] sm:$0xff]  }
  0x75   : > { %v1011_v34 = vsel %vm911_vm2, %v1006_v25, %v1010_v19 }
  0x76   : > { %6651 = vmatmul.mubr.bf16.gmra.mrb[4].mxu1 %v947_v11  ;;  %v1016_v11 = vshll.u32 %v7471_v4, 16 }
  0x77   : > { %6879 = vmatmul.mubr.bf16.gmra.mrb[24].mxu0 %v3327_v16  ;;  %6654 = vmatprep.mubr.bf16.mxu1 %v955_v17  ;;  %v1012_v16 = vshrl.u32 %v7467_v63, 16  ;;  %v7472_v17 = vld [vmem:[%s7693_s20 + $0x38] sm:$0xff]  }
  0x78   : > { %6882 = vmatprep.mubr.bf16.mxu0 %v3329_v20  ;;  %6687 = vmatpush3.bf16.msra.mxu1 %v7451_v8  ;;  %v3839_v8 = vrot.slane %v7466_v62, 2  ;;  %v7473_v20 = vld [vmem:[%s7693_s20 + $0x70] sm:$0xff]   ;;  %v1018_v26 = vrot.slane %v1016_v11, 1  ;;  %v3843_v29 = vrot.slane %v7472_v17, 2  ;;  %v7500_v62 = vld [vmem:[%s8381_s1 + $0x1e8] sm:$0xff]  }
  0x79   : > { %6688 = vmatprep.subr.bf16.mxu1 %v7457_v21  ;;  %v1014_v28 = vor.u32 %v1012_v16, %v1010_v19  ;;  %v7512_v16 = vld [vmem:[%s8381_s1 + $0x1f8] sm:$0xff]   ;;  %v3853_v19 = vrot.slane %v7486_v7, 2  ;;  %v7509_v7 = vld [vmem:[%s7693_s20 + $0x40] sm:$0xff]  }
  0x7a   : > { %v3840_v18 = vsel %vm3298_vm1, %v3837_v5, %v3839_v8  ;;  %v3842_v37 = vsel %vm3298_vm1, %v3839_v8, %v3841_v22  ;;  %v1022_v44 = vor.u32 %v1020_v32, %v1018_v26  ;;  %v3846_v56 = vsel %vm3298_vm1, %v3843_v29, %v3845_v45  ;;  %v7506_v5 = vld [vmem:[%s8381_s1 + $0x1f0] sm:$0xff]   ;;  %v7489_v8 = vld [vmem:[%s7693_s20 + $0x8] sm:$0xff]  }
  0x7c   : > { %6689 = vmatpush3.bf16.msra.mxu1 %v7457_v21  ;;  %v7475_v21 = vld [vmem:[%s8381_s1 + $0x1c8] sm:$0xff]  }
  0x7d   : > { %6690 = vmatprep.subr.bf16.mxu1 %v7464_v33 }
  0x7e   : > { %6655 = vmatmul.mubr.bf16.gmra.mrb[8].mxu1 %v963_v36  ;;  %v1028_v36 = vshrl.u32 %v7473_v20, 16 }
  0x7f   : > { %6883 = vmatmul.mubr.bf16.gmra.mrb[28].mxu0 %v3331_v39  ;;  %6658 = vmatprep.mubr.bf16.mxu1 %v971_v40  ;;  %v7478_v39 = vld [vmem:[%s7693_s20 + $0x48] sm:$0xff]   ;;  %v3844_v40 = vsel %vm3298_vm1, %v3841_v22, %v3843_v29 }
  0x80   : > { %6886 = vmatprep.mubr.bf16.mxu0 %v3333_v42  ;;  %6691 = vmatpush3.bf16.msra.mxu1 %v7464_v33  ;;  %v1024_v33 = vshll.u32 %v7473_v20, 16  ;;  %v3847_v49 = vrot.slane %v7478_v39, 2 }
  0x81   : > { %6692 = vmatprep.subr.bf16.mxu1 %v7470_v43 }
  0x82   : > { %v1026_v42 = vrot.slane %v1024_v33, 1  ;;  %v3848_v60 = vsel %vm3298_vm1, %v3845_v45, %v3847_v49  ;;  %v7496_v33 = vld [vmem:[%s7693_s20 + $0x78] sm:$0xff]  }
  0x84   : > { %6693 = vmatpush3.bf16.msra.mxu1 %v7470_v43  ;;  %v7479_v43 = vld [vmem:[%s7693_s20 + $0x80] sm:$0xff]   ;;  %v1030_v46 = vor.u32 %v1028_v36, %v1026_v42 }
  0x85   : > { %6694 = vmatprep.subr.bf16.mxu1 %v7476_v53  ;;  %v1040_v52 = vshll.u32 %v7479_v43, 16 }
  0x86   : > { %6659 = vmatmul.mubr.bf16.gmra.mrb[12].mxu1 %v979_v55  ;;  %v1044_v55 = vshrl.u32 %v7479_v43, 16  ;;  %v1035_v57 = vsel %vm911_vm2, %v1030_v46, %v1034_v47  ;;  %v7501_v43 = vld [vmem:[%s7693_s20 + $0x28] sm:$0xff]  }
  0x87   : > { %6887 = vmatmul.mubr.bf16.gmra.mrb[32].mxu0 %v3335_v58  ;;  %6662 = vmatprep.mubr.bf16.mxu1 %v987_v59  ;;  %v1048_v58 = vshll.u32 %v7482_v48, 16  ;;  %v7484_v59 = vld [vmem:[%s7693_s20 + $0x58] sm:$0xff]   ;;  %v1042_v63 = vrot.slane %v1040_v52, 1  ;;  %v7502_v46 = vld [vmem:[%s7693_s20 + $0x88] sm:$0xff]  }
  0x88   : > { %6906 = vmatprep.mubr.bf16.mxu0 %v3836_v0  ;;  %6695 = vmatpush3.bf16.msra.mxu1 %v7476_v53  ;;  %v1027_v53 = vsel %vm911_vm2, %v1022_v44, %v1026_v42  ;;  %v1038_v0 = vor.u32 %v1036_v51, %v1034_v47  ;;  %v3851_v4 = vrot.slane %v7484_v59, 2  ;;  %v7499_v42 = vld [vmem:[%s8381_s1 + $0xc8] sm:$0xff]   ;;  %v1566_v47 = vrot.slane %v7497_v38, 1  ;;  %v7505_v51 = vld [vmem:[%s8381_s1 + $0xd0] sm:$0xff]   ;;  %v7515_v59 = vld [vmem:[%s7693_s20 + $0x18] sm:$0xff]  }
  0x89   : > { %6696 = vmatprep.subr.bf16.mxu1 %v7483_v1  ;;  %v1046_v2 = vor.u32 %v1044_v55, %v1042_v63  ;;  %v1050_v3 = vrot.slane %v1048_v58, 1  ;;  %v3863_v52 = vrot.slane %v7502_v46, 2  ;;  %v8014_v55 = vld [vmem:[%s7693_s20 + $0x98] sm:$0xff]  }
  0x8a   : > { %v1043_v9 = vsel %vm911_vm2, %v1038_v0, %v1042_v63  ;;  %v7537_v46 = vld [vmem:[%s8381_s1 + $0xf8] sm:$0xff]  }
  0x8b   : > { %v1051_v11 = vsel %vm911_vm2, %v1046_v2, %v1050_v3  ;;  %v1054_v17 = vor.u32 %v1052_v6, %v1050_v3  ;;  %v7518_v6 = vld [vmem:[%s8381_s1 + $0xe0] sm:$0xff]  }
  0x8c   : > { %6697 = vmatpush3.bf16.msra.mxu1 %v7483_v1  ;;  %v3849_v1 = vrot.slane %v7480_v54, 2  ;;  %v8011_v54 = vld [vmem:[%s7693_s20 + $0x38] sm:$0xff]  }
  0x8d   : > { %6734 = vmatprep.subr.bf16.mxu1 %v7933_v23  ;;  %v1572_v0 = vrot.slane %v8011_v54, 1 }
  0x8e   : > { %6663 = vmatmul.mubr.bf16.gmra.mrb[16].mxu1 %v995_v12  ;;  %v7490_v12 = vld [vmem:[%s7693_s20 + $0x68] sm:$0xff]   ;;  %v3850_v13 = vsel %vm3298_vm1, %v3847_v49, %v3849_v1  ;;  %v1568_v49 = vrot.slane %v7501_v43, 1  ;;  %v7526_v43 = vld [vmem:[%s7693_s20 + $0x38] sm:$0xff]  }
  0x8f   : > { %6907 = vmatmul.mubr.bf16.vlgmr.msra.gmra.mrb[0].mxu0 %v3838_v14  ;;  %6666 = vmatprep.mubr.bf16.mxu1 %v1003_v15  ;;  %v7488_v14 = vld [vmem:[%s7693_s20] sm:$0xfe]   ;;  %v3852_v15 = vsel %vm3298_vm1, %v3849_v1, %v3851_v4  ;;  %v3855_v22 = vrot.slane %v7490_v12, 2  ;;  %v3867_v1 = vrot.slane %v8014_v55, 2  ;;  %v4418_v54 = vshll.u32 %v7526_v43, 16 }
  0x90   : > { %6910 = vmatprep.mubr.bf16.mxu0 %v3840_v18  ;;  %6943 = vmatpush3.bf16.msra.mxu0 %v7886_v24  ;;  %v1019_v24 = vsel %vm911_vm2, %v1014_v28, %v1018_v26  ;;  %v1058_v18 = vrot.slane %v1056_v10, 1  ;;  %v1559_v20 = vrot.slane %v7488_v14, 1  ;;  %v7491_v26 = vld [vmem:[%s7693_s20 + $0x10] sm:$0xff]   ;;  %v3854_v28 = vsel %vm3298_vm1, %v3851_v4, %v3853_v19  ;;  %v7513_v10 = vld [vmem:[%s7693_s20 + $0x48] sm:$0xff]   ;;  %v7517_v12 = vld [vmem:[%s7693_s20 + $0x20] sm:$0xff]  }
  0x91   : > { %6944 = vmatprep.subr.bf16.mxu0 %v7475_v21  ;;  %v3856_v32 = vsel %vm3298_vm1, %v3853_v19, %v3855_v22  ;;  %v1569_v58 = vsel %vm1558_vm3, %v1566_v47, %v1568_v49  ;;  %v4379_v4 = vshrl.u32 %v7515_v59, 16  ;;  %v4391_v27 = vshll.u32 %v7517_v12, 16  ;;  %v7521_v55 = vld [vmem:[%s7693_s20 + $0x60] sm:$0xff]  }
  0x92   : > { %v1059_v25 = vsel %vm911_vm2, %v1054_v17, %v1058_v18 }
  0x93   : > { %v4381_v18 = vrot.slane %v4379_v4, 2  ;;  %v1582_v4 = vrot.slane %v7521_v55, 1  ;;  %v7539_v55 = vld [vmem:[%s7693_s20 + $0x90] ss:$0 sps:$4 sm:$0x11]  }
  0x94   : > { %6945 = vmatpush3.bf16.msra.mxu0 %v7475_v21  ;;  %v1560_v21 = vrot.slane %v7489_v8, 1  ;;  %v7510_v8 = vld [vmem:[%s7693_s20 + $0xa0] ss:$0 sps:$4 sm:$0x33]  }
  0x95   : > { %6946 = vmatprep.subr.bf16.mxu0 %v7481_v30 }
  0x96   : > { %6667 = vmatmul.mubr.bf16.gmra.mrb[20].mxu1 %v1011_v34  ;;  %v1561_v29 = vsel %vm1558_vm3, %v1559_v20, %v1560_v21  ;;  %v1562_v34 = vrot.slane %v7491_v26, 1  ;;  %v7524_v20 = vld [vmem:[%s8381_s1 + $0xe8] sm:$0xff]   ;;  %v1576_v26 = vrot.slane %v7513_v10, 1 }
  0x97   : > { %6911 = vmatmul.mubr.bf16.gmra.mrb[4].mxu0 %v3842_v37  ;;  %6670 = vmatprep.mubr.bf16.mxu1 %v1019_v24  ;;  %v3859_v37 = vrot.slane %v7496_v33, 2  ;;  %v7990_v24 = vld [vmem:[%s8381_s1 + $0x200] sm:$0xff]   ;;  %v7530_v33 = vld [vmem:[%s8381_s1 + $0xf0] sm:$0xff]  }
  0x98   : > { %6914 = vmatprep.mubr.bf16.mxu0 %v3844_v40  ;;  %6947 = vmatpush3.bf16.msra.mxu0 %v7481_v30  ;;  %v7495_v30 = vld [vmem:[%s7693_s20 + $0x18] sm:$0xff]   ;;  %v1563_v39 = vsel %vm1558_vm3, %v1560_v21, %v1562_v34  ;;  %v7498_v40 = vld [vmem:[%s7693_s20 + $0x80] sm:$0xff]   ;;  %v1574_v21 = vrot.slane %v7509_v7, 1 }
  0x99   : > { %6948 = vmatprep.subr.bf16.mxu0 %v7487_v41  ;;  %v1564_v36 = vrot.slane %v7495_v30, 1  ;;  %v3860_v45 = vsel %vm3298_vm1, %v3857_v35, %v3859_v37  ;;  %v3861_v48 = vrot.slane %v7498_v40, 2  ;;  %v4393_v40 = vrot.slane %v4391_v27, 3 }
  0x9b   : > { %v1565_v44 = vsel %vm1558_vm3, %v1562_v34, %v1564_v36  ;;  %v7516_v34 = vld [vmem:[%s7693_s20 + $0x50] sm:$0xff]  }
  0x9c   : > { %6949 = vmatpush3.bf16.msra.mxu0 %v7487_v41  ;;  %v3858_v41 = vsel %vm3298_vm1, %v3855_v22, %v3857_v35  ;;  %v4388_v22 = vshrl.u32 %v7517_v12, 16  ;;  %v7522_v35 = vld [vmem:[%s7693_s20 + $0x30] sm:$0xff]  }
  0x9d   : > { %6950 = vmatprep.subr.bf16.mxu0 %v7494_v50 }
  0x9e   : > { %6671 = vmatmul.mubr.bf16.gmra.mrb[24].mxu1 %v1027_v53  ;;  %v7504_v53 = vld [vmem:[%s7693_s20 + $0x90] sm:$0xff]  }
  0x9f   : > { %6915 = vmatmul.mubr.bf16.gmra.mrb[8].mxu0 %v3846_v56  ;;  %6674 = vmatprep.mubr.bf16.mxu1 %v1035_v57  ;;  %v7514_v56 = vld [vmem:[%s7693_s20 + $0x10] sm:$0xfc]   ;;  %v3862_v57 = vsel %vm3298_vm1, %v3859_v37, %v3861_v48  ;;  %v3865_v63 = vrot.slane %v7504_v53, 2  ;;  %v4390_v37 = vrot.slane %v4388_v22, 2  ;;  %v4415_v53 = vshrl.u32 %v7526_v43, 16 }
  0xa0   : > { %6918 = vmatprep.mubr.bf16.mxu0 %v3848_v60  ;;  %6951 = vmatpush3.bf16.msra.mxu0 %v7494_v50  ;;  %v7503_v50 = vld [vmem:[%s7693_s20 + $0x30] sm:$0xff]   ;;  %v3864_v60 = vsel %vm3298_vm1, %v3861_v48, %v3863_v52  ;;  %v4371_v2 = vshrl.u32 %v7514_v56, 16  ;;  %v4374_v3 = vshll.u32 %v7514_v56, 16  ;;  %v4406_v48 = vshrl.u32 %v7522_v35, 16 }
  0xa1   : > { %6952 = vmatprep.subr.bf16.mxu0 %v7500_v62 }
  0xa2   : > { %v4373_v14 = vrot.slane %v4371_v2, 2  ;;  %v4376_v17 = vrot.slane %v4374_v3, 3  ;;  %v4408_v56 = vrot.slane %v4406_v48, 2  ;;  %v7529_v2 = vld [vmem:[%s8381_s1 + $0x208] sm:$0xff]   ;;  %v8072_v3 = vld [vmem:[%s8381_s1 + $0x100] sm:$0xff]  }
  0xa4   : > { %6953 = vmatpush3.bf16.msra.mxu0 %v7500_v62  ;;  %v1570_v62 = vrot.slane %v7503_v50, 1 }
  0xa5   : > { %6954 = vmatprep.subr.bf16.mxu0 %v7506_v5 }
  0xa6   : > { %6675 = vmatmul.mubr.bf16.gmra.mrb[28].mxu1 %v1043_v9  ;;  %v1571_v9 = vsel %vm1558_vm3, %v1568_v49, %v1570_v62  ;;  %v4394_v49 = vor.u32 %v4393_v40, %v4390_v37  ;;  %v7547_v37 = vld [vmem:[%s8381_s1 + $0x220] sm:$0xff]  }
  0xa7   : > { %6919 = vmatmul.mubr.bf16.gmra.mrb[12].mxu0 %v3850_v13  ;;  %6678 = vmatprep.mubr.bf16.mxu1 %v1051_v11  ;;  %v3866_v13 = vsel %vm3298_vm1, %v3863_v52, %v3865_v63  ;;  %v1573_v11 = vsel %vm1558_vm3, %v1570_v62, %v1572_v0  ;;  %v7532_v62 = vld [vmem:[%s7693_s20 + $0x48] sm:$0xff]  }
  0xa8   : > { %6922 = vmatprep.mubr.bf16.mxu0 %v3852_v15  ;;  %6955 = vmatpush3.bf16.msra.mxu0 %v7506_v5  ;;  %v4382_v5 = vshll.u32 %v7515_v59, 16  ;;  %v7520_v15 = vld [vmem:[%s7693_s20 + $0x28] sm:$0xff]   ;;  %v4433_v10 = vshrl.u32 %v7532_v62, 16 }
  0xa9   : > { %6956 = vmatprep.subr.bf16.mxu0 %v7512_v16 }
  0xaa   : > { %v4384_v19 = vrot.slane %v4382_v5, 3  ;;  %v4435_v22 = vrot.slane %v4433_v10, 2 }
  0xac   : > { %6957 = vmatpush3.bf16.msra.mxu0 %v7512_v16  ;;  %v3868_v16 = vsel %vm3298_vm1, %v3865_v63, %v3867_v1  ;;  %v4385_v30 = vor.u32 %v4384_v19, %v4381_v18 }
  0xad   : > { %6994 = vmatprep.subr.bf16.mxu0 %v7990_v24 }
  0xae   : > { %6679 = vmatmul.mubr.bf16.gmra.mrb[32].mxu1 %v1059_v25  ;;  %v3869_v25 = vrot.slane %v7510_v8, 2  ;;  %v4395_v59 = vsel %vm4369_vm4, %v4385_v30, %v4394_v49  ;;  %v7527_v8 = vld [vmem:[%s7693_s20 + $0x70] sm:$0xff]  }
  0xaf   : > { %6923 = vmatmul.mubr.bf16.gmra.mrb[16].mxu0 %v3854_v28  ;;  %6698 = vmatprep.mubr.bf16.mxu1 %v1561_v29  ;;  %v4397_v28 = vshrl.u32 %v7520_v15, 16  ;;  %v4377_v29 = vor.u32 %v4376_v17, %v4373_v14  ;;  %v7535_v14 = vld [vmem:[%s8381_s1 + $0x210] sm:$0xff]   ;;  %v1586_v27 = vrot.slane %v7527_v8, 1  ;;  %v7562_v8 = vld [vmem:[%s8381_s1 + $0x238] sm:$0xff]  }
  0xb0   : > { %6926 = vmatprep.mubr.bf16.mxu0 %v3856_v32  ;;  %v4400_v32 = vshll.u32 %v7520_v15, 16  ;;  %v3870_v38 = vsel %vm3298_vm1, %v3867_v1, %v3869_v25  ;;  %v4420_v1 = vrot.slane %v4418_v54, 3  ;;  %v7534_v15 = vld [vmem:[%s7693_s20 + $0x50] sm:$0xff]  }
  0xb6   : > { %6699 = vmatmul.mubr.bf16.vlgmr.msra.gmra.mrb[0].mxu1 %v1563_v39  ;;  %v1577_v39 = vsel %vm1558_vm3, %v1574_v21, %v1576_v26 }
  0xb7   : > { %6927 = vmatmul.mubr.bf16.gmra.mrb[20].mxu0 %v3858_v41  ;;  %6735 = vmatpush3.bf16.msra.mxu1 %v7933_v23  ;;  %v1567_v23 = vsel %vm1558_vm3, %v1564_v36, %v1566_v47  ;;  %v1575_v36 = vsel %vm1558_vm3, %v1572_v0, %v1574_v21  ;;  %v7519_v41 = vld [vmem:[%s7693_s20 + $0x58] sm:$0xff]   ;;  %v1578_v47 = vrot.slane %v7516_v34, 1  ;;  %v4417_v0 = vrot.slane %v4415_v53, 2 }
  0xb8   : > { %6702 = vmatprep.mubr.bf16.mxu1 %v1565_v44  ;;  %6930 = vmatprep.mubr.bf16.mxu0 %v3860_v45  ;;  %v4386_v44 = vsel %vm4369_vm4, %v4377_v29, %v4385_v30  ;;  %v4402_v45 = vrot.slane %v4400_v32, 3  ;;  %v1580_v50 = vrot.slane %v7519_v41, 1  ;;  %v4442_v29 = vshrl.u32 %v7534_v15, 16 }
  0xb9   : > { %6736 = vmatprep.subr.bf16.mxu1 %v7499_v42  ;;  %v4421_v12 = vor.u32 %v4420_v1, %v4417_v0  ;;  %v4445_v30 = vshll.u32 %v7534_v15, 16  ;;  %v7546_v0 = vld [vmem:[%s7693_s20 + $0x70] sm:$0xff]  }
  0xba   : > { %v1583_v17 = vsel %vm1558_vm3, %v1580_v50, %v1582_v4  ;;  %v4444_v41 = vrot.slane %v4442_v29, 2 }
  0xbb   : > { %6737 = vmatpush3.bf16.msra.mxu1 %v7499_v42  ;;  %v4399_v42 = vrot.slane %v4397_v28, 2 }
  0xbc   : > { %6738 = vmatprep.subr.bf16.mxu1 %v7505_v51 }
  0xbd   : > { %v4403_v52 = vor.u32 %v4402_v45, %v4399_v42  ;;  %v4447_v42 = vrot.slane %v4445_v30, 3 }
  0xbe   : > { %6703 = vmatmul.mubr.bf16.gmra.mrb[4].mxu1 %v1567_v23  ;;  %v1579_v23 = vsel %vm1558_vm3, %v1576_v26, %v1578_v47  ;;  %v7541_v26 = vld [vmem:[%s8381_s1 + $0x218] sm:$0xff]  }
  0xbf   : > { %6931 = vmatmul.mubr.bf16.gmra.mrb[24].mxu0 %v3862_v57  ;;  %6706 = vmatprep.mubr.bf16.mxu1 %v1569_v58  ;;  %v8059_v57 = vld [vmem:[%s7693_s20 + $0x68] sm:$0xff]   ;;  %v7528_v58 = vld [vmem:[%s7693_s20 + $0x40] sm:$0xff]   ;;  %v4404_v63 = vsel %vm4369_vm4, %v4394_v49, %v4403_v52  ;;  %v4448_v53 = vor.u32 %v4447_v42, %v4444_v41  ;;  %v7556_v41 = vld [vmem:[%s7693_s20 + $0x90] sm:$0xff]  }
  0xc0   : > { %6934 = vmatprep.mubr.bf16.mxu0 %v3864_v60  ;;  %6739 = vmatpush3.bf16.msra.mxu1 %v7505_v51  ;;  %v4409_v51 = vshll.u32 %v7522_v35, 16  ;;  %v1581_v60 = vsel %vm1558_vm3, %v1578_v47, %v1580_v50  ;;  %v1584_v5 = vrot.slane %v8059_v57, 1  ;;  %v7533_v35 = vld [vmem:[%s7693_s20 + $0x80] sm:$0xff]   ;;  %v7552_v49 = vld [vmem:[%s8381_s1 + $0x228] sm:$0xff]  }
  0xc1   : > { %6740 = vmatprep.subr.bf16.mxu1 %v7511_v61  ;;  %v7542_v57 = vld [vmem:[%s7693_s20 + $0x8] sm:$0xfe]  }
  0xc2   : > { %v1587_v40 = vsel %vm1558_vm3, %v1584_v5, %v1586_v27  ;;  %v2094_v10 = vrot.slane %v7542_v57, 1 }
  0xc4   : > { %6741 = vmatpush3.bf16.msra.mxu1 %v7511_v61  ;;  %v4411_v61 = vrot.slane %v4409_v51, 3  ;;  %v1590_v51 = vrot.slane %v7533_v35, 1 }
  0xc5   : > { %6742 = vmatprep.subr.bf16.mxu1 %v7518_v6 }
  0xc6   : > { %6707 = vmatmul.mubr.bf16.gmra.mrb[8].mxu1 %v1571_v9  ;;  %v4412_v7 = vor.u32 %v4411_v61, %v4408_v56  ;;  %v4427_v9 = vshll.u32 %v7528_v58, 16  ;;  %v7543_v61 = vld [vmem:[%s7693_s20 + $0x10] sm:$0xff]  }
  0xc7   : > { %6935 = vmatmul.mubr.bf16.gmra.mrb[28].mxu0 %v3866_v13  ;;  %6710 = vmatprep.mubr.bf16.mxu1 %v1573_v11  ;;  %v8079_v13 = vld [vmem:[%s7693_s20 + $0x78] sm:$0xff]   ;;  %v4436_v11 = vshll.u32 %v7532_v62, 16 }
  0xc8   : > { %6938 = vmatprep.mubr.bf16.mxu0 %v3868_v16  ;;  %6743 = vmatpush3.bf16.msra.mxu1 %v7518_v6  ;;  %v4424_v6 = vshrl.u32 %v7528_v58, 16  ;;  %v7538_v16 = vld [vmem:[%s7693_s20 + $0x58] sm:$0xff]   ;;  %v4413_v18 = vsel %vm4369_vm4, %v4403_v52, %v4412_v7  ;;  %v4422_v21 = vsel %vm4369_vm4, %v4412_v7, %v4421_v12  ;;  %v1588_v28 = vrot.slane %v8079_v13, 1 }
  0xc9   : > { %6744 = vmatprep.subr.bf16.mxu1 %v7524_v20  ;;  %v4438_v25 = vrot.slane %v4436_v11, 3  ;;  %v4451_v32 = vshrl.u32 %v7538_v16, 16  ;;  %v2095_v11 = vrot.slane %v7543_v61, 1 }
  0xca   : > { %v4426_v19 = vrot.slane %v4424_v6, 2  ;;  %v1591_v62 = vsel %vm1558_vm3, %v1588_v28, %v1590_v51 }
  0xcb   : > { %v4439_v34 = vor.u32 %v4438_v25, %v4435_v22  ;;  %v4453_v45 = vrot.slane %v4451_v32, 2  ;;  %v2096_v25 = vsel %vm1558_vm3, %v2094_v10, %v2095_v11 }
  0xcc   : > { %6745 = vmatpush3.bf16.msra.mxu1 %v7524_v20  ;;  %v4429_v20 = vrot.slane %v4427_v9, 3  ;;  %v1594_v9 = vrot.slane %v7539_v55, 1 }
  0xcd   : > { %6746 = vmatprep.subr.bf16.mxu1 %v7530_v33  ;;  %v4449_v1 = vsel %vm4369_vm4, %v4439_v34, %v4448_v53 }
  0xce   : > { %6711 = vmatmul.mubr.bf16.gmra.mrb[12].mxu1 %v1575_v36  ;;  %v4454_v36 = vshll.u32 %v7538_v16, 16 }
  0xcf   : > { %6939 = vmatmul.mubr.bf16.gmra.mrb[32].mxu0 %v3870_v38  ;;  %6714 = vmatprep.mubr.bf16.mxu1 %v1577_v39  ;;  %v8099_v38 = vld [vmem:[%s7693_s20 + $0x88] sm:$0xff]   ;;  %v7540_v39 = vld [vmem:[%s7693_s20 + $0x60] sm:$0xff]  }
  0xd0   : > { %6958 = vmatprep.mubr.bf16.mxu0 %v4386_v44  ;;  %6747 = vmatpush3.bf16.msra.mxu1 %v7530_v33  ;;  %v4430_v33 = vor.u32 %v4429_v20, %v4426_v19  ;;  %v1589_v44 = vsel %vm1558_vm3, %v1586_v27, %v1588_v28  ;;  %v4456_v48 = vrot.slane %v4454_v36, 3  ;;  %v4460_v50 = vshrl.u32 %v7540_v39, 16  ;;  %v7548_v20 = vld [vmem:[%s7693_s20 + $0x20] sm:$0xff]   ;;  %v7554_v27 = vld [vmem:[%s7693_s20 + $0x88] sm:$0xff]  }
  0xd1   : > { %6748 = vmatprep.subr.bf16.mxu1 %v7537_v46  ;;  %v4463_v52 = vshll.u32 %v7540_v39, 16  ;;  %v1592_v54 = vrot.slane %v8099_v38, 1  ;;  %v4505_v36 = vshrl.u32 %v7554_v27, 16  ;;  %v2099_v38 = vrot.slane %v7548_v20, 1  ;;  %v7563_v20 = vld [vmem:[%s7693_s20 + $0x50] sm:$0xff]  }
  0xd2   : > { %v4431_v43 = vsel %vm4369_vm4, %v4421_v12, %v4430_v33  ;;  %v4440_v47 = vsel %vm4369_vm4, %v4430_v33, %v4439_v34  ;;  %v4457_v56 = vor.u32 %v4456_v48, %v4453_v45  ;;  %v4478_v12 = vshrl.u32 %v7546_v0, 16 }
  0xd4   : > { %6749 = vmatpush3.bf16.msra.mxu1 %v7537_v46  ;;  %v7544_v46 = vld [vmem:[%s7693_s20 + $0x68] sm:$0xff]   ;;  %v4458_v6 = vsel %vm4369_vm4, %v4448_v53, %v4457_v56  ;;  %v4480_v19 = vrot.slane %v4478_v12, 2  ;;  %v4514_v53 = vshrl.u32 %v7556_v41, 16 }
  0xd5   : > { %7046 = vmatprep.subr.bf16.mxu1 %v8072_v3  ;;  %v4472_v58 = vshll.u32 %v7544_v46, 16 }
  0xd6   : > { %6715 = vmatmul.mubr.bf16.gmra.mrb[16].mxu1 %v1579_v23  ;;  %v4469_v23 = vshrl.u32 %v7544_v46, 16 }
  0xd7   : > { %6959 = vmatmul.mubr.bf16.vlgmr.msra.gmra.mrb[0].mxu0 %v4395_v59  ;;  %6718 = vmatprep.mubr.bf16.mxu1 %v1581_v60  ;;  %v7557_v59 = vld [vmem:[%s8381_s1 + $0x230] sm:$0xff]   ;;  %v4462_v60 = vrot.slane %v4460_v50, 2  ;;  %v4474_v7 = vrot.slane %v4472_v58, 3 }
  0xd8   : > { %6962 = vmatprep.mubr.bf16.mxu0 %v4404_v63  ;;  %6995 = vmatpush3.bf16.msra.mxu0 %v7990_v24  ;;  %v1585_v24 = vsel %vm1558_vm3, %v1582_v4, %v1584_v5  ;;  %v4465_v63 = vrot.slane %v4463_v52, 3  ;;  %v4471_v4 = vrot.slane %v4469_v23, 2  ;;  %v7549_v5 = vld [vmem:[%s7693_s20 + $0x78] sm:$0xff]   ;;  %v4517_v23 = vshll.u32 %v7556_v41, 16  ;;  %v7569_v41 = vld [vmem:[%s7693_s20 + $0x28] sm:$0xff]  }
  0xd9   : > { %6996 = vmatprep.subr.bf16.mxu0 %v7529_v2  ;;  %v4487_v16 = vshrl.u32 %v7549_v5, 16 }
  0xda   : > { %v4466_v13 = vor.u32 %v4465_v63, %v4462_v60  ;;  %v4475_v15 = vor.u32 %v4474_v7, %v4471_v4  ;;  %v7555_v60 = vld [vmem:[%s7693_s20 + $0x38] sm:$0xff]   ;;  %v7558_v4 = vld [vmem:[%s7693_s20 + $0x40] sm:$0xff]  }
  0xdb   : > { %v4489_v29 = vrot.slane %v4487_v16, 2  ;;  %v2107_v10 = vrot.slane %v7558_v4, 1  ;;  %v7560_v16 = vld [vmem:[%s7693_s20 + $0x48] sm:$0xff]  }
  0xdc   : > { %6997 = vmatpush3.bf16.msra.mxu0 %v7529_v2  ;;  %v1593_v2 = vsel %vm1558_vm3, %v1590_v51, %v1592_v54  ;;  %v4467_v22 = vsel %vm4369_vm4, %v4457_v56, %v4466_v13  ;;  %v4476_v28 = vsel %vm4369_vm4, %v4466_v13, %v4475_v15  ;;  %v7603_v56 = vld [vmem:[%s8381_s1 + $0x108] sm:$0xff]  }
  0xdd   : > { %6998 = vmatprep.subr.bf16.mxu0 %v7535_v14 }
  0xde   : > { %6719 = vmatmul.mubr.bf16.gmra.mrb[20].mxu1 %v1583_v17  ;;  %v4490_v17 = vshll.u32 %v7549_v5, 16 }
  0xdf   : > { %6963 = vmatmul.mubr.bf16.gmra.mrb[4].mxu0 %v4413_v18  ;;  %6722 = vmatprep.mubr.bf16.mxu1 %v1585_v24  ;;  %v7545_v18 = vld [vmem:[%s7693_s20 + $0x18] sm:$0xff]   ;;  %v1595_v24 = vsel %vm1558_vm3, %v1592_v54, %v1594_v9 }
  0xe0   : > { %6966 = vmatprep.mubr.bf16.mxu0 %v4422_v21  ;;  %6999 = vmatpush3.bf16.msra.mxu0 %v7535_v14  ;;  %v4481_v14 = vshll.u32 %v7546_v0, 16  ;;  %v7551_v21 = vld [vmem:[%s7693_s20 + $0x80] sm:$0xff]   ;;  %v4492_v30 = vrot.slane %v4490_v17, 3  ;;  %v2097_v32 = vrot.slane %v7545_v18, 1 }
  0xe1   : > { %7000 = vmatprep.subr.bf16.mxu0 %v7541_v26  ;;  %v4496_v33 = vshrl.u32 %v7551_v21, 16  ;;  %v4499_v34 = vshll.u32 %v7551_v21, 16 }
  0xe2   : > { %v4493_v39 = vor.u32 %v4492_v30, %v4489_v29  ;;  %v2098_v42 = vsel %vm1558_vm3, %v2095_v11, %v2097_v32  ;;  %v2100_v50 = vsel %vm1558_vm3, %v2097_v32, %v2099_v38  ;;  %v2111_v29 = vrot.slane %v7563_v20, 1 }
  0xe3   : > { %v4501_v46 = vrot.slane %v4499_v34, 3 }
  0xe4   : > { %7001 = vmatpush3.bf16.msra.mxu0 %v7541_v26  ;;  %v4483_v26 = vrot.slane %v4481_v14, 3  ;;  %v7605_v14 = vld [vmem:[%s8381_s1 + $0x118] sm:$0xff]  }
  0xe5   : > { %7002 = vmatprep.subr.bf16.mxu0 %v7547_v37 }
  0xe6   : > { %6723 = vmatmul.mubr.bf16.gmra.mrb[24].mxu1 %v1587_v40  ;;  %v4484_v35 = vor.u32 %v4483_v26, %v4480_v19  ;;  %v7550_v40 = vld [vmem:[%s7693_s20 + $0x28] sm:$0xff]   ;;  %v7606_v26 = vld [vmem:[%s8381_s1 + $0x120] sm:$0xff]  }
  0xe7   : > { %6967 = vmatmul.mubr.bf16.gmra.mrb[8].mxu0 %v4431_v43  ;;  %6726 = vmatprep.mubr.bf16.mxu1 %v1589_v44  ;;  %v4498_v43 = vrot.slane %v4496_v33, 2  ;;  %v7553_v44 = vld [vmem:[%s7693_s20 + $0x30] sm:$0xff]   ;;  %v2101_v52 = vrot.slane %v7550_v40, 1  ;;  %v7607_v33 = vld [vmem:[%s8381_s1 + $0x128] sm:$0xff]  }
  0xe8   : > { %6970 = vmatprep.mubr.bf16.mxu0 %v4440_v47  ;;  %7003 = vmatpush3.bf16.msra.mxu0 %v7547_v37  ;;  %v4508_v37 = vshll.u32 %v7554_v27, 16  ;;  %v4485_v45 = vsel %vm4369_vm4, %v4475_v15, %v4484_v35  ;;  %v4507_v47 = vrot.slane %v4505_v36, 2  ;;  %v4494_v51 = vsel %vm4369_vm4, %v4484_v35, %v4493_v39  ;;  %v7566_v35 = vld [vmem:[%s7693_s20 + $0x58] sm:$0xff]  }
  0xe9   : > { %7004 = vmatprep.subr.bf16.mxu0 %v7552_v49  ;;  %v4502_v54 = vor.u32 %v4501_v46, %v4498_v43  ;;  %v2103_v55 = vrot.slane %v7553_v44, 1  ;;  %v2102_v61 = vsel %vm1558_vm3, %v2099_v38, %v2101_v52  ;;  %v2109_v27 = vrot.slane %v7560_v16, 1  ;;  %v7567_v38 = vld [vmem:[%s7693_s20 + $0x20] sm:$0xff]  }
  0xea   : > { %v4510_v48 = vrot.slane %v4508_v37, 3  ;;  %v2113_v43 = vrot.slane %v7566_v35, 1  ;;  %v5042_v44 = vrot.slane %v7567_v38, 3  ;;  %v5044_v46 = vrot.slane %v7569_v41, 3 }
  0xeb   : > { %v4503_v63 = vsel %vm4369_vm4, %v4493_v39, %v4502_v54  ;;  %v2104_v0 = vsel %vm1558_vm3, %v2101_v52, %v2103_v55  ;;  %v2110_v34 = vsel %vm1558_vm3, %v2107_v10, %v2109_v27  ;;  %v2112_v37 = vsel %vm1558_vm3, %v2109_v27, %v2111_v29  ;;  %v7568_v39 = vld [vmem:[%s7693_s20 + $0x60] sm:$0xff]   ;;  %v7571_v52 = vld [vmem:[%s7693_s20 + $0x30] sm:$0xff]  }
  0xec   : > { %7005 = vmatpush3.bf16.msra.mxu0 %v7552_v49  ;;  %v7559_v49 = vld [vmem:[%s7693_s20 + $0x98] sm:$0xff]   ;;  %v4511_v57 = vor.u32 %v4510_v48, %v4507_v47  ;;  %v2114_v48 = vsel %vm1558_vm3, %v2111_v29, %v2113_v43 }
  0xed   : > { %7006 = vmatprep.subr.bf16.mxu0 %v7557_v59  ;;  %v4523_v58 = vshrl.u32 %v7559_v49, 16  ;;  %v7609_v47 = vld [vmem:[%s8381_s1 + $0x138] sm:$0xff]  }
  0xee   : > { %6727 = vmatmul.mubr.bf16.gmra.mrb[28].mxu1 %v1591_v62  ;;  %v4516_v62 = vrot.slane %v4514_v53, 2  ;;  %v4512_v5 = vsel %vm4369_vm4, %v4502_v54, %v4511_v57  ;;  %v7572_v53 = vld [vmem:[%s7693_s20 + $0x70] sm:$0xff]   ;;  %v5045_v54 = vsel %vm5038_vm5, %v5042_v44, %v5044_v46 }
  0xef   : > { %6971 = vmatmul.mubr.bf16.gmra.mrb[12].mxu0 %v4449_v1  ;;  %6730 = vmatprep.mubr.bf16.mxu1 %v1593_v2  ;;  %v4519_v1 = vrot.slane %v4517_v23, 3  ;;  %v7604_v2 = vld [vmem:[%s8381_s1 + $0x110] sm:$0xff]  }
  0xf0   : > { %6974 = vmatprep.mubr.bf16.mxu0 %v4458_v6  ;;  %7007 = vmatpush3.bf16.msra.mxu0 %v7557_v59  ;;  %v4526_v59 = vshll.u32 %v7559_v49, 16  ;;  %v4525_v6 = vrot.slane %v4523_v58, 2  ;;  %v7570_v49 = vld [vmem:[%s7693_s20 + $0x68] sm:$0xff]  }
  0xf1   : > { %7008 = vmatprep.subr.bf16.mxu0 %v7562_v8  ;;  %v4520_v9 = vor.u32 %v4519_v1, %v4516_v62  ;;  %v2117_v23 = vrot.slane %v7570_v49, 1  ;;  %v7577_v1 = vld [vmem:[%s7693_s20 + $0x48] sm:$0xff]   ;;  %v7587_v49 = vld [vmem:[%s7693_s20 + $0x70] sm:$0xff]  }
  0xf2   : > { %v4528_v7 = vrot.slane %v4526_v59, 3 }
  0xf3   : > { %v4521_v17 = vsel %vm4369_vm4, %v4511_v57, %v4520_v9  ;;  %v2119_v57 = vrot.slane %v7572_v53, 1 }
  0xf4   : > { %7009 = vmatpush3.bf16.msra.mxu0 %v7562_v8  ;;  %v2105_v8 = vrot.slane %v7555_v60, 1  ;;  %v4529_v11 = vor.u32 %v4528_v7, %v4525_v6  ;;  %v7574_v60 = vld [vmem:[%s7693_s20 + $0x78] sm:$0xff]   ;;  %v5052_v6 = vrot.slane %v7577_v1, 3 }
  0xf5   : > { %v2120_v62 = vsel %vm1558_vm3, %v2117_v23, %v2119_v57 }
  0xf6   : > { %6731 = vmatmul.mubr.bf16.gmra.mrb[32].mxu1 %v1595_v24  ;;  %v2106_v15 = vsel %vm1558_vm3, %v2103_v55, %v2105_v8  ;;  %v2108_v18 = vsel %vm1558_vm3, %v2105_v8, %v2107_v10  ;;  %v4530_v21 = vsel %vm4369_vm4, %v4520_v9, %v4529_v11  ;;  %v7573_v55 = vld [vmem:[%s7693_s20 + $0x38] sm:$0xff]   ;;  %v7578_v8 = vld [vmem:[%s7693_s20 + $0x88] sm:$0xff]  }
  0xf7   : > { %6975 = vmatmul.mubr.bf16.gmra.mrb[16].mxu0 %v4467_v22  ;;  %6750 = vmatprep.mubr.bf16.mxu1 %v2096_v25  ;;  %v7564_v22 = vld [vmem:[%s7693_s20 + $0x10] sm:$0xf8]   ;;  %v7565_v25 = vld [vmem:[%s7693_s20 + $0x18] sm:$0xff]   ;;  %v5048_v58 = vrot.slane %v7573_v55, 3  ;;  %v2125_v16 = vrot.slane %v7578_v8, 1  ;;  %v7593_v8 = vld [vmem:[%s7693_s20 + $0x88] sm:$0xff]  }
  0xf8   : > { %6978 = vmatprep.mubr.bf16.mxu0 %v4476_v28  ;;  %v5039_v30 = vrot.slane %v7564_v22, 3  ;;  %v5040_v32 = vrot.slane %v7565_v25, 3  ;;  %v7582_v22 = vld [vmem:[%s7693_s20 + $0x98] ss:$0 sps:$4 sm:$0x11]  }
  0xf9   : > { %v7586_v25 = vld [vmem:[%s7693_s20 + $0x58] sm:$0xff]   ;;  %v2129_v35 = vrot.slane %v7582_v22, 1  ;;  %v7595_v22 = vld [vmem:[%s7693_s20 + $0x90] sm:$0xff]  }
  0xfa   : > { %v5041_v40 = vsel %vm5038_vm5, %v5039_v30, %v5040_v32 }
  0xfe   : > { %6751 = vmatmul.mubr.bf16.vlgmr.msra.gmra.mrb[0].mxu1 %v2098_v42  ;;  %v7608_v42 = vld [vmem:[%s8381_s1 + $0x130] sm:$0xff]  }
  0xff   : > { %6979 = vmatmul.mubr.bf16.gmra.mrb[20].mxu0 %v4485_v45  ;;  %7054 = vmatpush3.bf16.msra.mxu1 %v8072_v3  ;;  %v7561_v3 = vld [vmem:[%s7693_s20 + $0xa0] ss:$0 sps:$4 sm:$0x77]   ;;  %v2115_v45 = vrot.slane %v7568_v39, 1 }
 0x100   : > { %6754 = vmatprep.mubr.bf16.mxu1 %v2100_v50  ;;  %6982 = vmatprep.mubr.bf16.mxu0 %v4494_v51  ;;  %v4532_v12 = vshrl.u32 %v7561_v3, 16  ;;  %v4535_v13 = vshll.u32 %v7561_v3, 16  ;;  %v5043_v50 = vsel %vm5038_vm5, %v5040_v32, %v5042_v44  ;;  %v7575_v3 = vld [vmem:[%s7693_s20 + $0x40] sm:$0xff]  }
 0x101   : > { %7047 = vmatprep.subr.bf16.mxu1 %v7603_v56  ;;  %v2116_v51 = vsel %vm1558_vm3, %v2113_v43, %v2115_v45  ;;  %v2118_v59 = vsel %vm1558_vm3, %v2115_v45, %v2117_v23  ;;  %v5050_v4 = vrot.slane %v7575_v3, 3  ;;  %v7588_v32 = vld [vmem:[%s7693_s20 + $0x60] sm:$0xff]  }
 0x102   : > { %v4534_v24 = vrot.slane %v4532_v12, 2  ;;  %v4537_v19 = vrot.slane %v4535_v13, 3  ;;  %v7579_v12 = vld [vmem:[%s7693_s20 + $0x50] sm:$0xff]   ;;  %v2732_v41 = vshll.u32 %v7588_v32, 16 }
 0x103   : > { %7055 = vmatpush3.bf16.msra.mxu1 %v7603_v56  ;;  %v5046_v56 = vrot.slane %v7571_v52, 3  ;;  %v5051_v9 = vsel %vm5038_vm5, %v5048_v58, %v5050_v4  ;;  %v7580_v13 = vld [vmem:[%s7693_s20 + $0x90] sm:$0xff]  }
 0x104   : > { %7048 = vmatprep.subr.bf16.mxu1 %v7604_v2  ;;  %v4538_v28 = vor.u32 %v4537_v19, %v4534_v24  ;;  %v7592_v52 = vld [vmem:[%s7693_s20 + $0x70] sm:$0xff]  }
 0x106   : > { %6755 = vmatmul.mubr.bf16.gmra.mrb[4].mxu1 %v2102_v61  ;;  %v4539_v36 = vsel %vm4369_vm4, %v4529_v11, %v4538_v28  ;;  %v5047_v61 = vsel %vm5038_vm5, %v5044_v46, %v5046_v56  ;;  %v7584_v11 = vld [vmem:[%s7693_s20 + $0x50] sm:$0xff]   ;;  %v7583_v28 = vld [vmem:[%s7693_s20 + $0x60] sm:$0xff]   ;;  %v7590_v46 = vld [vmem:[%s7693_s20 + $0x68] sm:$0xff]  }
 0x107   : > { %6983 = vmatmul.mubr.bf16.gmra.mrb[24].mxu0 %v4503_v63  ;;  %6758 = vmatprep.mubr.bf16.mxu1 %v2104_v0  ;;  %v7576_v63 = vld [vmem:[%s7693_s20 + $0x80] sm:$0xff]   ;;  %v5049_v0 = vsel %vm5038_vm5, %v5046_v56, %v5048_v58  ;;  %v2711_v24 = vshrl.u32 %v7584_v11, 16  ;;  %v2714_v19 = vshll.u32 %v7584_v11, 16  ;;  %v5058_v38 = vrot.slane %v7583_v28, 3 }
 0x108   : > { %6986 = vmatprep.mubr.bf16.mxu0 %v4512_v5  ;;  %7056 = vmatpush3.bf16.msra.mxu1 %v7604_v2  ;;  %v2121_v2 = vrot.slane %v7574_v60, 1  ;;  %v2123_v5 = vrot.slane %v7576_v63, 1  ;;  %v2738_v23 = vshrl.u32 %v7590_v46, 16  ;;  %v2741_v56 = vshll.u32 %v7590_v46, 16  ;;  %v7594_v63 = vld [vmem:[%s7693_s20 + $0x78] sm:$0xff]  }
 0x109   : > { %7049 = vmatprep.subr.bf16.mxu1 %v7605_v14  ;;  %v2713_v29 = vrot.slane %v2711_v24, 1  ;;  %v2716_v30 = vrot.slane %v2714_v19, 2  ;;  %v2747_v58 = vshrl.u32 %v7592_v52, 16  ;;  %v7598_v19 = vld [vmem:[%s7693_s20 + $0x88] sm:$0xff]  }
 0x10a   : > { %v2122_v7 = vsel %vm1558_vm3, %v2119_v57, %v2121_v2  ;;  %v2124_v10 = vsel %vm1558_vm3, %v2121_v2, %v2123_v5  ;;  %v5062_v57 = vrot.slane %v7587_v49, 3  ;;  %v2743_v3 = vrot.slane %v2741_v56, 2  ;;  %v7591_v2 = vld [vmem:[%s7693_s20 + $0x80] sm:$0xff]  }
 0x10b   : > { %v2717_v39 = vor.u32 %v2716_v30, %v2713_v29  ;;  %v7597_v29 = vld [vmem:[%s7693_s20 + $0x98] sm:$0xff]  }
 0x10c   : > { %7057 = vmatpush3.bf16.msra.mxu1 %v7605_v14  ;;  %v5053_v14 = vsel %vm5038_vm5, %v5050_v4, %v5052_v6  ;;  %v2749_v4 = vrot.slane %v2747_v58, 1 }
 0x10d   : > { %7050 = vmatprep.subr.bf16.mxu1 %v7606_v26 }
 0x10e   : > { %6759 = vmatmul.mubr.bf16.gmra.mrb[8].mxu1 %v2106_v15  ;;  %v7581_v15 = vld [vmem:[%s7693_s20 + $0x58] sm:$0xff]  }
 0x10f   : > { %6987 = vmatmul.mubr.bf16.gmra.mrb[28].mxu0 %v4521_v17  ;;  %6762 = vmatprep.mubr.bf16.mxu1 %v2108_v18  ;;  %v5054_v17 = vrot.slane %v7579_v12, 3  ;;  %v2127_v18 = vrot.slane %v7580_v13, 1  ;;  %v5056_v20 = vrot.slane %v7581_v15, 3  ;;  %v2759_v12 = vshll.u32 %v7594_v63, 16 }
 0x110   : > { %6990 = vmatprep.mubr.bf16.mxu0 %v4530_v21  ;;  %7058 = vmatpush3.bf16.msra.mxu1 %v7606_v26  ;;  %v2126_v21 = vsel %vm1558_vm3, %v2123_v5, %v2125_v16  ;;  %v5066_v13 = vrot.slane %v7591_v2, 3 }
 0x111   : > { %7051 = vmatprep.subr.bf16.mxu1 %v7607_v33  ;;  %v5055_v26 = vsel %vm5038_vm5, %v5052_v6, %v5054_v17  ;;  %v2128_v27 = vsel %vm1558_vm3, %v2125_v16, %v2127_v18  ;;  %v2130_v43 = vsel %vm1558_vm3, %v2127_v18, %v2129_v35  ;;  %v7596_v6 = vld [vmem:[%s7693_s20 + $0x80] sm:$0xff]   ;;  %v5068_v16 = vrot.slane %v7593_v8, 3 }
 0x112   : > { %v2768_v15 = vshll.u32 %v7596_v6, 16  ;;  %v2761_v24 = vrot.slane %v2759_v12, 2 }
 0x113   : > { %v5069_v28 = vsel %vm5038_vm5, %v5066_v13, %v5068_v16 }
 0x114   : > { %7059 = vmatpush3.bf16.msra.mxu1 %v7607_v33  ;;  %v5057_v33 = vsel %vm5038_vm5, %v5054_v17, %v5056_v20 }
 0x115   : > { %7052 = vmatprep.subr.bf16.mxu1 %v7608_v42 }
 0x116   : > { %6763 = vmatmul.mubr.bf16.gmra.mrb[12].mxu1 %v2110_v34  ;;  %v7585_v34 = vld [vmem:[%s7693_s20 + $0x68] sm:$0xff]  }
 0x117   : > { %6991 = vmatmul.mubr.bf16.gmra.mrb[32].mxu0 %v4539_v36  ;;  %6766 = vmatprep.mubr.bf16.mxu1 %v2112_v37  ;;  %v2720_v36 = vshrl.u32 %v7586_v25, 16  ;;  %v2723_v37 = vshll.u32 %v7586_v25, 16 }
 0x118   : > { %7010 = vmatprep.mubr.bf16.mxu0 %v5041_v40  ;;  %7060 = vmatpush3.bf16.msra.mxu1 %v7608_v42  ;;  %v2729_v40 = vshrl.u32 %v7588_v32, 16  ;;  %v5060_v42 = vrot.slane %v7585_v34, 3  ;;  %v2774_v32 = vshrl.u32 %v7598_v19, 16  ;;  %v5070_v34 = vrot.slane %v7595_v22, 3 }
 0x119   : > { %7053 = vmatprep.subr.bf16.mxu1 %v7609_v47  ;;  %v2722_v44 = vrot.slane %v2720_v36, 1  ;;  %v2725_v45 = vrot.slane %v2723_v37, 2 }
 0x11a   : > { %v5061_v53 = vsel %vm5038_vm5, %v5058_v38, %v5060_v42 }
 0x11b   : > { %v2726_v55 = vor.u32 %v2725_v45, %v2722_v44  ;;  %v7599_v45 = vld [vmem:[%s7693_s20 + $0xa0] ss:$0 sps:$4 sm:$0x77]  }
 0x11c   : > { %7061 = vmatpush3.bf16.msra.mxu1 %v7609_v47  ;;  %v5059_v47 = vsel %vm5038_vm5, %v5056_v20, %v5058_v38  ;;  %v5072_v38 = vrot.slane %v7597_v29, 3 }
 0x11e   : > { %6767 = vmatmul.mubr.bf16.gmra.mrb[16].mxu1 %v2114_v48  ;;  %v2718_v48 = vsel %vm2629_vm0, %v7762_v31, %v2717_v39 }
 0x11f   : > { %7011 = vmatmul.mubr.bf16.vlgmr.msra.gmra.mrb[0].mxu0 %v5043_v50  ;;  %6770 = vmatprep.mubr.bf16.mxu1 %v2116_v51  ;;  %v2731_v50 = vrot.slane %v2729_v40, 1  ;;  %v2734_v51 = vrot.slane %v2732_v41, 2  ;;  %v2776_v40 = vrot.slane %v2774_v32, 1 }
 0x120   : > { %7014 = vmatprep.mubr.bf16.mxu0 %v5045_v54  ;;  %v7589_v54 = vld [vmem:[%s7693_s20 + $0x78] sm:$0xff]  }
 0x121   : > { %v2735_v31 = vor.u32 %v2734_v51, %v2731_v50  ;;  %v5064_v60 = vrot.slane %v7589_v54, 3 }
 0x123   : > { %v2736_v1 = vsel %vm2629_vm0, %v2726_v55, %v2735_v31  ;;  %v5067_v20 = vsel %vm5038_vm5, %v5064_v60, %v5066_v13  ;;  %v8269_v13 = vld [vmem:[%s8382_s2] ss:$0 sm:$0xff] }
 0x126   : > { %6771 = vmatmul.mubr.bf16.gmra.mrb[20].mxu1 %v2118_v59  ;;  %v2750_v59 = vshll.u32 %v7592_v52, 16  ;;  %v5074_v52 = vrot.slane %v7599_v45, 3 }
 0x127   : > { %7015 = vmatmul.mubr.bf16.gmra.mrb[4].mxu0 %v5047_v61  ;;  %6774 = vmatprep.mubr.bf16.mxu1 %v2120_v62  ;;  %v2727_v61 = vsel %vm2629_vm0, %v2717_v39, %v2726_v55  ;;  %v2740_v62 = vrot.slane %v2738_v23, 1 }
 0x128   : > { %7018 = vmatprep.mubr.bf16.mxu0 %v5049_v0  ;;  %v5063_v0 = vsel %vm5038_vm5, %v5060_v42, %v5062_v57  ;;  %v2752_v5 = vrot.slane %v2750_v59, 2  ;;  %v7601_v42 = vld [vmem:[%s7693_s20 + $0x98] ss:$0 sps:$4 sm:$0x33]   ;;  %v5075_v56 = vsel %vm5038_vm5, %v5072_v38, %v5074_v52 }
 0x129   : > { %v2792_v50 = vshrl.u32 %v7601_v42, 16  ;;  %v2795_v51 = vshll.u32 %v7601_v42, 16 }
 0x12a   : > { %v2753_v11 = vor.u32 %v2752_v5, %v2749_v4 }
 0x12b   : > { %v2794_v55 = vrot.slane %v2792_v50, 1  ;;  %v2797_v23 = vrot.slane %v2795_v51, 2 }
 0x12e   : > { %6775 = vmatmul.mubr.bf16.gmra.mrb[24].mxu1 %v2122_v7  ;;  %v5065_v7 = vsel %vm5038_vm5, %v5062_v57, %v5064_v60 }
 0x12f   : > { %7019 = vmatmul.mubr.bf16.gmra.mrb[8].mxu0 %v5051_v9  ;;  %6778 = vmatprep.mubr.bf16.mxu1 %v2124_v10  ;;  %v2744_v9 = vor.u32 %v2743_v3, %v2740_v62  ;;  %v2756_v10 = vshrl.u32 %v7594_v63, 16 }
 0x130   : > { %7022 = vmatprep.mubr.bf16.mxu0 %v5053_v14  ;;  %v2765_v14 = vshrl.u32 %v7596_v6, 16 }
 0x131   : > { %v2745_v17 = vsel %vm2629_vm0, %v2735_v31, %v2744_v9  ;;  %v2758_v18 = vrot.slane %v2756_v10, 1  ;;  %v2798_v31 = vor.u32 %v2797_v23, %v2794_v55 }
 0x132   : > { %v2767_v25 = vrot.slane %v2765_v14, 1 }
 0x133   : > { %v2762_v30 = vor.u32 %v2761_v24, %v2758_v18 }
 0x135   : > { %v2763_v39 = vsel %vm2629_vm0, %v2753_v11, %v2762_v30 }
 0x136   : > { %6779 = vmatmul.mubr.bf16.gmra.mrb[28].mxu1 %v2126_v21  ;;  %v2754_v21 = vsel %vm2629_vm0, %v2744_v9, %v2753_v11 }
 0x137   : > { %7023 = vmatmul.mubr.bf16.gmra.mrb[12].mxu0 %v5055_v26  ;;  %6782 = vmatprep.mubr.bf16.mxu1 %v2128_v27  ;;  %v2770_v26 = vrot.slane %v2768_v15, 2  ;;  %v7600_v27 = vld [vmem:[%s7693_s20 + $0x90] sm:$0xff]   ;;  %v8274_v15 = vld [vmem:[%s8383_s3] ss:$0 sm:$0xff] }
 0x138   : > { %7026 = vmatprep.mubr.bf16.mxu0 %v5057_v33  ;;  %v2777_v33 = vshll.u32 %v7598_v19, 16  ;;  %v2783_v36 = vshrl.u32 %v7600_v27, 16  ;;  %v2786_v37 = vshll.u32 %v7600_v27, 16 }
 0x139   : > { %v2771_v35 = vor.u32 %v2770_v26, %v2767_v25 }
 0x13a   : > { %v2779_v41 = vrot.slane %v2777_v33, 2  ;;  %v2785_v46 = vrot.slane %v2783_v36, 1 }
 0x13b   : > { %v2772_v44 = vsel %vm2629_vm0, %v2762_v30, %v2771_v35 }
 0x13c   : > { %v2780_v49 = vor.u32 %v2779_v41, %v2776_v40 }
 0x13e   : > { %6783 = vmatmul.mubr.bf16.gmra.mrb[32].mxu1 %v2130_v43  ;;  %v5071_v43 = vsel %vm5038_vm5, %v5068_v16, %v5070_v34  ;;  %v2781_v54 = vsel %vm2629_vm0, %v2771_v35, %v2780_v49 }
 0x13f   : > { %7027 = vmatmul.mubr.bf16.gmra.mrb[16].mxu0 %v5059_v47  ;;  %6818 = vmatprep.mubr.bf16.mxu1 %v2718_v48  ;;  %v2788_v47 = vrot.slane %v2786_v37, 2  ;;  %v5073_v48 = vsel %vm5038_vm5, %v5070_v34, %v5072_v38 }
 0x140   : > { %7030 = vmatprep.mubr.bf16.mxu0 %v5061_v53 }
 0x141   : > { %v2789_v53 = vor.u32 %v2788_v47, %v2785_v46 }
 0x143   : > { %v2790_v57 = vsel %vm2629_vm0, %v2780_v49, %v2789_v53  ;;  %v2799_v58 = vsel %vm2629_vm0, %v2789_v53, %v2798_v31 }
 0x146   : > { %6819 = vmatmul.mubr.bf16.vlgmr.msra.gmra.mrb[16].mxu1 %v2727_v61 }
 0x147   : > { %7031 = vmatmul.mubr.bf16.gmra.mrb[20].mxu0 %v5063_v0  ;;  %6822 = vmatprep.mubr.bf16.mxu1 %v2736_v1 }
 0x148   : > { %7034 = vmatprep.mubr.bf16.mxu0 %v5065_v7 }
 0x14e   : > { %6823 = vmatmul.mubr.bf16.gmra.mrb[20].mxu1 %v2745_v17 }
 0x14f   : > { %7035 = vmatmul.mubr.bf16.gmra.mrb[24].mxu0 %v5067_v20  ;;  %6826 = vmatprep.mubr.bf16.mxu1 %v2754_v21 }
 0x150   : > { %7038 = vmatprep.mubr.bf16.mxu0 %v5069_v28 }
 0x156   : > { %6827 = vmatmul.mubr.bf16.gmra.mrb[24].mxu1 %v2763_v39 }
 0x157   : > { %7039 = vmatmul.mubr.bf16.gmra.mrb[28].mxu0 %v5071_v43  ;;  %6830 = vmatprep.mubr.bf16.mxu1 %v2772_v44 }
 0x158   : > { %7042 = vmatprep.mubr.bf16.mxu0 %v5073_v48 }
 0x15e   : > { %6831 = vmatmul.mubr.bf16.gmra.mrb[28].mxu1 %v2781_v54 }
 0x15f   : > { %7043 = vmatmul.mubr.bf16.gmra.mrb[32].mxu0 %v5075_v56  ;;  %6834 = vmatprep.mubr.bf16.mxu1 %v2790_v57 }
 0x166   : > { %6835 = vmatmul.mubr.bf16.gmra.mrb[32].mxu1 %v2799_v58 }
 0x1d1   : > { %v6752_v59 = vpop.f32.mrb[0].mxu1 }
 0x1d2   : > { %v2231_v60 = vpop.f32.mrb[1].mxu1 }
 0x1d3   : > { %v6753_v61 = vpop.f32.mrb[2].mxu1 }
 0x1d4   : > { %v2234_v62 = vpop.f32.mrb[3].mxu1 }
 0x1d9   : > { %v6756_v3 = vpop.f32.mrb[4].mxu1 }
 0x1da   : > { %v2247_v63 = vpop.f32.mrb[5].mxu1 }
 0x1db   : > { %v6757_v0 = vpop.f32.mrb[6].mxu1 }
 0x1dc   : > { %v2250_v1 = vpop.f32.mrb[7].mxu1 }
 0x1e1   : > { %v6760_v2 = vpop.f32.mrb[8].mxu1 }
 0x1e2   : > { %v2263_v4 = vpop.f32.mrb[9].mxu1 }
 0x1e3   : > { %v6761_v5 = vpop.f32.mrb[10].mxu1 }
 0x1e4   : > { %v8256_v6 = vpop.f32.mrb[11].mxu1 }
 0x1e9   : > { %v8258_v7 = vpop.f32.mrb[12].mxu1 }
 0x1ea   : > { %v8260_v8 = vpop.f32.mrb[13].mxu1 }
 0x1eb   : > { %v8262_v9 = vpop.f32.mrb[14].mxu1 }
 0x1ec   : > { %v8264_v10 = vpop.f32.mrb[15].mxu1 }
 0x1f2   : > { %v7012_v12 = vpop.f32.mrb[0].mxu0 }
 0x1f3   : > { %v7062_v11 = vadd.f32 %v7012_v12, %v6752_v59  ;;  %v5176_v14 = vpop.f32.mrb[1].mxu0 }
 0x1f4   : > { %v7063_v16 = vadd.f32 %v5176_v14, %v2231_v60  ;;  %v7013_v17 = vpop.f32.mrb[2].mxu0 }
 0x1f5   : > { %v5436_v18 = vmul.f32 %v7062_v11, %v8269_v13  ;;  %v7064_v24 = vadd.f32 %v7013_v17, %v6753_v61  ;;  %v5179_v19 = vpop.f32.mrb[3].mxu0 }
 0x1f6   : > { %v5434_v20 = vmul.f32 %v7063_v16, %v8269_v13  ;;  %v7065_v21 = vadd.f32 %v5179_v19, %v2234_v62 }
 0x1f7   : > { %v5479_v22 = vadd.f32 %v8274_v15, %v5436_v18  ;;  %v5437_v25 = vmul.f32 %v7064_v24, %v8269_v13 }
 0x1f8   : > { %v5477_v26 = vadd.f32 %v8274_v15, %v5434_v20  ;;  %v5435_v27 = vmul.f32 %v7065_v21, %v8269_v13 }
 0x1f9   : > { %v5480_v28 = vadd.f32 %v8274_v15, %v5437_v25  ;;  %v5515_v32 = vmax.f32 %v5479_v22, 0.0 }
 0x1fa   : > { %v5478_v29 = vadd.f32 %v8274_v15, %v5435_v27  ;;  %v7016_v30 = vpop.f32.mrb[4].mxu0  ;;  %v5513_v36 = vmax.f32 %v5477_v26, 0.0 }
 0x1fb   : > { %v5516_v33 = vmax.f32 %v5480_v28, 0.0  ;;  %v7066_v34 = vadd.f32 %v7016_v30, %v6756_v3  ;;  %v5192_v35 = vpop.f32.mrb[5].mxu0 }
 0x1fc   : > { %v5514_v37 = vmax.f32 %v5478_v29, 0.0  ;;  %v7067_v38 = vadd.f32 %v5192_v35, %v2247_v63  ;;  %v7017_v39 = vpop.f32.mrb[6].mxu0 }
 0x1fd   : > { %v6245_v40 = vpack.c.bf16 %v5516_v33, %v5515_v32  ;;  %v5440_v41 = vmul.f32 %v7066_v34, %v8269_v13  ;;  %v7068_v42 = vadd.f32 %v7017_v39, %v6757_v0  ;;  %v5195_v43 = vpop.f32.mrb[7].mxu0 }
 0x1fe   : > { %v6240_v44 = vpack.c.bf16 %v5514_v37, %v5513_v36  ;;  %v5438_v45 = vmul.f32 %v7067_v38, %v8269_v13  ;;  %v7069_v46 = vadd.f32 %v5195_v43, %v2250_v1 }
 0x1ff   : > { %6327 = vst [vmem:[%s8288_s25 + $0x8] sm:$0xff] %v6245_v40   ;;  %v5483_v47 = vadd.f32 %v8274_v15, %v5440_v41  ;;  %v5441_v48 = vmul.f32 %v7068_v42, %v8269_v13 }
 0x200   : > { %6241 = vst [vmem:[%s8288_s25] sm:$0xff] %v6240_v44   ;;  %v5481_v49 = vadd.f32 %v8274_v15, %v5438_v45  ;;  %v5439_v50 = vmul.f32 %v7069_v46, %v8269_v13 }
 0x201   : > { %v5484_v51 = vadd.f32 %v8274_v15, %v5441_v48  ;;  %v5519_v54 = vmax.f32 %v5483_v47, 0.0 }
 0x202   : > { %v5482_v52 = vadd.f32 %v8274_v15, %v5439_v50  ;;  %v7020_v53 = vpop.f32.mrb[8].mxu0  ;;  %v5517_v57 = vmax.f32 %v5481_v49, 0.0 }
 0x203   : > { %v5520_v55 = vmax.f32 %v5484_v51, 0.0  ;;  %v7070_v23 = vadd.f32 %v7020_v53, %v6760_v2  ;;  %v5208_v56 = vpop.f32.mrb[9].mxu0 }
 0x204   : > { %v5518_v31 = vmax.f32 %v5482_v52, 0.0  ;;  %v7071_v58 = vadd.f32 %v5208_v56, %v2263_v4  ;;  %v7021_v59 = vpop.f32.mrb[10].mxu0 }
 0x205   : > { %v6255_v60 = vpack.c.bf16 %v5520_v55, %v5519_v54  ;;  %v5444_v61 = vmul.f32 %v7070_v23, %v8269_v13  ;;  %v7072_v62 = vadd.f32 %v7021_v59, %v6761_v5  ;;  %v5211_v3 = vpop.f32.mrb[11].mxu0 }
 0x206   : > { %v6250_v63 = vpack.c.bf16 %v5518_v31, %v5517_v57  ;;  %v5442_v0 = vmul.f32 %v7071_v58, %v8269_v13  ;;  %v7073_v1 = vadd.f32 %v5211_v3, %v8256_v6 }
 0x207   : > { %6329 = vst [vmem:[%s8288_s25 + $0x18] sm:$0xff] %v6255_v60   ;;  %v5487_v12 = vadd.f32 %v8274_v15, %v5444_v61  ;;  %v5445_v2 = vmul.f32 %v7072_v62, %v8269_v13 }
 0x208   : > { %6328 = vst [vmem:[%s8288_s25 + $0x10] sm:$0xff] %v6250_v63   ;;  %v5485_v11 = vadd.f32 %v8274_v15, %v5442_v0  ;;  %v5443_v4 = vmul.f32 %v7073_v1, %v8269_v13 }
 0x209   : > { %v5488_v14 = vadd.f32 %v8274_v15, %v5445_v2  ;;  %v5523_v17 = vmax.f32 %v5487_v12, 0.0 }
 0x20a   : > { %v5486_v5 = vadd.f32 %v8274_v15, %v5443_v4  ;;  %v7024_v16 = vpop.f32.mrb[12].mxu0  ;;  %v5521_v19 = vmax.f32 %v5485_v11, 0.0 }
 0x20b   : > { %v5524_v18 = vmax.f32 %v5488_v14, 0.0  ;;  %v7074_v6 = vadd.f32 %v7024_v16, %v8258_v7  ;;  %v5224_v24 = vpop.f32.mrb[13].mxu0 }
 0x20c   : > { %v5522_v20 = vmax.f32 %v5486_v5, 0.0  ;;  %v7075_v21 = vadd.f32 %v5224_v24, %v8260_v8  ;;  %v7025_v22 = vpop.f32.mrb[14].mxu0 }
 0x20d   : > { %v6265_v25 = vpack.c.bf16 %v5524_v18, %v5523_v17  ;;  %v5448_v26 = vmul.f32 %v7074_v6, %v8269_v13  ;;  %v7076_v27 = vadd.f32 %v7025_v22, %v8262_v9  ;;  %v5227_v28 = vpop.f32.mrb[15].mxu0 }
 0x20e   : > { %v6260_v29 = vpack.c.bf16 %v5522_v20, %v5521_v19  ;;  %v5446_v30 = vmul.f32 %v7075_v21, %v8269_v13  ;;  %v7077_v32 = vadd.f32 %v5227_v28, %v8264_v10 }
 0x20f   : > { %6331 = vst [vmem:[%s8288_s25 + $0x28] sm:$0xff] %v6265_v25   ;;  %v5491_v7 = vadd.f32 %v8274_v15, %v5448_v26  ;;  %v5449_v33 = vmul.f32 %v7076_v27, %v8269_v13 }
 0x210   : > { %6330 = vst [vmem:[%s8288_s25 + $0x20] sm:$0xff] %v6260_v29   ;;  %v5489_v8 = vadd.f32 %v8274_v15, %v5446_v30  ;;  %v5447_v34 = vmul.f32 %v7077_v32, %v8269_v13 }
 0x211   : > { %v5492_v9 = vadd.f32 %v8274_v15, %v5449_v33  ;;  %v5527_v37 = vmax.f32 %v5491_v7, 0.0 }
 0x212   : > { %v5490_v35 = vadd.f32 %v8274_v15, %v5447_v34  ;;  %v7028_v36 = vpop.f32.mrb[16].mxu0  ;;  %v5525_v39 = vmax.f32 %v5489_v8, 0.0 }
 0x213   : > { %v5528_v38 = vmax.f32 %v5492_v9, 0.0  ;;  %v5240_v10 = vpop.f32.mrb[17].mxu0 }
 0x214   : > { %v5526_v40 = vmax.f32 %v5490_v35, 0.0  ;;  %v7029_v41 = vpop.f32.mrb[18].mxu0 }
 0x215   : > { %v6275_v42 = vpack.c.bf16 %v5528_v38, %v5527_v37  ;;  %v5243_v43 = vpop.f32.mrb[19].mxu0 }
 0x216   : > { %v6270_v44 = vpack.c.bf16 %v5526_v40, %v5525_v39 }
 0x217   : > { %6333 = vst [vmem:[%s8288_s25 + $0x38] sm:$0xff] %v6275_v42  }
 0x218   : > { %6332 = vst [vmem:[%s8288_s25 + $0x30] sm:$0xff] %v6270_v44  }
 0x219   : > { %v6820_v45 = vpop.f32.mrb[16].mxu1 }
 0x21a   : > { %v7078_v46 = vadd.f32 %v7028_v36, %v6820_v45  ;;  %v7032_v47 = vpop.f32.mrb[20].mxu0  ;;  %v2964_v48 = vpop.f32.mrb[17].mxu1 }
 0x21b   : > { %v7079_v49 = vadd.f32 %v5240_v10, %v2964_v48  ;;  %v5256_v50 = vpop.f32.mrb[21].mxu0  ;;  %v6821_v51 = vpop.f32.mrb[18].mxu1 }
 0x21c   : > { %v5452_v52 = vmul.f32 %v7078_v46, %v8269_v13  ;;  %v7080_v53 = vadd.f32 %v7029_v41, %v6821_v51  ;;  %v7033_v54 = vpop.f32.mrb[22].mxu0  ;;  %v2967_v55 = vpop.f32.mrb[19].mxu1 }
 0x21d   : > { %v5450_v23 = vmul.f32 %v7079_v49, %v8269_v13  ;;  %v7081_v56 = vadd.f32 %v5243_v43, %v2967_v55  ;;  %v5259_v57 = vpop.f32.mrb[23].mxu0 }
 0x21e   : > { %v5495_v31 = vadd.f32 %v8274_v15, %v5452_v52  ;;  %v5453_v58 = vmul.f32 %v7080_v53, %v8269_v13 }
 0x21f   : > { %v5493_v59 = vadd.f32 %v8274_v15, %v5450_v23  ;;  %v5451_v60 = vmul.f32 %v7081_v56, %v8269_v13 }
 0x220   : > { %v5496_v61 = vadd.f32 %v8274_v15, %v5453_v58  ;;  %v5531_v63 = vmax.f32 %v5495_v31, 0.0 }
 0x221   : > { %v5494_v62 = vadd.f32 %v8274_v15, %v5451_v60  ;;  %v6824_v3 = vpop.f32.mrb[20].mxu1  ;;  %v5529_v11 = vmax.f32 %v5493_v59, 0.0 }
 0x222   : > { %v5532_v0 = vmax.f32 %v5496_v61, 0.0  ;;  %v7082_v1 = vadd.f32 %v7032_v47, %v6824_v3  ;;  %v7036_v12 = vpop.f32.mrb[24].mxu0  ;;  %v2980_v2 = vpop.f32.mrb[21].mxu1 }
 0x223   : > { %v5530_v4 = vmax.f32 %v5494_v62, 0.0  ;;  %v7083_v14 = vadd.f32 %v5256_v50, %v2980_v2  ;;  %v5272_v5 = vpop.f32.mrb[25].mxu0  ;;  %v6825_v16 = vpop.f32.mrb[22].mxu1 }
 0x224   : > { %v6285_v17 = vpack.c.bf16 %v5532_v0, %v5531_v63  ;;  %v5456_v18 = vmul.f32 %v7082_v1, %v8269_v13  ;;  %v7084_v6 = vadd.f32 %v7033_v54, %v6825_v16  ;;  %v7037_v24 = vpop.f32.mrb[26].mxu0  ;;  %v2983_v19 = vpop.f32.mrb[23].mxu1 }
 0x225   : > { %v6280_v20 = vpack.c.bf16 %v5530_v4, %v5529_v11  ;;  %v5454_v21 = vmul.f32 %v7083_v14, %v8269_v13  ;;  %v7085_v22 = vadd.f32 %v5259_v57, %v2983_v19  ;;  %v5275_v25 = vpop.f32.mrb[27].mxu0 }
 0x226   : > { %6335 = vst [vmem:[%s8288_s25 + $0x48] sm:$0xff] %v6285_v17   ;;  %v5499_v26 = vadd.f32 %v8274_v15, %v5456_v18  ;;  %v5457_v27 = vmul.f32 %v7084_v6, %v8269_v13 }
 0x227   : > { %6334 = vst [vmem:[%s8288_s25 + $0x40] sm:$0xff] %v6280_v20   ;;  %v5497_v28 = vadd.f32 %v8274_v15, %v5454_v21  ;;  %v5455_v29 = vmul.f32 %v7085_v22, %v8269_v13 }
 0x228   : > { %v5500_v30 = vadd.f32 %v8274_v15, %v5457_v27  ;;  %v5535_v33 = vmax.f32 %v5499_v26, 0.0 }
 0x229   : > { %v5498_v32 = vadd.f32 %v8274_v15, %v5455_v29  ;;  %v6828_v7 = vpop.f32.mrb[24].mxu1  ;;  %v5533_v36 = vmax.f32 %v5497_v28, 0.0 }
 0x22a   : > { %v5536_v8 = vmax.f32 %v5500_v30, 0.0  ;;  %v7086_v34 = vadd.f32 %v7036_v12, %v6828_v7  ;;  %v7040_v9 = vpop.f32.mrb[28].mxu0  ;;  %v2996_v35 = vpop.f32.mrb[25].mxu1 }
 0x22b   : > { %v5534_v37 = vmax.f32 %v5498_v32, 0.0  ;;  %v7087_v38 = vadd.f32 %v5272_v5, %v2996_v35  ;;  %v5288_v10 = vpop.f32.mrb[29].mxu0  ;;  %v6829_v39 = vpop.f32.mrb[26].mxu1 }
 0x22c   : > { %v6295_v40 = vpack.c.bf16 %v5536_v8, %v5535_v33  ;;  %v5460_v41 = vmul.f32 %v7086_v34, %v8269_v13  ;;  %v7088_v42 = vadd.f32 %v7037_v24, %v6829_v39  ;;  %v7041_v43 = vpop.f32.mrb[30].mxu0  ;;  %v2999_v44 = vpop.f32.mrb[27].mxu1 }
 0x22d   : > { %v6290_v45 = vpack.c.bf16 %v5534_v37, %v5533_v36  ;;  %v5458_v46 = vmul.f32 %v7087_v38, %v8269_v13  ;;  %v7089_v47 = vadd.f32 %v5275_v25, %v2999_v44  ;;  %v5291_v48 = vpop.f32.mrb[31].mxu0 }
 0x22e   : > { %6337 = vst [vmem:[%s8288_s25 + $0x58] sm:$0xff] %v6295_v40   ;;  %v5503_v49 = vadd.f32 %v8274_v15, %v5460_v41  ;;  %v5461_v50 = vmul.f32 %v7088_v42, %v8269_v13 }
 0x22f   : > { %6336 = vst [vmem:[%s8288_s25 + $0x50] sm:$0xff] %v6290_v45   ;;  %v5501_v51 = vadd.f32 %v8274_v15, %v5458_v46  ;;  %v5459_v52 = vmul.f32 %v7089_v47, %v8269_v13 }
 0x230   : > { %v5504_v53 = vadd.f32 %v8274_v15, %v5461_v50  ;;  %v5539_v23 = vmax.f32 %v5503_v49, 0.0 }
 0x231   : > { %v5502_v54 = vadd.f32 %v8274_v15, %v5459_v52  ;;  %v6832_v55 = vpop.f32.mrb[28].mxu1  ;;  %v5537_v59 = vmax.f32 %v5501_v51, 0.0 }
 0x232   : > { %v5540_v56 = vmax.f32 %v5504_v53, 0.0  ;;  %v7090_v57 = vadd.f32 %v7040_v9, %v6832_v55  ;;  %v7044_v31 = vpop.f32.mrb[32].mxu0  ;;  %v3012_v58 = vpop.f32.mrb[29].mxu1 }
 0x233   : > { %v5538_v60 = vmax.f32 %v5502_v54, 0.0  ;;  %v7091_v61 = vadd.f32 %v5288_v10, %v3012_v58  ;;  %v5304_v62 = vpop.f32.mrb[33].mxu0  ;;  %v6833_v3 = vpop.f32.mrb[30].mxu1 }
 0x234   : > { %v6305_v63 = vpack.c.bf16 %v5540_v56, %v5539_v23  ;;  %v5464_v0 = vmul.f32 %v7090_v57, %v8269_v13  ;;  %v7092_v1 = vadd.f32 %v7041_v43, %v6833_v3  ;;  %v7045_v12 = vpop.f32.mrb[34].mxu0  ;;  %v3015_v2 = vpop.f32.mrb[31].mxu1 }
 0x235   : > { %v6300_v11 = vpack.c.bf16 %v5538_v60, %v5537_v59  ;;  %v5462_v4 = vmul.f32 %v7091_v61, %v8269_v13  ;;  %v7093_v14 = vadd.f32 %v5291_v48, %v3015_v2  ;;  %v5307_v5 = vpop.f32.mrb[35].mxu0 }
 0x236   : > { %6339 = vst [vmem:[%s8288_s25 + $0x68] sm:$0xff] %v6305_v63   ;;  %v5507_v16 = vadd.f32 %v8274_v15, %v5464_v0  ;;  %v5465_v17 = vmul.f32 %v7092_v1, %v8269_v13 }
 0x237   : > { %6338 = vst [vmem:[%s8288_s25 + $0x60] sm:$0xff] %v6300_v11   ;;  %v5505_v18 = vadd.f32 %v8274_v15, %v5462_v4  ;;  %v5463_v6 = vmul.f32 %v7093_v14, %v8269_v13 }
 0x238   : > { %v5508_v24 = vadd.f32 %v8274_v15, %v5465_v17  ;;  %v5543_v21 = vmax.f32 %v5507_v16, 0.0 }
 0x239   : > { %v5506_v19 = vadd.f32 %v8274_v15, %v5463_v6  ;;  %v6836_v20 = vpop.f32.mrb[32].mxu1  ;;  %v5541_v27 = vmax.f32 %v5505_v18, 0.0 }
 0x23a   : > { %v5544_v22 = vmax.f32 %v5508_v24, 0.0  ;;  %v7094_v25 = vadd.f32 %v7044_v31, %v6836_v20  ;;  %v3028_v26 = vpop.f32.mrb[33].mxu1 }
 0x23b   : > { %v5542_v28 = vmax.f32 %v5506_v19, 0.0  ;;  %v7095_v29 = vadd.f32 %v5304_v62, %v3028_v26  ;;  %v6837_v30 = vpop.f32.mrb[34].mxu1 }
 0x23c   : > { %v6315_v32 = vpack.c.bf16 %v5544_v22, %v5543_v21  ;;  %v5468_v7 = vmul.f32 %v7094_v25, %v8269_v13  ;;  %v7096_v33 = vadd.f32 %v7045_v12, %v6837_v30  ;;  %v3031_v8 = vpop.f32.mrb[35].mxu1 }
 0x23d   : > { %v6310_v34 = vpack.c.bf16 %v5542_v28, %v5541_v27  ;;  %v5466_v9 = vmul.f32 %v7095_v29, %v8269_v13  ;;  %v7097_v35 = vadd.f32 %v5307_v5, %v3031_v8 }
 0x23e   : > { %6341 = vst [vmem:[%s8288_s25 + $0x78] sm:$0xff] %v6315_v32   ;;  %v5511_v36 = vadd.f32 %v8274_v15, %v5468_v7  ;;  %v5469_v37 = vmul.f32 %v7096_v33, %v8269_v13 }
 0x23f   : > { %6340 = vst [vmem:[%s8288_s25 + $0x70] sm:$0xff] %v6310_v34   ;;  %v5509_v38 = vadd.f32 %v8274_v15, %v5466_v9  ;;  %v5467_v10 = vmul.f32 %v7097_v35, %v8269_v13 }
 0x240   : > { %v5512_v39 = vadd.f32 %v8274_v15, %v5469_v37  ;;  %v5547_v41 = vmax.f32 %v5511_v36, 0.0 }
 0x241   : > { %v5510_v40 = vadd.f32 %v8274_v15, %v5467_v10  ;;  %v5545_v43 = vmax.f32 %v5509_v38, 0.0 }
 0x242   : > { %v5548_v42 = vmax.f32 %v5512_v39, 0.0 }
 0x243   : > { %v5546_v44 = vmax.f32 %v5510_v40, 0.0 }
 0x244   : > { %v6325_v45 = vpack.c.bf16 %v5548_v42, %v5547_v41 }
 0x245   : > { %v6320_v46 = vpack.c.bf16 %v5546_v44, %v5545_v43 }
 0x246   : > { %6343 = vst [vmem:[%s8288_s25 + $0x88] sm:$0xff] %v6325_v45  }
 0x247   : > { %6342 = vst [vmem:[%s8288_s25 + $0x80] sm:$0xff] %v6320_v46  }
 0x248 PF: > { %s14_s15 = sadd.s32 1, %s7616_s15  }
 0x249   : > { %p11_p4 = scmp.ge.s32.totalorder %s14_s15, 4  }
 0x24b   :  { %13 = sbr.rel (!%p11_p4) target bundleno = 1 (0x1), region = 74 }

</bundles_post_ra>
